<compile_context>
chip_gen: v6e
topology: v6e:2x2x1
jax: 0.10.0
libtpu: 0.0.40
codegen_flags: <defaults>
</compile_context>

<pallas_src>
import functools
import math

import jax
import jax.numpy as jnp
from jax.experimental import pallas as pl
from jax.experimental.pallas import tpu as pltpu


# ---------------------------------------------------------------------------
# Kernel 1: a GRU layer with D directions (D=2 bidirectional, D=1 uni),
# both directions interleaved inside one time loop.
#   gi_ref : (D, S, B, 3H) f32   hoisted x@W_ih + b_ih + [b_hr, b_hz, 0]
#   h0_ref : (B, H)         f32
#   whh_ref: (D, H, 3H)     bf16  gates packed [r | z | n] along lanes
#   bhn_ref: (D, 1, H)      f32
#   out_ref: (D, S, B, H)   f32
# ---------------------------------------------------------------------------
def _gru_layer_kernel(gi_ref, h0_ref, whh_ref, bhn_ref, out_ref, h_scr):
    D = gi_ref.shape[0]
    S = gi_ref.shape[1]
    B, H = h0_ref.shape

    for d in range(D):
        h_scr[d] = h0_ref[...]

    # Hoist time-invariant weight loads and bias broadcasts out of the serial
    # recurrence (fori_loop closure => evaluated once).
    w_hh = [whh_ref[d] for d in range(D)]                       # (H, 3H) bf16
    b_hn = [jnp.broadcast_to(bhn_ref[d], (B, H)) for d in range(D)]

    def step(t, carry):
        for d in range(D):
            tt = t if d == 0 else S - 1 - t                     # time reversal
            h = h_scr[d]                                        # (B, H) f32
            # ONE fused gate matmul per direction per step (bf16 operands,
            # f32 accumulation on the MXU).
            gh = jnp.dot(h.astype(jnp.bfloat16), w_hh[d],
                         preferred_element_type=jnp.float32)    # (B, 3H)
            gi = gi_ref[d, tt]                                  # (B, 3H)
            r = jax.nn.sigmoid(gi[:, :H] + gh[:, :H])
            z = jax.nn.sigmoid(gi[:, H:2 * H] + gh[:, H:2 * H])
            n = jnp.tanh(gi[:, 2 * H:] + r * (gh[:, 2 * H:] + b_hn[d]))
            h_new = (1.0 - z) * n + z * h
            h_scr[d] = h_new
            out_ref[d, tt] = h_new
        return carry

    jax.lax.fori_loop(0, S, step, 0, unroll=(S if S <= 16 else 8))


def gru_layer(gi, h0, w_hh, b_hn):
    """gi: (D,S,B,3H) f32; w_hh: (D,H,3H) bf16; b_hn: (D,1,H) f32.
    Returns (D,S,B,H) f32 (dir 0 = forward scan, dir 1 = reversed scan)."""
    D, S, B, G3 = gi.shape
    H = G3 // 3
    return pl.pallas_call(
        _gru_layer_kernel,
        out_shape=jax.ShapeDtypeStruct((D, S, B, H), jnp.float32),
        grid_spec=pltpu.PrefetchScalarGridSpec(
            num_scalar_prefetch=0,
            grid=(1,),
            in_specs=[
                pl.BlockSpec((D, S, B, G3), lambda i: (0, 0, 0, 0)),
                pl.BlockSpec((B, H), lambda i: (0, 0)),
                pl.BlockSpec((D, H, G3), lambda i: (0, 0, 0)),
                pl.BlockSpec((D, 1, H), lambda i: (0, 0, 0)),
            ],
            out_specs=pl.BlockSpec((D, S, B, H), lambda i: (0, 0, 0, 0)),
            scratch_shapes=[pltpu.VMEM((D, B, H), jnp.float32)],
        ),
        compiler_params=pltpu.CompilerParams(
            dimension_semantics=("arbitrary",),
            vmem_limit_bytes=48 * 1024 * 1024),
    )(gi, h0, w_hh, b_hn)


# ---------------------------------------------------------------------------
# Kernel 2: last decoder GRU layer fused with predict-Linear + log-space NLL.
# ---------------------------------------------------------------------------
def _gru_decode_nll_kernel(gi_ref, h0_ref, whh_ref, bhn_ref, wp_ref, bp_ref,
                           lab_ref, nll_ref, h_scr, hs_scr):
    S = gi_ref.shape[0]
    B, H = h0_ref.shape

    h_scr[...] = h0_ref[...]
    w_hh = whh_ref[...]                                         # (H, 3H) bf16
    b_hn = jnp.broadcast_to(bhn_ref[...], (B, H))               # hoisted

    def step(t, carry):
        h = h_scr[...]
        gh = jnp.dot(h.astype(jnp.bfloat16), w_hh,
                     preferred_element_type=jnp.float32)        # (B, 3H)
        gi = gi_ref[t]                                          # (B, 3H)
        r = jax.nn.sigmoid(gi[:, :H] + gh[:, :H])
        z = jax.nn.sigmoid(gi[:, H:2 * H] + gh[:, H:2 * H])
        n = jnp.tanh(gi[:, 2 * H:] + r * (gh[:, 2 * H:] + b_hn))
        h_new = (1.0 - z) * n + z * h
        h_scr[...] = h_new
        # TODO(synk): at production pad B to a multiple of 8 so this row-block
        # store is an unmasked full-tile write (or use an (S,B,H) scratch).
        hs_scr[pl.ds(t * B, B), :] = h_new.astype(jnp.bfloat16)
        return carry

    jax.lax.fori_loop(0, S, step, 0, unroll=(S if S <= 16 else 8))

    # ---- fused predict + NLL (one big MXU matmul, log-space, stable) ----
    # TODO(synk): tile over row blocks of N (and L for real vocab sizes) at
    # production so the (N,L) intermediates stay in vregs.
    logits = (jnp.dot(hs_scr[...], wp_ref[...],
                      preferred_element_type=jnp.float32)
              + bp_ref[...])                                    # (N, L) f32
    L = logits.shape[-1]
    m = jnp.max(logits, axis=-1, keepdims=True)
    lse = m + jnp.log(jnp.sum(jnp.exp(logits - m), axis=-1, keepdims=True))
    c = math.log(1e-6)
    # log(sum(exp(logits)) + 1e-6) = logaddexp(lse, log 1e-6), overflow-safe
    log_denom = jnp.maximum(lse, c) + jnp.log(1.0 + jnp.exp(-jnp.abs(lse - c)))
    lab = lab_ref[...]                                          # (N, 1) int32
    col = jax.lax.broadcasted_iota(jnp.int32, logits.shape, 1)
    logit_t = jnp.sum(jnp.where(col == lab, logits, 0.0),
                      axis=-1, keepdims=True)                   # (N, 1)
    nll = log_denom - logit_t
    # reference: p_x[:, label_num-1] = 1  =>  NLL = 0 for that target id
    nll_ref[...] = jnp.where(lab == (L - 1), 0.0, nll)


def gru_decode_nll(gi, h0, w_hh, b_hn, w_pred, b_pred, label_tm):
    """gi: (Sd,B,3H) f32; label_tm: (Sd*B,1) int32 (time-major).
    Returns (Sd*B, 1) f32 per-step NLL (time-major)."""
    S, B, G3 = gi.shape
    H = G3 // 3
    L = w_pred.shape[1]
    N = S * B
    # TODO(synk): lane-dense (Sd,B) output + label once B is production-sized.
    return pl.pallas_call(
        _gru_decode_nll_kernel,
        out_shape=jax.ShapeDtypeStruct((N, 1), jnp.float32),
        grid_spec=pltpu.PrefetchScalarGridSpec(
            num_scalar_prefetch=0,
            grid=(1,),
            in_specs=[
                pl.BlockSpec((S, B, G3), lambda i: (0, 0, 0)),
                pl.BlockSpec((B, H), lambda i: (0, 0)),
                pl.BlockSpec((H, G3), lambda i: (0, 0)),
                pl.BlockSpec((1, H), lambda i: (0, 0)),
                pl.BlockSpec((H, L), lambda i: (0, 0)),
                pl.BlockSpec((1, L), lambda i: (0, 0)),
                pl.BlockSpec((N, 1), lambda i: (0, 0)),
            ],
            out_specs=pl.BlockSpec((N, 1), lambda i: (0, 0)),
            scratch_shapes=[pltpu.VMEM((B, H), jnp.float32),
                            pltpu.VMEM((N, H), jnp.bfloat16)],
        ),
        compiler_params=pltpu.CompilerParams(
            dimension_semantics=("arbitrary",),
            vmem_limit_bytes=48 * 1024 * 1024),
    )(gi, h0, w_hh, b_hn, w_pred, b_pred, label_tm)


# ---------------------------------------------------------------------------
# Parameter construction (deterministic, PyTorch-style uniform init).
# Gate-packed layout: W_* are (*, 3H) with [r | z | n] along the last axis.
# b_ih + b_hr + b_hz are pre-folded into b_gi; b_hn is kept separate.
# ---------------------------------------------------------------------------
def _uniform(key, shape, scale):
    return jax.random.uniform(key, shape, jnp.float32, -scale, scale)


def init_params(key, input_size, hidden_size, layer_num, latent_num, label_num):
    H = hidden_size
    k = 1.0 / math.sqrt(H)
    keys = iter(jax.random.split(key, 1024))
    p = {"enc_layers": [], "dec_layers": []}

    # Encoder: bidirectional GRU stack.
    for layer in range(layer_num):
        in_dim = input_size if layer == 0 else 2 * H
        b_ih = _uniform(next(keys), (2, 3 * H), k)
        b_hh = _uniform(next(keys), (2, 3 * H), k)
        b_gi = b_ih + jnp.concatenate(
            [b_hh[:, :2 * H], jnp.zeros((2, H), jnp.float32)], axis=1)
        p["enc_layers"].append(dict(
            w_ih=_uniform(next(keys), (2, in_dim, 3 * H), k),
            b_gi=b_gi,
            w_hh=_uniform(next(keys), (2, H, 3 * H), k).astype(jnp.bfloat16),
            b_hn=b_hh[:, 2 * H:].reshape(2, 1, H),
        ))
    p["w_mu"] = _uniform(next(keys), (2 * H, latent_num), k)
    p["b_mu"] = _uniform(next(keys), (1, latent_num), k)

    # Decoder: latent -> initial hidden, unidirectional GRU stack.
    p["w_z2h"] = _uniform(next(keys), (latent_num, H), k)
    p["b_z2h"] = _uniform(next(keys), (1, H), k)
    for layer in range(layer_num):
        in_dim = input_size if layer == 0 else H
        b_ih = _uniform(next(keys), (3 * H,), k)
        b_hh = _uniform(next(keys), (3 * H,), k)
        b_gi = b_ih + jnp.concatenate(
            [b_hh[:2 * H], jnp.zeros((H,), jnp.float32)])
        p["dec_layers"].append(dict(
            w_ih=_uniform(next(keys), (in_dim, 3 * H), k),
            b_gi=b_gi,
            w_hh=_uniform(next(keys), (H, 3 * H), k).astype(jnp.bfloat16),
            b_hn=b_hh[2 * H:].reshape(1, H),
        ))

    # predict: Linear(hidden_size, label_num)
    p["w_pred"] = _uniform(next(keys), (H, label_num), k).astype(jnp.bfloat16)
    p["b_pred"] = _uniform(next(keys), (1, label_num), k)
    return p


# ---------------------------------------------------------------------------
# VAE forward (mirrors VAE.forward -> nll_loss of shape (batch, seq_len)).
# ---------------------------------------------------------------------------
@functools.partial(jax.jit, static_argnames=("hidden_size",))
def vae_forward(params, src, trg, label, hidden_size):
    H = hidden_size
    B = src.shape[0]

    # ----- Encoder (bidirectional GRU) -----
    x = jnp.transpose(src.astype(jnp.float32), (1, 0, 2))        # (S, B, I)
    h0 = jnp.zeros((B, H), jnp.float32)
    out = None
    for li, lp in enumerate(params["enc_layers"]):
        # Hoisted input projection: one big batched matmul per layer, with
        # b_ih + b_hr + b_hz folded in.
        if li == 0:
            gi = jnp.einsum("sbi,dik->dsbk", x, lp["w_ih"])
        else:
            # previous layer's (fwd, bwd): split the weight, never concat.
            gi = (jnp.einsum("sbh,dhk->dsbk", out[0], lp["w_ih"][:, :H, :]) +
                  jnp.einsum("sbh,dhk->dsbk", out[1], lp["w_ih"][:, H:, :]))
        gi = gi + lp["b_gi"][:, None, None, :]                    # (2,S,B,3H)
        out = gru_layer(gi, h0, lp["w_hh"], lp["b_hn"])           # (2,S,B,H)

    # concat(final fwd hidden, final bwd hidden) @ w_mu, without the concat.
    z = (out[0, -1] @ params["w_mu"][:H] + out[1, 0] @ params["w_mu"][H:]
         + params["b_mu"])                                        # (B, latent)

    # ----- Decoder -----
    h0_dec = jnp.tanh(z @ params["w_z2h"] + params["b_z2h"])      # (B, H)
    y = jnp.transpose(trg[:, :-1].astype(jnp.float32), (1, 0, 2))  # (Sd, B, I)
    Sd = y.shape[0]
    n_dec = len(params["dec_layers"])
    # permute the tiny int32 labels to time-major instead of transposing the
    # decoder activations back to batch-first.
    label_tm = jnp.transpose(label).reshape(Sd * B, 1).astype(jnp.int32)

    nll = None
    for li, lp in enumerate(params["dec_layers"]):
        gi = (jnp.einsum("sbi,ik->sbk", y, lp["w_ih"])
              + lp["b_gi"][None, None, :])                        # (Sd,B,3H)
        if li < n_dec - 1:
            y = gru_layer(gi[None], h0_dec, lp["w_hh"][None],
                          lp["b_hn"][None])[0]                    # (Sd,B,H)
        else:
            nll = gru_decode_nll(gi, h0_dec, lp["w_hh"], lp["b_hn"],
                                 params["w_pred"], params["b_pred"], label_tm)

    # (Sd*B, 1) time-major -> (B, Sd) batch-first, matching the reference.
    return jnp.transpose(nll[:, 0].reshape(Sd, B))


if __name__ == "__main__":
    # Small shapes consistent with the module's forward.
    batch, seq_src, seq_trg = 2, 8, 9
    input_size, hidden_size, layer_num = 32, 32, 1
    latent_num, label_num, dropout = 16, 11, 0.1

    key = jax.random.PRNGKey(0)
    k_par, k_src, k_trg, k_lab = jax.random.split(key, 4)

    params = init_params(k_par, input_size, hidden_size, layer_num,
                         latent_num, label_num)

    src = jax.random.normal(k_src, (batch, seq_src, input_size), jnp.float32)
    trg = jax.random.normal(k_trg, (batch, seq_trg, input_size), jnp.float32)
    # label aligns with trg[:, :-1] (decoder output length = seq_trg - 1)
    label = jax.random.randint(k_lab, (batch, seq_trg - 1), 0, label_num,
                               dtype=jnp.int32)

    nll = vae_forward(params, src, trg, label, hidden_size=hidden_size)
    nll = jax.block_until_ready(nll)

    assert nll.shape == (batch, seq_trg - 1)
    assert bool(jnp.all(jnp.isfinite(nll)))
    print("KERNEL_OK")
</pallas_src>

<mosaic_0001>
module attributes {stable_mosaic.version = 11 : i64} {
  func.func @_gru_layer_kernel(%arg0: i32, %arg1: memref<2x8x2x96xf32, #tpu.memory_space<vmem>>, %arg2: memref<2x32xf32, #tpu.memory_space<vmem>>, %arg3: memref<2x32x96xbf16, #tpu.memory_space<vmem>>, %arg4: memref<2x1x32xf32, #tpu.memory_space<vmem>>, %arg5: memref<2x8x2x32xf32, #tpu.memory_space<vmem>>, %arg6: memref<2x2x32xf32, #tpu.memory_space<vmem>>) attributes {dimension_semantics = [#tpu.dimension_semantics<arbitrary>], iteration_bounds = array<i64: 1>, scalar_prefetch = 0 : i64, scratch_operands = 1 : i64, tpu.core_type = #tpu.core_type<tc>, window_params = [{pipeline_mode = #tpu.pipeline_mode<synchronous>, transform_indices = @transform_0, window_bounds = array<i64: 2, 8, 2, 96>}, {pipeline_mode = #tpu.pipeline_mode<synchronous>, transform_indices = @transform_1, window_bounds = array<i64: 2, 32>}, {pipeline_mode = #tpu.pipeline_mode<synchronous>, transform_indices = @transform_2, window_bounds = array<i64: 2, 32, 96>}, {pipeline_mode = #tpu.pipeline_mode<synchronous>, transform_indices = @transform_3, window_bounds = array<i64: 2, 1, 32>}, {pipeline_mode = #tpu.pipeline_mode<synchronous>, transform_indices = @transform_4, window_bounds = array<i64: 2, 8, 2, 32>}]} {
    %c0 = arith.constant 0 : index
    %c0_0 = arith.constant 0 : index
    %0 = vector.load %arg2[%c0, %c0_0] : memref<2x32xf32, #tpu.memory_space<vmem>>, vector<2x32xf32>
    %c0_1 = arith.constant 0 : index
    %c0_2 = arith.constant 0 : index
    %c0_3 = arith.constant 0 : index
    %1 = vector.load %arg6[%c0_1, %c0_2, %c0_3] : memref<2x2x32xf32, #tpu.memory_space<vmem>>, vector<1x2x32xf32>
    %2 = vector.shape_cast %1 : vector<1x2x32xf32> to vector<2x32xf32>
    %3 = vector.shape_cast %0 : vector<2x32xf32> to vector<1x2x32xf32>
    tpu.vector_store %arg6[%c0_1, %c0_2, %c0_3], %3 {strides = array<i32>} : memref<2x2x32xf32, #tpu.memory_space<vmem>>, vector<1x2x32xf32>,
    %c0_4 = arith.constant 0 : index
    %c0_5 = arith.constant 0 : index
    %4 = vector.load %arg2[%c0_4, %c0_5] : memref<2x32xf32, #tpu.memory_space<vmem>>, vector<2x32xf32>
    %c1 = arith.constant 1 : index
    %c0_6 = arith.constant 0 : index
    %c0_7 = arith.constant 0 : index
    %5 = vector.load %arg6[%c1, %c0_6, %c0_7] : memref<2x2x32xf32, #tpu.memory_space<vmem>>, vector<1x2x32xf32>
    %6 = vector.shape_cast %5 : vector<1x2x32xf32> to vector<2x32xf32>
    %7 = vector.shape_cast %4 : vector<2x32xf32> to vector<1x2x32xf32>
    tpu.vector_store %arg6[%c1, %c0_6, %c0_7], %7 {strides = array<i32>} : memref<2x2x32xf32, #tpu.memory_space<vmem>>, vector<1x2x32xf32>,
    %c0_8 = arith.constant 0 : index
    %c0_9 = arith.constant 0 : index
    %c0_10 = arith.constant 0 : index
    %8 = vector.load %arg3[%c0_8, %c0_9, %c0_10] : memref<2x32x96xbf16, #tpu.memory_space<vmem>>, vector<1x32x96xbf16>
    %9 = vector.shape_cast %8 : vector<1x32x96xbf16> to vector<32x96xbf16>
    %c1_11 = arith.constant 1 : index
    %c0_12 = arith.constant 0 : index
    %c0_13 = arith.constant 0 : index
    %10 = vector.load %arg3[%c1_11, %c0_12, %c0_13] : memref<2x32x96xbf16, #tpu.memory_space<vmem>>, vector<1x32x96xbf16>
    %11 = vector.shape_cast %10 : vector<1x32x96xbf16> to vector<32x96xbf16>
    %c0_14 = arith.constant 0 : index
    %c0_15 = arith.constant 0 : index
    %c0_16 = arith.constant 0 : index
    %12 = vector.load %arg4[%c0_14, %c0_15, %c0_16] : memref<2x1x32xf32, #tpu.memory_space<vmem>>, vector<1x1x32xf32>
    %13 = vector.shape_cast %12 : vector<1x1x32xf32> to vector<1x32xf32>
    %14 = vector.shape_cast %13 : vector<1x32xf32> to vector<1x32xf32>
    %15 = vector.broadcast %14 : vector<1x32xf32> to vector<2x32xf32>
    %c1_17 = arith.constant 1 : index
    %c0_18 = arith.constant 0 : index
    %c0_19 = arith.constant 0 : index
    %16 = vector.load %arg4[%c1_17, %c0_18, %c0_19] : memref<2x1x32xf32, #tpu.memory_space<vmem>>, vector<1x1x32xf32>
    %17 = vector.shape_cast %16 : vector<1x1x32xf32> to vector<1x32xf32>
    %18 = vector.shape_cast %17 : vector<1x32xf32> to vector<1x32xf32>
    %19 = vector.broadcast %18 : vector<1x32xf32> to vector<2x32xf32>
    %c0_i32 = arith.constant 0 : i32
    %c0_20 = arith.constant 0 : index
    %c0_21 = arith.constant 0 : index
    %c0_22 = arith.constant 0 : index
    %20 = vector.load %arg6[%c0_20, %c0_21, %c0_22] : memref<2x2x32xf32, #tpu.memory_space<vmem>>, vector<1x2x32xf32>
    %21 = vector.shape_cast %20 : vector<1x2x32xf32> to vector<2x32xf32>
    %22 = arith.truncf %21 : vector<2x32xf32> to vector<2x32xbf16>
    %cst = arith.constant dense<0.000000e+00> : vector<2x96xf32>
    %23 = tpu.matmul %22, %9, %cst {dimension_numbers = #tpu.dot_dimension_numbers<[1], [0], [0], [1], [0, 0, 1, 1], [], []>} : vector<2x32xbf16>, vector<32x96xbf16>, vector<2x96xf32> -> vector<2x96xf32>
    %c0_23 = arith.constant 0 : index
    %24 = arith.index_cast %c0_i32 : i32 to index
    %c0_24 = arith.constant 0 : index
    %c0_25 = arith.constant 0 : index
    %25 = vector.load %arg1[%c0_23, %24, %c0_24, %c0_25] : memref<2x8x2x96xf32, #tpu.memory_space<vmem>>, vector<1x1x2x96xf32>
    %26 = vector.shape_cast %25 : vector<1x1x2x96xf32> to vector<2x96xf32>
    %27 = vector.extract_strided_slice %26 {offsets = [0, 0], sizes = [2, 32], strides = [1, 1]} : vector<2x96xf32> to vector<2x32xf32>
    %28 = vector.extract_strided_slice %23 {offsets = [0, 0], sizes = [2, 32], strides = [1, 1]} : vector<2x96xf32> to vector<2x32xf32>
    %29 = arith.addf %27, %28 : vector<2x32xf32>
    %30 = arith.negf %29 : vector<2x32xf32>
    %31 = math.exp %30 : vector<2x32xf32>
    %cst_26 = arith.constant 1.000000e+00 : f32
    %32 = vector.broadcast %cst_26 : f32 to vector<2x32xf32>
    %33 = arith.addf %32, %31 : vector<2x32xf32>
    %34 = arith.divf %32, %33 : vector<2x32xf32>
    %35 = vector.extract_strided_slice %26 {offsets = [0, 32], sizes = [2, 32], strides = [1, 1]} : vector<2x96xf32> to vector<2x32xf32>
    %36 = vector.extract_strided_slice %23 {offsets = [0, 32], sizes = [2, 32], strides = [1, 1]} : vector<2x96xf32> to vector<2x32xf32>
    %37 = arith.addf %35, %36 : vector<2x32xf32>
    %38 = arith.negf %37 : vector<2x32xf32>
    %39 = math.exp %38 : vector<2x32xf32>
    %cst_27 = arith.constant 1.000000e+00 : f32
    %40 = vector.broadcast %cst_27 : f32 to vector<2x32xf32>
    %41 = arith.addf %40, %39 : vector<2x32xf32>
    %42 = arith.divf %40, %41 : vector<2x32xf32>
    %43 = vector.extract_strided_slice %26 {offsets = [0, 64], sizes = [2, 32], strides = [1, 1]} : vector<2x96xf32> to vector<2x32xf32>
    %44 = vector.extract_strided_slice %23 {offsets = [0, 64], sizes = [2, 32], strides = [1, 1]} : vector<2x96xf32> to vector<2x32xf32>
    %45 = arith.addf %44, %15 : vector<2x32xf32>
    %46 = arith.mulf %34, %45 : vector<2x32xf32>
    %47 = arith.addf %43, %46 : vector<2x32xf32>
    %48 = math.tanh %47 : vector<2x32xf32>
    %cst_28 = arith.constant 1.000000e+00 : f32
    %49 = vector.broadcast %cst_28 : f32 to vector<2x32xf32>
    %50 = arith.subf %49, %42 : vector<2x32xf32>
    %51 = arith.mulf %50, %48 : vector<2x32xf32>
    %52 = arith.mulf %42, %21 : vector<2x32xf32>
    %53 = arith.addf %51, %52 : vector<2x32xf32>
    %c0_29 = arith.constant 0 : index
    %c0_30 = arith.constant 0 : index
    %c0_31 = arith.constant 0 : index
    %54 = vector.load %arg6[%c0_29, %c0_30, %c0_31] : memref<2x2x32xf32, #tpu.memory_space<vmem>>, vector<1x2x32xf32>
    %55 = vector.shape_cast %54 : vector<1x2x32xf32> to vector<2x32xf32>
    %56 = vector.shape_cast %53 : vector<2x32xf32> to vector<1x2x32xf32>
    tpu.vector_store %arg6[%c0_29, %c0_30, %c0_31], %56 {strides = array<i32>} : memref<2x2x32xf32, #tpu.memory_space<vmem>>, vector<1x2x32xf32>,
    %c0_32 = arith.constant 0 : index
    %57 = arith.index_cast %c0_i32 : i32 to index
    %c0_33 = arith.constant 0 : index
    %c0_34 = arith.constant 0 : index
    %58 = vector.load %arg5[%c0_32, %57, %c0_33, %c0_34] : memref<2x8x2x32xf32, #tpu.memory_space<vmem>>, vector<1x1x2x32xf32>
    %59 = vector.shape_cast %58 : vector<1x1x2x32xf32> to vector<2x32xf32>
    %60 = vector.shape_cast %53 : vector<2x32xf32> to vector<1x1x2x32xf32>
    tpu.vector_store %arg5[%c0_32, %57, %c0_33, %c0_34], %60 {strides = array<i32>} : memref<2x8x2x32xf32, #tpu.memory_space<vmem>>, vector<1x1x2x32xf32>,
    %c7_i32 = arith.constant 7 : i32
    %61 = arith.subi %c7_i32, %c0_i32 : i32
    %c1_35 = arith.constant 1 : index
    %c0_36 = arith.constant 0 : index
    %c0_37 = arith.constant 0 : index
    %62 = vector.load %arg6[%c1_35, %c0_36, %c0_37] : memref<2x2x32xf32, #tpu.memory_space<vmem>>, vector<1x2x32xf32>
    %63 = vector.shape_cast %62 : vector<1x2x32xf32> to vector<2x32xf32>
    %64 = arith.truncf %63 : vector<2x32xf32> to vector<2x32xbf16>
    %cst_38 = arith.constant dense<0.000000e+00> : vector<2x96xf32>
    %65 = tpu.matmul %64, %11, %cst_38 {dimension_numbers = #tpu.dot_dimension_numbers<[1], [0], [0], [1], [0, 0, 1, 1], [], []>} : vector<2x32xbf16>, vector<32x96xbf16>, vector<2x96xf32> -> vector<2x96xf32>
    %c1_39 = arith.constant 1 : index
    %66 = arith.index_cast %61 : i32 to index
    %c0_40 = arith.constant 0 : index
    %c0_41 = arith.constant 0 : index
    %67 = vector.load %arg1[%c1_39, %66, %c0_40, %c0_41] : memref<2x8x2x96xf32, #tpu.memory_space<vmem>>, vector<1x1x2x96xf32>
    %68 = vector.shape_cast %67 : vector<1x1x2x96xf32> to vector<2x96xf32>
    %69 = vector.extract_strided_slice %68 {offsets = [0, 0], sizes = [2, 32], strides = [1, 1]} : vector<2x96xf32> to vector<2x32xf32>
    %70 = vector.extract_strided_slice %65 {offsets = [0, 0], sizes = [2, 32], strides = [1, 1]} : vector<2x96xf32> to vector<2x32xf32>
    %71 = arith.addf %69, %70 : vector<2x32xf32>
    %72 = arith.negf %71 : vector<2x32xf32>
    %73 = math.exp %72 : vector<2x32xf32>
    %cst_42 = arith.constant 1.000000e+00 : f32
    %74 = vector.broadcast %cst_42 : f32 to vector<2x32xf32>
    %75 = arith.addf %74, %73 : vector<2x32xf32>
    %76 = arith.divf %74, %75 : vector<2x32xf32>
    %77 = vector.extract_strided_slice %68 {offsets = [0, 32], sizes = [2, 32], strides = [1, 1]} : vector<2x96xf32> to vector<2x32xf32>
    %78 = vector.extract_strided_slice %65 {offsets = [0, 32], sizes = [2, 32], strides = [1, 1]} : vector<2x96xf32> to vector<2x32xf32>
    %79 = arith.addf %77, %78 : vector<2x32xf32>
    %80 = arith.negf %79 : vector<2x32xf32>
    %81 = math.exp %80 : vector<2x32xf32>
    %cst_43 = arith.constant 1.000000e+00 : f32
    %82 = vector.broadcast %cst_43 : f32 to vector<2x32xf32>
    %83 = arith.addf %82, %81 : vector<2x32xf32>
    %84 = arith.divf %82, %83 : vector<2x32xf32>
    %85 = vector.extract_strided_slice %68 {offsets = [0, 64], sizes = [2, 32], strides = [1, 1]} : vector<2x96xf32> to vector<2x32xf32>
    %86 = vector.extract_strided_slice %65 {offsets = [0, 64], sizes = [2, 32], strides = [1, 1]} : vector<2x96xf32> to vector<2x32xf32>
    %87 = arith.addf %86, %19 : vector<2x32xf32>
    %88 = arith.mulf %76, %87 : vector<2x32xf32>
    %89 = arith.addf %85, %88 : vector<2x32xf32>
    %90 = math.tanh %89 : vector<2x32xf32>
    %cst_44 = arith.constant 1.000000e+00 : f32
    %91 = vector.broadcast %cst_44 : f32 to vector<2x32xf32>
    %92 = arith.subf %91, %84 : vector<2x32xf32>
    %93 = arith.mulf %92, %90 : vector<2x32xf32>
    %94 = arith.mulf %84, %63 : vector<2x32xf32>
    %95 = arith.addf %93, %94 : vector<2x32xf32>
    %c1_45 = arith.constant 1 : index
    %c0_46 = arith.constant 0 : index
    %c0_47 = arith.constant 0 : index
    %96 = vector.load %arg6[%c1_45, %c0_46, %c0_47] : memref<2x2x32xf32, #tpu.memory_space<vmem>>, vector<1x2x32xf32>
    %97 = vector.shape_cast %96 : vector<1x2x32xf32> to vector<2x32xf32>
    %98 = vector.shape_cast %95 : vector<2x32xf32> to vector<1x2x32xf32>
    tpu.vector_store %arg6[%c1_45, %c0_46, %c0_47], %98 {strides = array<i32>} : memref<2x2x32xf32, #tpu.memory_space<vmem>>, vector<1x2x32xf32>,
    %c1_48 = arith.constant 1 : index
    %99 = arith.index_cast %61 : i32 to index
    %c0_49 = arith.constant 0 : index
    %c0_50 = arith.constant 0 : index
    %100 = vector.load %arg5[%c1_48, %99, %c0_49, %c0_50] : memref<2x8x2x32xf32, #tpu.memory_space<vmem>>, vector<1x1x2x32xf32>
    %101 = vector.shape_cast %100 : vector<1x1x2x32xf32> to vector<2x32xf32>
    %102 = vector.shape_cast %95 : vector<2x32xf32> to vector<1x1x2x32xf32>
    tpu.vector_store %arg5[%c1_48, %99, %c0_49, %c0_50], %102 {strides = array<i32>} : memref<2x8x2x32xf32, #tpu.memory_space<vmem>>, vector<1x1x2x32xf32>,
    %c1_i32 = arith.constant 1 : i32
    %c0_51 = arith.constant 0 : index
    %c0_52 = arith.constant 0 : index
    %c0_53 = arith.constant 0 : index
    %103 = vector.load %arg6[%c0_51, %c0_52, %c0_53] : memref<2x2x32xf32, #tpu.memory_space<vmem>>, vector<1x2x32xf32>
    %104 = vector.shape_cast %103 : vector<1x2x32xf32> to vector<2x32xf32>
    %105 = arith.truncf %104 : vector<2x32xf32> to vector<2x32xbf16>
    %cst_54 = arith.constant dense<0.000000e+00> : vector<2x96xf32>
    %106 = tpu.matmul %105, %9, %cst_54 {dimension_numbers = #tpu.dot_dimension_numbers<[1], [0], [0], [1], [0, 0, 1, 1], [], []>} : vector<2x32xbf16>, vector<32x96xbf16>, vector<2x96xf32> -> vector<2x96xf32>
    %c0_55 = arith.constant 0 : index
    %107 = arith.index_cast %c1_i32 : i32 to index
    %c0_56 = arith.constant 0 : index
    %c0_57 = arith.constant 0 : index
    %108 = vector.load %arg1[%c0_55, %107, %c0_56, %c0_57] : memref<2x8x2x96xf32, #tpu.memory_space<vmem>>, vector<1x1x2x96xf32>
    %109 = vector.shape_cast %108 : vector<1x1x2x96xf32> to vector<2x96xf32>
    %110 = vector.extract_strided_slice %109 {offsets = [0, 0], sizes = [2, 32], strides = [1, 1]} : vector<2x96xf32> to vector<2x32xf32>
    %111 = vector.extract_strided_slice %106 {offsets = [0, 0], sizes = [2, 32], strides = [1, 1]} : vector<2x96xf32> to vector<2x32xf32>
    %112 = arith.addf %110, %111 : vector<2x32xf32>
    %113 = arith.negf %112 : vector<2x32xf32>
    %114 = math.exp %113 : vector<2x32xf32>
    %cst_58 = arith.constant 1.000000e+00 : f32
    %115 = vector.broadcast %cst_58 : f32 to vector<2x32xf32>
    %116 = arith.addf %115, %114 : vector<2x32xf32>
    %117 = arith.divf %115, %116 : vector<2x32xf32>
    %118 = vector.extract_strided_slice %109 {offsets = [0, 32], sizes = [2, 32], strides = [1, 1]} : vector<2x96xf32> to vector<2x32xf32>
    %119 = vector.extract_strided_slice %106 {offsets = [0, 32], sizes = [2, 32], strides = [1, 1]} : vector<2x96xf32> to vector<2x32xf32>
    %120 = arith.addf %118, %119 : vector<2x32xf32>
    %121 = arith.negf %120 : vector<2x32xf32>
    %122 = math.exp %121 : vector<2x32xf32>
    %cst_59 = arith.constant 1.000000e+00 : f32
    %123 = vector.broadcast %cst_59 : f32 to vector<2x32xf32>
    %124 = arith.addf %123, %122 : vector<2x32xf32>
    %125 = arith.divf %123, %124 : vector<2x32xf32>
    %126 = vector.extract_strided_slice %109 {offsets = [0, 64], sizes = [2, 32], strides = [1, 1]} : vector<2x96xf32> to vector<2x32xf32>
    %127 = vector.extract_strided_slice %106 {offsets = [0, 64], sizes = [2, 32], strides = [1, 1]} : vector<2x96xf32> to vector<2x32xf32>
    %128 = arith.addf %127, %15 : vector<2x32xf32>
    %129 = arith.mulf %117, %128 : vector<2x32xf32>
    %130 = arith.addf %126, %129 : vector<2x32xf32>
    %131 = math.tanh %130 : vector<2x32xf32>
    %cst_60 = arith.constant 1.000000e+00 : f32
    %132 = vector.broadcast %cst_60 : f32 to vector<2x32xf32>
    %133 = arith.subf %132, %125 : vector<2x32xf32>
    %134 = arith.mulf %133, %131 : vector<2x32xf32>
    %135 = arith.mulf %125, %104 : vector<2x32xf32>
    %136 = arith.addf %134, %135 : vector<2x32xf32>
    %c0_61 = arith.constant 0 : index
    %c0_62 = arith.constant 0 : index
    %c0_63 = arith.constant 0 : index
    %137 = vector.load %arg6[%c0_61, %c0_62, %c0_63] : memref<2x2x32xf32, #tpu.memory_space<vmem>>, vector<1x2x32xf32>
    %138 = vector.shape_cast %137 : vector<1x2x32xf32> to vector<2x32xf32>
    %139 = vector.shape_cast %136 : vector<2x32xf32> to vector<1x2x32xf32>
    tpu.vector_store %arg6[%c0_61, %c0_62, %c0_63], %139 {strides = array<i32>} : memref<2x2x32xf32, #tpu.memory_space<vmem>>, vector<1x2x32xf32>,
    %c0_64 = arith.constant 0 : index
    %140 = arith.index_cast %c1_i32 : i32 to index
    %c0_65 = arith.constant 0 : index
    %c0_66 = arith.constant 0 : index
    %141 = vector.load %arg5[%c0_64, %140, %c0_65, %c0_66] : memref<2x8x2x32xf32, #tpu.memory_space<vmem>>, vector<1x1x2x32xf32>
    %142 = vector.shape_cast %141 : vector<1x1x2x32xf32> to vector<2x32xf32>
    %143 = vector.shape_cast %136 : vector<2x32xf32> to vector<1x1x2x32xf32>
    tpu.vector_store %arg5[%c0_64, %140, %c0_65, %c0_66], %143 {strides = array<i32>} : memref<2x8x2x32xf32, #tpu.memory_space<vmem>>, vector<1x1x2x32xf32>,
    %c7_i32_67 = arith.constant 7 : i32
    %144 = arith.subi %c7_i32_67, %c1_i32 : i32
    %c1_68 = arith.constant 1 : index
    %c0_69 = arith.constant 0 : index
    %c0_70 = arith.constant 0 : index
    %145 = vector.load %arg6[%c1_68, %c0_69, %c0_70] : memref<2x2x32xf32, #tpu.memory_space<vmem>>, vector<1x2x32xf32>
    %146 = vector.shape_cast %145 : vector<1x2x32xf32> to vector<2x32xf32>
    %147 = arith.truncf %146 : vector<2x32xf32> to vector<2x32xbf16>
    %cst_71 = arith.constant dense<0.000000e+00> : vector<2x96xf32>
    %148 = tpu.matmul %147, %11, %cst_71 {dimension_numbers = #tpu.dot_dimension_numbers<[1], [0], [0], [1], [0, 0, 1, 1], [], []>} : vector<2x32xbf16>, vector<32x96xbf16>, vector<2x96xf32> -> vector<2x96xf32>
    %c1_72 = arith.constant 1 : index
    %149 = arith.index_cast %144 : i32 to index
    %c0_73 = arith.constant 0 : index
    %c0_74 = arith.constant 0 : index
    %150 = vector.load %arg1[%c1_72, %149, %c0_73, %c0_74] : memref<2x8x2x96xf32, #tpu.memory_space<vmem>>, vector<1x1x2x96xf32>
    %151 = vector.shape_cast %150 : vector<1x1x2x96xf32> to vector<2x96xf32>
    %152 = vector.extract_strided_slice %151 {offsets = [0, 0], sizes = [2, 32], strides = [1, 1]} : vector<2x96xf32> to vector<2x32xf32>
    %153 = vector.extract_strided_slice %148 {offsets = [0, 0], sizes = [2, 32], strides = [1, 1]} : vector<2x96xf32> to vector<2x32xf32>
    %154 = arith.addf %152, %153 : vector<2x32xf32>
    %155 = arith.negf %154 : vector<2x32xf32>
    %156 = math.exp %155 : vector<2x32xf32>
    %cst_75 = arith.constant 1.000000e+00 : f32
    %157 = vector.broadcast %cst_75 : f32 to vector<2x32xf32>
    %158 = arith.addf %157, %156 : vector<2x32xf32>
    %159 = arith.divf %157, %158 : vector<2x32xf32>
    %160 = vector.extract_strided_slice %151 {offsets = [0, 32], sizes = [2, 32], strides = [1, 1]} : vector<2x96xf32> to vector<2x32xf32>
    %161 = vector.extract_strided_slice %148 {offsets = [0, 32], sizes = [2, 32], strides = [1, 1]} : vector<2x96xf32> to vector<2x32xf32>
    %162 = arith.addf %160, %161 : vector<2x32xf32>
    %163 = arith.negf %162 : vector<2x32xf32>
    %164 = math.exp %163 : vector<2x32xf32>
    %cst_76 = arith.constant 1.000000e+00 : f32
    %165 = vector.broadcast %cst_76 : f32 to vector<2x32xf32>
    %166 = arith.addf %165, %164 : vector<2x32xf32>
    %167 = arith.divf %165, %166 : vector<2x32xf32>
    %168 = vector.extract_strided_slice %151 {offsets = [0, 64], sizes = [2, 32], strides = [1, 1]} : vector<2x96xf32> to vector<2x32xf32>
    %169 = vector.extract_strided_slice %148 {offsets = [0, 64], sizes = [2, 32], strides = [1, 1]} : vector<2x96xf32> to vector<2x32xf32>
    %170 = arith.addf %169, %19 : vector<2x32xf32>
    %171 = arith.mulf %159, %170 : vector<2x32xf32>
    %172 = arith.addf %168, %171 : vector<2x32xf32>
    %173 = math.tanh %172 : vector<2x32xf32>
    %cst_77 = arith.constant 1.000000e+00 : f32
    %174 = vector.broadcast %cst_77 : f32 to vector<2x32xf32>
    %175 = arith.subf %174, %167 : vector<2x32xf32>
    %176 = arith.mulf %175, %173 : vector<2x32xf32>
    %177 = arith.mulf %167, %146 : vector<2x32xf32>
    %178 = arith.addf %176, %177 : vector<2x32xf32>
    %c1_78 = arith.constant 1 : index
    %c0_79 = arith.constant 0 : index
    %c0_80 = arith.constant 0 : index
    %179 = vector.load %arg6[%c1_78, %c0_79, %c0_80] : memref<2x2x32xf32, #tpu.memory_space<vmem>>, vector<1x2x32xf32>
    %180 = vector.shape_cast %179 : vector<1x2x32xf32> to vector<2x32xf32>
    %181 = vector.shape_cast %178 : vector<2x32xf32> to vector<1x2x32xf32>
    tpu.vector_store %arg6[%c1_78, %c0_79, %c0_80], %181 {strides = array<i32>} : memref<2x2x32xf32, #tpu.memory_space<vmem>>, vector<1x2x32xf32>,
    %c1_81 = arith.constant 1 : index
    %182 = arith.index_cast %144 : i32 to index
    %c0_82 = arith.constant 0 : index
    %c0_83 = arith.constant 0 : index
    %183 = vector.load %arg5[%c1_81, %182, %c0_82, %c0_83] : memref<2x8x2x32xf32, #tpu.memory_space<vmem>>, vector<1x1x2x32xf32>
    %184 = vector.shape_cast %183 : vector<1x1x2x32xf32> to vector<2x32xf32>
    %185 = vector.shape_cast %178 : vector<2x32xf32> to vector<1x1x2x32xf32>
    tpu.vector_store %arg5[%c1_81, %182, %c0_82, %c0_83], %185 {strides = array<i32>} : memref<2x8x2x32xf32, #tpu.memory_space<vmem>>, vector<1x1x2x32xf32>,
    %c2_i32 = arith.constant 2 : i32
    %c0_84 = arith.constant 0 : index
    %c0_85 = arith.constant 0 : index
    %c0_86 = arith.constant 0 : index
    %186 = vector.load %arg6[%c0_84, %c0_85, %c0_86] : memref<2x2x32xf32, #tpu.memory_space<vmem>>, vector<1x2x32xf32>
    %187 = vector.shape_cast %186 : vector<1x2x32xf32> to vector<2x32xf32>
    %188 = arith.truncf %187 : vector<2x32xf32> to vector<2x32xbf16>
    %cst_87 = arith.constant dense<0.000000e+00> : vector<2x96xf32>
    %189 = tpu.matmul %188, %9, %cst_87 {dimension_numbers = #tpu.dot_dimension_numbers<[1], [0], [0], [1], [0, 0, 1, 1], [], []>} : vector<2x32xbf16>, vector<32x96xbf16>, vector<2x96xf32> -> vector<2x96xf32>
    %c0_88 = arith.constant 0 : index
    %190 = arith.index_cast %c2_i32 : i32 to index
    %c0_89 = arith.constant 0 : index
    %c0_90 = arith.constant 0 : index
    %191 = vector.load %arg1[%c0_88, %190, %c0_89, %c0_90] : memref<2x8x2x96xf32, #tpu.memory_space<vmem>>, vector<1x1x2x96xf32>
    %192 = vector.shape_cast %191 : vector<1x1x2x96xf32> to vector<2x96xf32>
    %193 = vector.extract_strided_slice %192 {offsets = [0, 0], sizes = [2, 32], strides = [1, 1]} : vector<2x96xf32> to vector<2x32xf32>
    %194 = vector.extract_strided_slice %189 {offsets = [0, 0], sizes = [2, 32], strides = [1, 1]} : vector<2x96xf32> to vector<2x32xf32>
    %195 = arith.addf %193, %194 : vector<2x32xf32>
    %196 = arith.negf %195 : vector<2x32xf32>
    %197 = math.exp %196 : vector<2x32xf32>
    %cst_91 = arith.constant 1.000000e+00 : f32
    %198 = vector.broadcast %cst_91 : f32 to vector<2x32xf32>
    %199 = arith.addf %198, %197 : vector<2x32xf32>
    %200 = arith.divf %198, %199 : vector<2x32xf32>
    %201 = vector.extract_strided_slice %192 {offsets = [0, 32], sizes = [2, 32], strides = [1, 1]} : vector<2x96xf32> to vector<2x32xf32>
    %202 = vector.extract_strided_slice %189 {offsets = [0, 32], sizes = [2, 32], strides = [1, 1]} : vector<2x96xf32> to vector<2x32xf32>
    %203 = arith.addf %201, %202 : vector<2x32xf32>
    %204 = arith.negf %203 : vector<2x32xf32>
    %205 = math.exp %204 : vector<2x32xf32>
    %cst_92 = arith.constant 1.000000e+00 : f32
    %206 = vector.broadcast %cst_92 : f32 to vector<2x32xf32>
    %207 = arith.addf %206, %205 : vector<2x32xf32>
    %208 = arith.divf %206, %207 : vector<2x32xf32>
    %209 = vector.extract_strided_slice %192 {offsets = [0, 64], sizes = [2, 32], strides = [1, 1]} : vector<2x96xf32> to vector<2x32xf32>
    %210 = vector.extract_strided_slice %189 {offsets = [0, 64], sizes = [2, 32], strides = [1, 1]} : vector<2x96xf32> to vector<2x32xf32>
    %211 = arith.addf %210, %15 : vector<2x32xf32>
    %212 = arith.mulf %200, %211 : vector<2x32xf32>
    %213 = arith.addf %209, %212 : vector<2x32xf32>
    %214 = math.tanh %213 : vector<2x32xf32>
    %cst_93 = arith.constant 1.000000e+00 : f32
    %215 = vector.broadcast %cst_93 : f32 to vector<2x32xf32>
    %216 = arith.subf %215, %208 : vector<2x32xf32>
    %217 = arith.mulf %216, %214 : vector<2x32xf32>
    %218 = arith.mulf %208, %187 : vector<2x32xf32>
    %219 = arith.addf %217, %218 : vector<2x32xf32>
    %c0_94 = arith.constant 0 : index
    %c0_95 = arith.constant 0 : index
    %c0_96 = arith.constant 0 : index
    %220 = vector.load %arg6[%c0_94, %c0_95, %c0_96] : memref<2x2x32xf32, #tpu.memory_space<vmem>>, vector<1x2x32xf32>
    %221 = vector.shape_cast %220 : vector<1x2x32xf32> to vector<2x32xf32>
    %222 = vector.shape_cast %219 : vector<2x32xf32> to vector<1x2x32xf32>
    tpu.vector_store %arg6[%c0_94, %c0_95, %c0_96], %222 {strides = array<i32>} : memref<2x2x32xf32, #tpu.memory_space<vmem>>, vector<1x2x32xf32>,
    %c0_97 = arith.constant 0 : index
    %223 = arith.index_cast %c2_i32 : i32 to index
    %c0_98 = arith.constant 0 : index
    %c0_99 = arith.constant 0 : index
    %224 = vector.load %arg5[%c0_97, %223, %c0_98, %c0_99] : memref<2x8x2x32xf32, #tpu.memory_space<vmem>>, vector<1x1x2x32xf32>
    %225 = vector.shape_cast %224 : vector<1x1x2x32xf32> to vector<2x32xf32>
    %226 = vector.shape_cast %219 : vector<2x32xf32> to vector<1x1x2x32xf32>
    tpu.vector_store %arg5[%c0_97, %223, %c0_98, %c0_99], %226 {strides = array<i32>} : memref<2x8x2x32xf32, #tpu.memory_space<vmem>>, vector<1x1x2x32xf32>,
    %c7_i32_100 = arith.constant 7 : i32
    %227 = arith.subi %c7_i32_100, %c2_i32 : i32
    %c1_101 = arith.constant 1 : index
    %c0_102 = arith.constant 0 : index
    %c0_103 = arith.constant 0 : index
    %228 = vector.load %arg6[%c1_101, %c0_102, %c0_103] : memref<2x2x32xf32, #tpu.memory_space<vmem>>, vector<1x2x32xf32>
    %229 = vector.shape_cast %228 : vector<1x2x32xf32> to vector<2x32xf32>
    %230 = arith.truncf %229 : vector<2x32xf32> to vector<2x32xbf16>
    %cst_104 = arith.constant dense<0.000000e+00> : vector<2x96xf32>
    %231 = tpu.matmul %230, %11, %cst_104 {dimension_numbers = #tpu.dot_dimension_numbers<[1], [0], [0], [1], [0, 0, 1, 1], [], []>} : vector<2x32xbf16>, vector<32x96xbf16>, vector<2x96xf32> -> vector<2x96xf32>
    %c1_105 = arith.constant 1 : index
    %232 = arith.index_cast %227 : i32 to index
    %c0_106 = arith.constant 0 : index
    %c0_107 = arith.constant 0 : index
    %233 = vector.load %arg1[%c1_105, %232, %c0_106, %c0_107] : memref<2x8x2x96xf32, #tpu.memory_space<vmem>>, vector<1x1x2x96xf32>
    %234 = vector.shape_cast %233 : vector<1x1x2x96xf32> to vector<2x96xf32>
    %235 = vector.extract_strided_slice %234 {offsets = [0, 0], sizes = [2, 32], strides = [1, 1]} : vector<2x96xf32> to vector<2x32xf32>
    %236 = vector.extract_strided_slice %231 {offsets = [0, 0], sizes = [2, 32], strides = [1, 1]} : vector<2x96xf32> to vector<2x32xf32>
    %237 = arith.addf %235, %236 : vector<2x32xf32>
    %238 = arith.negf %237 : vector<2x32xf32>
    %239 = math.exp %238 : vector<2x32xf32>
    %cst_108 = arith.constant 1.000000e+00 : f32
    %240 = vector.broadcast %cst_108 : f32 to vector<2x32xf32>
    %241 = arith.addf %240, %239 : vector<2x32xf32>
    %242 = arith.divf %240, %241 : vector<2x32xf32>
    %243 = vector.extract_strided_slice %234 {offsets = [0, 32], sizes = [2, 32], strides = [1, 1]} : vector<2x96xf32> to vector<2x32xf32>
    %244 = vector.extract_strided_slice %231 {offsets = [0, 32], sizes = [2, 32], strides = [1, 1]} : vector<2x96xf32> to vector<2x32xf32>
    %245 = arith.addf %243, %244 : vector<2x32xf32>
    %246 = arith.negf %245 : vector<2x32xf32>
    %247 = math.exp %246 : vector<2x32xf32>
    %cst_109 = arith.constant 1.000000e+00 : f32
    %248 = vector.broadcast %cst_109 : f32 to vector<2x32xf32>
    %249 = arith.addf %248, %247 : vector<2x32xf32>
    %250 = arith.divf %248, %249 : vector<2x32xf32>
    %251 = vector.extract_strided_slice %234 {offsets = [0, 64], sizes = [2, 32], strides = [1, 1]} : vector<2x96xf32> to vector<2x32xf32>
    %252 = vector.extract_strided_slice %231 {offsets = [0, 64], sizes = [2, 32], strides = [1, 1]} : vector<2x96xf32> to vector<2x32xf32>
    %253 = arith.addf %252, %19 : vector<2x32xf32>
    %254 = arith.mulf %242, %253 : vector<2x32xf32>
    %255 = arith.addf %251, %254 : vector<2x32xf32>
    %256 = math.tanh %255 : vector<2x32xf32>
    %cst_110 = arith.constant 1.000000e+00 : f32
    %257 = vector.broadcast %cst_110 : f32 to vector<2x32xf32>
    %258 = arith.subf %257, %250 : vector<2x32xf32>
    %259 = arith.mulf %258, %256 : vector<2x32xf32>
    %260 = arith.mulf %250, %229 : vector<2x32xf32>
    %261 = arith.addf %259, %260 : vector<2x32xf32>
    %c1_111 = arith.constant 1 : index
    %c0_112 = arith.constant 0 : index
    %c0_113 = arith.constant 0 : index
    %262 = vector.load %arg6[%c1_111, %c0_112, %c0_113] : memref<2x2x32xf32, #tpu.memory_space<vmem>>, vector<1x2x32xf32>
    %263 = vector.shape_cast %262 : vector<1x2x32xf32> to vector<2x32xf32>
    %264 = vector.shape_cast %261 : vector<2x32xf32> to vector<1x2x32xf32>
    tpu.vector_store %arg6[%c1_111, %c0_112, %c0_113], %264 {strides = array<i32>} : memref<2x2x32xf32, #tpu.memory_space<vmem>>, vector<1x2x32xf32>,
    %c1_114 = arith.constant 1 : index
    %265 = arith.index_cast %227 : i32 to index
    %c0_115 = arith.constant 0 : index
    %c0_116 = arith.constant 0 : index
    %266 = vector.load %arg5[%c1_114, %265, %c0_115, %c0_116] : memref<2x8x2x32xf32, #tpu.memory_space<vmem>>, vector<1x1x2x32xf32>
    %267 = vector.shape_cast %266 : vector<1x1x2x32xf32> to vector<2x32xf32>
    %268 = vector.shape_cast %261 : vector<2x32xf32> to vector<1x1x2x32xf32>
    tpu.vector_store %arg5[%c1_114, %265, %c0_115, %c0_116], %268 {strides = array<i32>} : memref<2x8x2x32xf32, #tpu.memory_space<vmem>>, vector<1x1x2x32xf32>,
    %c3_i32 = arith.constant 3 : i32
    %c0_117 = arith.constant 0 : index
    %c0_118 = arith.constant 0 : index
    %c0_119 = arith.constant 0 : index
    %269 = vector.load %arg6[%c0_117, %c0_118, %c0_119] : memref<2x2x32xf32, #tpu.memory_space<vmem>>, vector<1x2x32xf32>
    %270 = vector.shape_cast %269 : vector<1x2x32xf32> to vector<2x32xf32>
    %271 = arith.truncf %270 : vector<2x32xf32> to vector<2x32xbf16>
    %cst_120 = arith.constant dense<0.000000e+00> : vector<2x96xf32>
    %272 = tpu.matmul %271, %9, %cst_120 {dimension_numbers = #tpu.dot_dimension_numbers<[1], [0], [0], [1], [0, 0, 1, 1], [], []>} : vector<2x32xbf16>, vector<32x96xbf16>, vector<2x96xf32> -> vector<2x96xf32>
    %c0_121 = arith.constant 0 : index
    %273 = arith.index_cast %c3_i32 : i32 to index
    %c0_122 = arith.constant 0 : index
    %c0_123 = arith.constant 0 : index
    %274 = vector.load %arg1[%c0_121, %273, %c0_122, %c0_123] : memref<2x8x2x96xf32, #tpu.memory_space<vmem>>, vector<1x1x2x96xf32>
    %275 = vector.shape_cast %274 : vector<1x1x2x96xf32> to vector<2x96xf32>
    %276 = vector.extract_strided_slice %275 {offsets = [0, 0], sizes = [2, 32], strides = [1, 1]} : vector<2x96xf32> to vector<2x32xf32>
    %277 = vector.extract_strided_slice %272 {offsets = [0, 0], sizes = [2, 32], strides = [1, 1]} : vector<2x96xf32> to vector<2x32xf32>
    %278 = arith.addf %276, %277 : vector<2x32xf32>
    %279 = arith.negf %278 : vector<2x32xf32>
    %280 = math.exp %279 : vector<2x32xf32>
    %cst_124 = arith.constant 1.000000e+00 : f32
    %281 = vector.broadcast %cst_124 : f32 to vector<2x32xf32>
    %282 = arith.addf %281, %280 : vector<2x32xf32>
    %283 = arith.divf %281, %282 : vector<2x32xf32>
    %284 = vector.extract_strided_slice %275 {offsets = [0, 32], sizes = [2, 32], strides = [1, 1]} : vector<2x96xf32> to vector<2x32xf32>
    %285 = vector.extract_strided_slice %272 {offsets = [0, 32], sizes = [2, 32], strides = [1, 1]} : vector<2x96xf32> to vector<2x32xf32>
    %286 = arith.addf %284, %285 : vector<2x32xf32>
    %287 = arith.negf %286 : vector<2x32xf32>
    %288 = math.exp %287 : vector<2x32xf32>
    %cst_125 = arith.constant 1.000000e+00 : f32
    %289 = vector.broadcast %cst_125 : f32 to vector<2x32xf32>
    %290 = arith.addf %289, %288 : vector<2x32xf32>
    %291 = arith.divf %289, %290 : vector<2x32xf32>
    %292 = vector.extract_strided_slice %275 {offsets = [0, 64], sizes = [2, 32], strides = [1, 1]} : vector<2x96xf32> to vector<2x32xf32>
    %293 = vector.extract_strided_slice %272 {offsets = [0, 64], sizes = [2, 32], strides = [1, 1]} : vector<2x96xf32> to vector<2x32xf32>
    %294 = arith.addf %293, %15 : vector<2x32xf32>
    %295 = arith.mulf %283, %294 : vector<2x32xf32>
    %296 = arith.addf %292, %295 : vector<2x32xf32>
    %297 = math.tanh %296 : vector<2x32xf32>
    %cst_126 = arith.constant 1.000000e+00 : f32
    %298 = vector.broadcast %cst_126 : f32 to vector<2x32xf32>
    %299 = arith.subf %298, %291 : vector<2x32xf32>
    %300 = arith.mulf %299, %297 : vector<2x32xf32>
    %301 = arith.mulf %291, %270 : vector<2x32xf32>
    %302 = arith.addf %300, %301 : vector<2x32xf32>
    %c0_127 = arith.constant 0 : index
    %c0_128 = arith.constant 0 : index
    %c0_129 = arith.constant 0 : index
    %303 = vector.load %arg6[%c0_127, %c0_128, %c0_129] : memref<2x2x32xf32, #tpu.memory_space<vmem>>, vector<1x2x32xf32>
    %304 = vector.shape_cast %303 : vector<1x2x32xf32> to vector<2x32xf32>
    %305 = vector.shape_cast %302 : vector<2x32xf32> to vector<1x2x32xf32>
    tpu.vector_store %arg6[%c0_127, %c0_128, %c0_129], %305 {strides = array<i32>} : memref<2x2x32xf32, #tpu.memory_space<vmem>>, vector<1x2x32xf32>,
    %c0_130 = arith.constant 0 : index
    %306 = arith.index_cast %c3_i32 : i32 to index
    %c0_131 = arith.constant 0 : index
    %c0_132 = arith.constant 0 : index
    %307 = vector.load %arg5[%c0_130, %306, %c0_131, %c0_132] : memref<2x8x2x32xf32, #tpu.memory_space<vmem>>, vector<1x1x2x32xf32>
    %308 = vector.shape_cast %307 : vector<1x1x2x32xf32> to vector<2x32xf32>
    %309 = vector.shape_cast %302 : vector<2x32xf32> to vector<1x1x2x32xf32>
    tpu.vector_store %arg5[%c0_130, %306, %c0_131, %c0_132], %309 {strides = array<i32>} : memref<2x8x2x32xf32, #tpu.memory_space<vmem>>, vector<1x1x2x32xf32>,
    %c7_i32_133 = arith.constant 7 : i32
    %310 = arith.subi %c7_i32_133, %c3_i32 : i32
    %c1_134 = arith.constant 1 : index
    %c0_135 = arith.constant 0 : index
    %c0_136 = arith.constant 0 : index
    %311 = vector.load %arg6[%c1_134, %c0_135, %c0_136] : memref<2x2x32xf32, #tpu.memory_space<vmem>>, vector<1x2x32xf32>
    %312 = vector.shape_cast %311 : vector<1x2x32xf32> to vector<2x32xf32>
    %313 = arith.truncf %312 : vector<2x32xf32> to vector<2x32xbf16>
    %cst_137 = arith.constant dense<0.000000e+00> : vector<2x96xf32>
    %314 = tpu.matmul %313, %11, %cst_137 {dimension_numbers = #tpu.dot_dimension_numbers<[1], [0], [0], [1], [0, 0, 1, 1], [], []>} : vector<2x32xbf16>, vector<32x96xbf16>, vector<2x96xf32> -> vector<2x96xf32>
    %c1_138 = arith.constant 1 : index
    %315 = arith.index_cast %310 : i32 to index
    %c0_139 = arith.constant 0 : index
    %c0_140 = arith.constant 0 : index
    %316 = vector.load %arg1[%c1_138, %315, %c0_139, %c0_140] : memref<2x8x2x96xf32, #tpu.memory_space<vmem>>, vector<1x1x2x96xf32>
    %317 = vector.shape_cast %316 : vector<1x1x2x96xf32> to vector<2x96xf32>
    %318 = vector.extract_strided_slice %317 {offsets = [0, 0], sizes = [2, 32], strides = [1, 1]} : vector<2x96xf32> to vector<2x32xf32>
    %319 = vector.extract_strided_slice %314 {offsets = [0, 0], sizes = [2, 32], strides = [1, 1]} : vector<2x96xf32> to vector<2x32xf32>
    %320 = arith.addf %318, %319 : vector<2x32xf32>
    %321 = arith.negf %320 : vector<2x32xf32>
    %322 = math.exp %321 : vector<2x32xf32>
    %cst_141 = arith.constant 1.000000e+00 : f32
    %323 = vector.broadcast %cst_141 : f32 to vector<2x32xf32>
    %324 = arith.addf %323, %322 : vector<2x32xf32>
    %325 = arith.divf %323, %324 : vector<2x32xf32>
    %326 = vector.extract_strided_slice %317 {offsets = [0, 32], sizes = [2, 32], strides = [1, 1]} : vector<2x96xf32> to vector<2x32xf32>
    %327 = vector.extract_strided_slice %314 {offsets = [0, 32], sizes = [2, 32], strides = [1, 1]} : vector<2x96xf32> to vector<2x32xf32>
    %328 = arith.addf %326, %327 : vector<2x32xf32>
    %329 = arith.negf %328 : vector<2x32xf32>
    %330 = math.exp %329 : vector<2x32xf32>
    %cst_142 = arith.constant 1.000000e+00 : f32
    %331 = vector.broadcast %cst_142 : f32 to vector<2x32xf32>
    %332 = arith.addf %331, %330 : vector<2x32xf32>
    %333 = arith.divf %331, %332 : vector<2x32xf32>
    %334 = vector.extract_strided_slice %317 {offsets = [0, 64], sizes = [2, 32], strides = [1, 1]} : vector<2x96xf32> to vector<2x32xf32>
    %335 = vector.extract_strided_slice %314 {offsets = [0, 64], sizes = [2, 32], strides = [1, 1]} : vector<2x96xf32> to vector<2x32xf32>
    %336 = arith.addf %335, %19 : vector<2x32xf32>
    %337 = arith.mulf %325, %336 : vector<2x32xf32>
    %338 = arith.addf %334, %337 : vector<2x32xf32>
    %339 = math.tanh %338 : vector<2x32xf32>
    %cst_143 = arith.constant 1.000000e+00 : f32
    %340 = vector.broadcast %cst_143 : f32 to vector<2x32xf32>
    %341 = arith.subf %340, %333 : vector<2x32xf32>
    %342 = arith.mulf %341, %339 : vector<2x32xf32>
    %343 = arith.mulf %333, %312 : vector<2x32xf32>
    %344 = arith.addf %342, %343 : vector<2x32xf32>
    %c1_144 = arith.constant 1 : index
    %c0_145 = arith.constant 0 : index
    %c0_146 = arith.constant 0 : index
    %345 = vector.load %arg6[%c1_144, %c0_145, %c0_146] : memref<2x2x32xf32, #tpu.memory_space<vmem>>, vector<1x2x32xf32>
    %346 = vector.shape_cast %345 : vector<1x2x32xf32> to vector<2x32xf32>
    %347 = vector.shape_cast %344 : vector<2x32xf32> to vector<1x2x32xf32>
    tpu.vector_store %arg6[%c1_144, %c0_145, %c0_146], %347 {strides = array<i32>} : memref<2x2x32xf32, #tpu.memory_space<vmem>>, vector<1x2x32xf32>,
    %c1_147 = arith.constant 1 : index
    %348 = arith.index_cast %310 : i32 to index
    %c0_148 = arith.constant 0 : index
    %c0_149 = arith.constant 0 : index
    %349 = vector.load %arg5[%c1_147, %348, %c0_148, %c0_149] : memref<2x8x2x32xf32, #tpu.memory_space<vmem>>, vector<1x1x2x32xf32>
    %350 = vector.shape_cast %349 : vector<1x1x2x32xf32> to vector<2x32xf32>
    %351 = vector.shape_cast %344 : vector<2x32xf32> to vector<1x1x2x32xf32>
    tpu.vector_store %arg5[%c1_147, %348, %c0_148, %c0_149], %351 {strides = array<i32>} : memref<2x8x2x32xf32, #tpu.memory_space<vmem>>, vector<1x1x2x32xf32>,
    %c4_i32 = arith.constant 4 : i32
    %c0_150 = arith.constant 0 : index
    %c0_151 = arith.constant 0 : index
    %c0_152 = arith.constant 0 : index
    %352 = vector.load %arg6[%c0_150, %c0_151, %c0_152] : memref<2x2x32xf32, #tpu.memory_space<vmem>>, vector<1x2x32xf32>
    %353 = vector.shape_cast %352 : vector<1x2x32xf32> to vector<2x32xf32>
    %354 = arith.truncf %353 : vector<2x32xf32> to vector<2x32xbf16>
    %cst_153 = arith.constant dense<0.000000e+00> : vector<2x96xf32>
    %355 = tpu.matmul %354, %9, %cst_153 {dimension_numbers = #tpu.dot_dimension_numbers<[1], [0], [0], [1], [0, 0, 1, 1], [], []>} : vector<2x32xbf16>, vector<32x96xbf16>, vector<2x96xf32> -> vector<2x96xf32>
    %c0_154 = arith.constant 0 : index
    %356 = arith.index_cast %c4_i32 : i32 to index
    %c0_155 = arith.constant 0 : index
    %c0_156 = arith.constant 0 : index
    %357 = vector.load %arg1[%c0_154, %356, %c0_155, %c0_156] : memref<2x8x2x96xf32, #tpu.memory_space<vmem>>, vector<1x1x2x96xf32>
    %358 = vector.shape_cast %357 : vector<1x1x2x96xf32> to vector<2x96xf32>
    %359 = vector.extract_strided_slice %358 {offsets = [0, 0], sizes = [2, 32], strides = [1, 1]} : vector<2x96xf32> to vector<2x32xf32>
    %360 = vector.extract_strided_slice %355 {offsets = [0, 0], sizes = [2, 32], strides = [1, 1]} : vector<2x96xf32> to vector<2x32xf32>
    %361 = arith.addf %359, %360 : vector<2x32xf32>
    %362 = arith.negf %361 : vector<2x32xf32>
    %363 = math.exp %362 : vector<2x32xf32>
    %cst_157 = arith.constant 1.000000e+00 : f32
    %364 = vector.broadcast %cst_157 : f32 to vector<2x32xf32>
    %365 = arith.addf %364, %363 : vector<2x32xf32>
    %366 = arith.divf %364, %365 : vector<2x32xf32>
    %367 = vector.extract_strided_slice %358 {offsets = [0, 32], sizes = [2, 32], strides = [1, 1]} : vector<2x96xf32> to vector<2x32xf32>
    %368 = vector.extract_strided_slice %355 {offsets = [0, 32], sizes = [2, 32], strides = [1, 1]} : vector<2x96xf32> to vector<2x32xf32>
    %369 = arith.addf %367, %368 : vector<2x32xf32>
    %370 = arith.negf %369 : vector<2x32xf32>
    %371 = math.exp %370 : vector<2x32xf32>
    %cst_158 = arith.constant 1.000000e+00 : f32
    %372 = vector.broadcast %cst_158 : f32 to vector<2x32xf32>
    %373 = arith.addf %372, %371 : vector<2x32xf32>
    %374 = arith.divf %372, %373 : vector<2x32xf32>
    %375 = vector.extract_strided_slice %358 {offsets = [0, 64], sizes = [2, 32], strides = [1, 1]} : vector<2x96xf32> to vector<2x32xf32>
    %376 = vector.extract_strided_slice %355 {offsets = [0, 64], sizes = [2, 32], strides = [1, 1]} : vector<2x96xf32> to vector<2x32xf32>
    %377 = arith.addf %376, %15 : vector<2x32xf32>
    %378 = arith.mulf %366, %377 : vector<2x32xf32>
    %379 = arith.addf %375, %378 : vector<2x32xf32>
    %380 = math.tanh %379 : vector<2x32xf32>
    %cst_159 = arith.constant 1.000000e+00 : f32
    %381 = vector.broadcast %cst_159 : f32 to vector<2x32xf32>
    %382 = arith.subf %381, %374 : vector<2x32xf32>
    %383 = arith.mulf %382, %380 : vector<2x32xf32>
    %384 = arith.mulf %374, %353 : vector<2x32xf32>
    %385 = arith.addf %383, %384 : vector<2x32xf32>
    %c0_160 = arith.constant 0 : index
    %c0_161 = arith.constant 0 : index
    %c0_162 = arith.constant 0 : index
    %386 = vector.load %arg6[%c0_160, %c0_161, %c0_162] : memref<2x2x32xf32, #tpu.memory_space<vmem>>, vector<1x2x32xf32>
    %387 = vector.shape_cast %386 : vector<1x2x32xf32> to vector<2x32xf32>
    %388 = vector.shape_cast %385 : vector<2x32xf32> to vector<1x2x32xf32>
    tpu.vector_store %arg6[%c0_160, %c0_161, %c0_162], %388 {strides = array<i32>} : memref<2x2x32xf32, #tpu.memory_space<vmem>>, vector<1x2x32xf32>,
    %c0_163 = arith.constant 0 : index
    %389 = arith.index_cast %c4_i32 : i32 to index
    %c0_164 = arith.constant 0 : index
    %c0_165 = arith.constant 0 : index
    %390 = vector.load %arg5[%c0_163, %389, %c0_164, %c0_165] : memref<2x8x2x32xf32, #tpu.memory_space<vmem>>, vector<1x1x2x32xf32>
    %391 = vector.shape_cast %390 : vector<1x1x2x32xf32> to vector<2x32xf32>
    %392 = vector.shape_cast %385 : vector<2x32xf32> to vector<1x1x2x32xf32>
    tpu.vector_store %arg5[%c0_163, %389, %c0_164, %c0_165], %392 {strides = array<i32>} : memref<2x8x2x32xf32, #tpu.memory_space<vmem>>, vector<1x1x2x32xf32>,
    %c7_i32_166 = arith.constant 7 : i32
    %393 = arith.subi %c7_i32_166, %c4_i32 : i32
    %c1_167 = arith.constant 1 : index
    %c0_168 = arith.constant 0 : index
    %c0_169 = arith.constant 0 : index
    %394 = vector.load %arg6[%c1_167, %c0_168, %c0_169] : memref<2x2x32xf32, #tpu.memory_space<vmem>>, vector<1x2x32xf32>
    %395 = vector.shape_cast %394 : vector<1x2x32xf32> to vector<2x32xf32>
    %396 = arith.truncf %395 : vector<2x32xf32> to vector<2x32xbf16>
    %cst_170 = arith.constant dense<0.000000e+00> : vector<2x96xf32>
    %397 = tpu.matmul %396, %11, %cst_170 {dimension_numbers = #tpu.dot_dimension_numbers<[1], [0], [0], [1], [0, 0, 1, 1], [], []>} : vector<2x32xbf16>, vector<32x96xbf16>, vector<2x96xf32> -> vector<2x96xf32>
    %c1_171 = arith.constant 1 : index
    %398 = arith.index_cast %393 : i32 to index
    %c0_172 = arith.constant 0 : index
    %c0_173 = arith.constant 0 : index
    %399 = vector.load %arg1[%c1_171, %398, %c0_172, %c0_173] : memref<2x8x2x96xf32, #tpu.memory_space<vmem>>, vector<1x1x2x96xf32>
    %400 = vector.shape_cast %399 : vector<1x1x2x96xf32> to vector<2x96xf32>
    %401 = vector.extract_strided_slice %400 {offsets = [0, 0], sizes = [2, 32], strides = [1, 1]} : vector<2x96xf32> to vector<2x32xf32>
    %402 = vector.extract_strided_slice %397 {offsets = [0, 0], sizes = [2, 32], strides = [1, 1]} : vector<2x96xf32> to vector<2x32xf32>
    %403 = arith.addf %401, %402 : vector<2x32xf32>
    %404 = arith.negf %403 : vector<2x32xf32>
    %405 = math.exp %404 : vector<2x32xf32>
    %cst_174 = arith.constant 1.000000e+00 : f32
    %406 = vector.broadcast %cst_174 : f32 to vector<2x32xf32>
    %407 = arith.addf %406, %405 : vector<2x32xf32>
    %408 = arith.divf %406, %407 : vector<2x32xf32>
    %409 = vector.extract_strided_slice %400 {offsets = [0, 32], sizes = [2, 32], strides = [1, 1]} : vector<2x96xf32> to vector<2x32xf32>
    %410 = vector.extract_strided_slice %397 {offsets = [0, 32], sizes = [2, 32], strides = [1, 1]} : vector<2x96xf32> to vector<2x32xf32>
    %411 = arith.addf %409, %410 : vector<2x32xf32>
    %412 = arith.negf %411 : vector<2x32xf32>
    %413 = math.exp %412 : vector<2x32xf32>
    %cst_175 = arith.constant 1.000000e+00 : f32
    %414 = vector.broadcast %cst_175 : f32 to vector<2x32xf32>
    %415 = arith.addf %414, %413 : vector<2x32xf32>
    %416 = arith.divf %414, %415 : vector<2x32xf32>
    %417 = vector.extract_strided_slice %400 {offsets = [0, 64], sizes = [2, 32], strides = [1, 1]} : vector<2x96xf32> to vector<2x32xf32>
    %418 = vector.extract_strided_slice %397 {offsets = [0, 64], sizes = [2, 32], strides = [1, 1]} : vector<2x96xf32> to vector<2x32xf32>
    %419 = arith.addf %418, %19 : vector<2x32xf32>
    %420 = arith.mulf %408, %419 : vector<2x32xf32>
    %421 = arith.addf %417, %420 : vector<2x32xf32>
    %422 = math.tanh %421 : vector<2x32xf32>
    %cst_176 = arith.constant 1.000000e+00 : f32
    %423 = vector.broadcast %cst_176 : f32 to vector<2x32xf32>
    %424 = arith.subf %423, %416 : vector<2x32xf32>
    %425 = arith.mulf %424, %422 : vector<2x32xf32>
    %426 = arith.mulf %416, %395 : vector<2x32xf32>
    %427 = arith.addf %425, %426 : vector<2x32xf32>
    %c1_177 = arith.constant 1 : index
    %c0_178 = arith.constant 0 : index
    %c0_179 = arith.constant 0 : index
    %428 = vector.load %arg6[%c1_177, %c0_178, %c0_179] : memref<2x2x32xf32, #tpu.memory_space<vmem>>, vector<1x2x32xf32>
    %429 = vector.shape_cast %428 : vector<1x2x32xf32> to vector<2x32xf32>
    %430 = vector.shape_cast %427 : vector<2x32xf32> to vector<1x2x32xf32>
    tpu.vector_store %arg6[%c1_177, %c0_178, %c0_179], %430 {strides = array<i32>} : memref<2x2x32xf32, #tpu.memory_space<vmem>>, vector<1x2x32xf32>,
    %c1_180 = arith.constant 1 : index
    %431 = arith.index_cast %393 : i32 to index
    %c0_181 = arith.constant 0 : index
    %c0_182 = arith.constant 0 : index
    %432 = vector.load %arg5[%c1_180, %431, %c0_181, %c0_182] : memref<2x8x2x32xf32, #tpu.memory_space<vmem>>, vector<1x1x2x32xf32>
    %433 = vector.shape_cast %432 : vector<1x1x2x32xf32> to vector<2x32xf32>
    %434 = vector.shape_cast %427 : vector<2x32xf32> to vector<1x1x2x32xf32>
    tpu.vector_store %arg5[%c1_180, %431, %c0_181, %c0_182], %434 {strides = array<i32>} : memref<2x8x2x32xf32, #tpu.memory_space<vmem>>, vector<1x1x2x32xf32>,
    %c5_i32 = arith.constant 5 : i32
    %c0_183 = arith.constant 0 : index
    %c0_184 = arith.constant 0 : index
    %c0_185 = arith.constant 0 : index
    %435 = vector.load %arg6[%c0_183, %c0_184, %c0_185] : memref<2x2x32xf32, #tpu.memory_space<vmem>>, vector<1x2x32xf32>
    %436 = vector.shape_cast %435 : vector<1x2x32xf32> to vector<2x32xf32>
    %437 = arith.truncf %436 : vector<2x32xf32> to vector<2x32xbf16>
    %cst_186 = arith.constant dense<0.000000e+00> : vector<2x96xf32>
    %438 = tpu.matmul %437, %9, %cst_186 {dimension_numbers = #tpu.dot_dimension_numbers<[1], [0], [0], [1], [0, 0, 1, 1], [], []>} : vector<2x32xbf16>, vector<32x96xbf16>, vector<2x96xf32> -> vector<2x96xf32>
    %c0_187 = arith.constant 0 : index
    %439 = arith.index_cast %c5_i32 : i32 to index
    %c0_188 = arith.constant 0 : index
    %c0_189 = arith.constant 0 : index
    %440 = vector.load %arg1[%c0_187, %439, %c0_188, %c0_189] : memref<2x8x2x96xf32, #tpu.memory_space<vmem>>, vector<1x1x2x96xf32>
    %441 = vector.shape_cast %440 : vector<1x1x2x96xf32> to vector<2x96xf32>
    %442 = vector.extract_strided_slice %441 {offsets = [0, 0], sizes = [2, 32], strides = [1, 1]} : vector<2x96xf32> to vector<2x32xf32>
    %443 = vector.extract_strided_slice %438 {offsets = [0, 0], sizes = [2, 32], strides = [1, 1]} : vector<2x96xf32> to vector<2x32xf32>
    %444 = arith.addf %442, %443 : vector<2x32xf32>
    %445 = arith.negf %444 : vector<2x32xf32>
    %446 = math.exp %445 : vector<2x32xf32>
    %cst_190 = arith.constant 1.000000e+00 : f32
    %447 = vector.broadcast %cst_190 : f32 to vector<2x32xf32>
    %448 = arith.addf %447, %446 : vector<2x32xf32>
    %449 = arith.divf %447, %448 : vector<2x32xf32>
    %450 = vector.extract_strided_slice %441 {offsets = [0, 32], sizes = [2, 32], strides = [1, 1]} : vector<2x96xf32> to vector<2x32xf32>
    %451 = vector.extract_strided_slice %438 {offsets = [0, 32], sizes = [2, 32], strides = [1, 1]} : vector<2x96xf32> to vector<2x32xf32>
    %452 = arith.addf %450, %451 : vector<2x32xf32>
    %453 = arith.negf %452 : vector<2x32xf32>
    %454 = math.exp %453 : vector<2x32xf32>
    %cst_191 = arith.constant 1.000000e+00 : f32
    %455 = vector.broadcast %cst_191 : f32 to vector<2x32xf32>
    %456 = arith.addf %455, %454 : vector<2x32xf32>
    %457 = arith.divf %455, %456 : vector<2x32xf32>
    %458 = vector.extract_strided_slice %441 {offsets = [0, 64], sizes = [2, 32], strides = [1, 1]} : vector<2x96xf32> to vector<2x32xf32>
    %459 = vector.extract_strided_slice %438 {offsets = [0, 64], sizes = [2, 32], strides = [1, 1]} : vector<2x96xf32> to vector<2x32xf32>
    %460 = arith.addf %459, %15 : vector<2x32xf32>
    %461 = arith.mulf %449, %460 : vector<2x32xf32>
    %462 = arith.addf %458, %461 : vector<2x32xf32>
    %463 = math.tanh %462 : vector<2x32xf32>
    %cst_192 = arith.constant 1.000000e+00 : f32
    %464 = vector.broadcast %cst_192 : f32 to vector<2x32xf32>
    %465 = arith.subf %464, %457 : vector<2x32xf32>
    %466 = arith.mulf %465, %463 : vector<2x32xf32>
    %467 = arith.mulf %457, %436 : vector<2x32xf32>
    %468 = arith.addf %466, %467 : vector<2x32xf32>
    %c0_193 = arith.constant 0 : index
    %c0_194 = arith.constant 0 : index
    %c0_195 = arith.constant 0 : index
    %469 = vector.load %arg6[%c0_193, %c0_194, %c0_195] : memref<2x2x32xf32, #tpu.memory_space<vmem>>, vector<1x2x32xf32>
    %470 = vector.shape_cast %469 : vector<1x2x32xf32> to vector<2x32xf32>
    %471 = vector.shape_cast %468 : vector<2x32xf32> to vector<1x2x32xf32>
    tpu.vector_store %arg6[%c0_193, %c0_194, %c0_195], %471 {strides = array<i32>} : memref<2x2x32xf32, #tpu.memory_space<vmem>>, vector<1x2x32xf32>,
    %c0_196 = arith.constant 0 : index
    %472 = arith.index_cast %c5_i32 : i32 to index
    %c0_197 = arith.constant 0 : index
    %c0_198 = arith.constant 0 : index
    %473 = vector.load %arg5[%c0_196, %472, %c0_197, %c0_198] : memref<2x8x2x32xf32, #tpu.memory_space<vmem>>, vector<1x1x2x32xf32>
    %474 = vector.shape_cast %473 : vector<1x1x2x32xf32> to vector<2x32xf32>
    %475 = vector.shape_cast %468 : vector<2x32xf32> to vector<1x1x2x32xf32>
    tpu.vector_store %arg5[%c0_196, %472, %c0_197, %c0_198], %475 {strides = array<i32>} : memref<2x8x2x32xf32, #tpu.memory_space<vmem>>, vector<1x1x2x32xf32>,
    %c7_i32_199 = arith.constant 7 : i32
    %476 = arith.subi %c7_i32_199, %c5_i32 : i32
    %c1_200 = arith.constant 1 : index
    %c0_201 = arith.constant 0 : index
    %c0_202 = arith.constant 0 : index
    %477 = vector.load %arg6[%c1_200, %c0_201, %c0_202] : memref<2x2x32xf32, #tpu.memory_space<vmem>>, vector<1x2x32xf32>
    %478 = vector.shape_cast %477 : vector<1x2x32xf32> to vector<2x32xf32>
    %479 = arith.truncf %478 : vector<2x32xf32> to vector<2x32xbf16>
    %cst_203 = arith.constant dense<0.000000e+00> : vector<2x96xf32>
    %480 = tpu.matmul %479, %11, %cst_203 {dimension_numbers = #tpu.dot_dimension_numbers<[1], [0], [0], [1], [0, 0, 1, 1], [], []>} : vector<2x32xbf16>, vector<32x96xbf16>, vector<2x96xf32> -> vector<2x96xf32>
    %c1_204 = arith.constant 1 : index
    %481 = arith.index_cast %476 : i32 to index
    %c0_205 = arith.constant 0 : index
    %c0_206 = arith.constant 0 : index
    %482 = vector.load %arg1[%c1_204, %481, %c0_205, %c0_206] : memref<2x8x2x96xf32, #tpu.memory_space<vmem>>, vector<1x1x2x96xf32>
    %483 = vector.shape_cast %482 : vector<1x1x2x96xf32> to vector<2x96xf32>
    %484 = vector.extract_strided_slice %483 {offsets = [0, 0], sizes = [2, 32], strides = [1, 1]} : vector<2x96xf32> to vector<2x32xf32>
    %485 = vector.extract_strided_slice %480 {offsets = [0, 0], sizes = [2, 32], strides = [1, 1]} : vector<2x96xf32> to vector<2x32xf32>
    %486 = arith.addf %484, %485 : vector<2x32xf32>
    %487 = arith.negf %486 : vector<2x32xf32>
    %488 = math.exp %487 : vector<2x32xf32>
    %cst_207 = arith.constant 1.000000e+00 : f32
    %489 = vector.broadcast %cst_207 : f32 to vector<2x32xf32>
    %490 = arith.addf %489, %488 : vector<2x32xf32>
    %491 = arith.divf %489, %490 : vector<2x32xf32>
    %492 = vector.extract_strided_slice %483 {offsets = [0, 32], sizes = [2, 32], strides = [1, 1]} : vector<2x96xf32> to vector<2x32xf32>
    %493 = vector.extract_strided_slice %480 {offsets = [0, 32], sizes = [2, 32], strides = [1, 1]} : vector<2x96xf32> to vector<2x32xf32>
    %494 = arith.addf %492, %493 : vector<2x32xf32>
    %495 = arith.negf %494 : vector<2x32xf32>
    %496 = math.exp %495 : vector<2x32xf32>
    %cst_208 = arith.constant 1.000000e+00 : f32
    %497 = vector.broadcast %cst_208 : f32 to vector<2x32xf32>
    %498 = arith.addf %497, %496 : vector<2x32xf32>
    %499 = arith.divf %497, %498 : vector<2x32xf32>
    %500 = vector.extract_strided_slice %483 {offsets = [0, 64], sizes = [2, 32], strides = [1, 1]} : vector<2x96xf32> to vector<2x32xf32>
    %501 = vector.extract_strided_slice %480 {offsets = [0, 64], sizes = [2, 32], strides = [1, 1]} : vector<2x96xf32> to vector<2x32xf32>
    %502 = arith.addf %501, %19 : vector<2x32xf32>
    %503 = arith.mulf %491, %502 : vector<2x32xf32>
    %504 = arith.addf %500, %503 : vector<2x32xf32>
    %505 = math.tanh %504 : vector<2x32xf32>
    %cst_209 = arith.constant 1.000000e+00 : f32
    %506 = vector.broadcast %cst_209 : f32 to vector<2x32xf32>
    %507 = arith.subf %506, %499 : vector<2x32xf32>
    %508 = arith.mulf %507, %505 : vector<2x32xf32>
    %509 = arith.mulf %499, %478 : vector<2x32xf32>
    %510 = arith.addf %508, %509 : vector<2x32xf32>
    %c1_210 = arith.constant 1 : index
    %c0_211 = arith.constant 0 : index
    %c0_212 = arith.constant 0 : index
    %511 = vector.load %arg6[%c1_210, %c0_211, %c0_212] : memref<2x2x32xf32, #tpu.memory_space<vmem>>, vector<1x2x32xf32>
    %512 = vector.shape_cast %511 : vector<1x2x32xf32> to vector<2x32xf32>
    %513 = vector.shape_cast %510 : vector<2x32xf32> to vector<1x2x32xf32>
    tpu.vector_store %arg6[%c1_210, %c0_211, %c0_212], %513 {strides = array<i32>} : memref<2x2x32xf32, #tpu.memory_space<vmem>>, vector<1x2x32xf32>,
    %c1_213 = arith.constant 1 : index
    %514 = arith.index_cast %476 : i32 to index
    %c0_214 = arith.constant 0 : index
    %c0_215 = arith.constant 0 : index
    %515 = vector.load %arg5[%c1_213, %514, %c0_214, %c0_215] : memref<2x8x2x32xf32, #tpu.memory_space<vmem>>, vector<1x1x2x32xf32>
    %516 = vector.shape_cast %515 : vector<1x1x2x32xf32> to vector<2x32xf32>
    %517 = vector.shape_cast %510 : vector<2x32xf32> to vector<1x1x2x32xf32>
    tpu.vector_store %arg5[%c1_213, %514, %c0_214, %c0_215], %517 {strides = array<i32>} : memref<2x8x2x32xf32, #tpu.memory_space<vmem>>, vector<1x1x2x32xf32>,
    %c6_i32 = arith.constant 6 : i32
    %c0_216 = arith.constant 0 : index
    %c0_217 = arith.constant 0 : index
    %c0_218 = arith.constant 0 : index
    %518 = vector.load %arg6[%c0_216, %c0_217, %c0_218] : memref<2x2x32xf32, #tpu.memory_space<vmem>>, vector<1x2x32xf32>
    %519 = vector.shape_cast %518 : vector<1x2x32xf32> to vector<2x32xf32>
    %520 = arith.truncf %519 : vector<2x32xf32> to vector<2x32xbf16>
    %cst_219 = arith.constant dense<0.000000e+00> : vector<2x96xf32>
    %521 = tpu.matmul %520, %9, %cst_219 {dimension_numbers = #tpu.dot_dimension_numbers<[1], [0], [0], [1], [0, 0, 1, 1], [], []>} : vector<2x32xbf16>, vector<32x96xbf16>, vector<2x96xf32> -> vector<2x96xf32>
    %c0_220 = arith.constant 0 : index
    %522 = arith.index_cast %c6_i32 : i32 to index
    %c0_221 = arith.constant 0 : index
    %c0_222 = arith.constant 0 : index
    %523 = vector.load %arg1[%c0_220, %522, %c0_221, %c0_222] : memref<2x8x2x96xf32, #tpu.memory_space<vmem>>, vector<1x1x2x96xf32>
    %524 = vector.shape_cast %523 : vector<1x1x2x96xf32> to vector<2x96xf32>
    %525 = vector.extract_strided_slice %524 {offsets = [0, 0], sizes = [2, 32], strides = [1, 1]} : vector<2x96xf32> to vector<2x32xf32>
    %526 = vector.extract_strided_slice %521 {offsets = [0, 0], sizes = [2, 32], strides = [1, 1]} : vector<2x96xf32> to vector<2x32xf32>
    %527 = arith.addf %525, %526 : vector<2x32xf32>
    %528 = arith.negf %527 : vector<2x32xf32>
    %529 = math.exp %528 : vector<2x32xf32>
    %cst_223 = arith.constant 1.000000e+00 : f32
    %530 = vector.broadcast %cst_223 : f32 to vector<2x32xf32>
    %531 = arith.addf %530, %529 : vector<2x32xf32>
    %532 = arith.divf %530, %531 : vector<2x32xf32>
    %533 = vector.extract_strided_slice %524 {offsets = [0, 32], sizes = [2, 32], strides = [1, 1]} : vector<2x96xf32> to vector<2x32xf32>
    %534 = vector.extract_strided_slice %521 {offsets = [0, 32], sizes = [2, 32], strides = [1, 1]} : vector<2x96xf32> to vector<2x32xf32>
    %535 = arith.addf %533, %534 : vector<2x32xf32>
    %536 = arith.negf %535 : vector<2x32xf32>
    %537 = math.exp %536 : vector<2x32xf32>
    %cst_224 = arith.constant 1.000000e+00 : f32
    %538 = vector.broadcast %cst_224 : f32 to vector<2x32xf32>
    %539 = arith.addf %538, %537 : vector<2x32xf32>
    %540 = arith.divf %538, %539 : vector<2x32xf32>
    %541 = vector.extract_strided_slice %524 {offsets = [0, 64], sizes = [2, 32], strides = [1, 1]} : vector<2x96xf32> to vector<2x32xf32>
    %542 = vector.extract_strided_slice %521 {offsets = [0, 64], sizes = [2, 32], strides = [1, 1]} : vector<2x96xf32> to vector<2x32xf32>
    %543 = arith.addf %542, %15 : vector<2x32xf32>
    %544 = arith.mulf %532, %543 : vector<2x32xf32>
    %545 = arith.addf %541, %544 : vector<2x32xf32>
    %546 = math.tanh %545 : vector<2x32xf32>
    %cst_225 = arith.constant 1.000000e+00 : f32
    %547 = vector.broadcast %cst_225 : f32 to vector<2x32xf32>
    %548 = arith.subf %547, %540 : vector<2x32xf32>
    %549 = arith.mulf %548, %546 : vector<2x32xf32>
    %550 = arith.mulf %540, %519 : vector<2x32xf32>
    %551 = arith.addf %549, %550 : vector<2x32xf32>
    %c0_226 = arith.constant 0 : index
    %c0_227 = arith.constant 0 : index
    %c0_228 = arith.constant 0 : index
    %552 = vector.load %arg6[%c0_226, %c0_227, %c0_228] : memref<2x2x32xf32, #tpu.memory_space<vmem>>, vector<1x2x32xf32>
    %553 = vector.shape_cast %552 : vector<1x2x32xf32> to vector<2x32xf32>
    %554 = vector.shape_cast %551 : vector<2x32xf32> to vector<1x2x32xf32>
    tpu.vector_store %arg6[%c0_226, %c0_227, %c0_228], %554 {strides = array<i32>} : memref<2x2x32xf32, #tpu.memory_space<vmem>>, vector<1x2x32xf32>,
    %c0_229 = arith.constant 0 : index
    %555 = arith.index_cast %c6_i32 : i32 to index
    %c0_230 = arith.constant 0 : index
    %c0_231 = arith.constant 0 : index
    %556 = vector.load %arg5[%c0_229, %555, %c0_230, %c0_231] : memref<2x8x2x32xf32, #tpu.memory_space<vmem>>, vector<1x1x2x32xf32>
    %557 = vector.shape_cast %556 : vector<1x1x2x32xf32> to vector<2x32xf32>
    %558 = vector.shape_cast %551 : vector<2x32xf32> to vector<1x1x2x32xf32>
    tpu.vector_store %arg5[%c0_229, %555, %c0_230, %c0_231], %558 {strides = array<i32>} : memref<2x8x2x32xf32, #tpu.memory_space<vmem>>, vector<1x1x2x32xf32>,
    %c7_i32_232 = arith.constant 7 : i32
    %559 = arith.subi %c7_i32_232, %c6_i32 : i32
    %c1_233 = arith.constant 1 : index
    %c0_234 = arith.constant 0 : index
    %c0_235 = arith.constant 0 : index
    %560 = vector.load %arg6[%c1_233, %c0_234, %c0_235] : memref<2x2x32xf32, #tpu.memory_space<vmem>>, vector<1x2x32xf32>
    %561 = vector.shape_cast %560 : vector<1x2x32xf32> to vector<2x32xf32>
    %562 = arith.truncf %561 : vector<2x32xf32> to vector<2x32xbf16>
    %cst_236 = arith.constant dense<0.000000e+00> : vector<2x96xf32>
    %563 = tpu.matmul %562, %11, %cst_236 {dimension_numbers = #tpu.dot_dimension_numbers<[1], [0], [0], [1], [0, 0, 1, 1], [], []>} : vector<2x32xbf16>, vector<32x96xbf16>, vector<2x96xf32> -> vector<2x96xf32>
    %c1_237 = arith.constant 1 : index
    %564 = arith.index_cast %559 : i32 to index
    %c0_238 = arith.constant 0 : index
    %c0_239 = arith.constant 0 : index
    %565 = vector.load %arg1[%c1_237, %564, %c0_238, %c0_239] : memref<2x8x2x96xf32, #tpu.memory_space<vmem>>, vector<1x1x2x96xf32>
    %566 = vector.shape_cast %565 : vector<1x1x2x96xf32> to vector<2x96xf32>
    %567 = vector.extract_strided_slice %566 {offsets = [0, 0], sizes = [2, 32], strides = [1, 1]} : vector<2x96xf32> to vector<2x32xf32>
    %568 = vector.extract_strided_slice %563 {offsets = [0, 0], sizes = [2, 32], strides = [1, 1]} : vector<2x96xf32> to vector<2x32xf32>
    %569 = arith.addf %567, %568 : vector<2x32xf32>
    %570 = arith.negf %569 : vector<2x32xf32>
    %571 = math.exp %570 : vector<2x32xf32>
    %cst_240 = arith.constant 1.000000e+00 : f32
    %572 = vector.broadcast %cst_240 : f32 to vector<2x32xf32>
    %573 = arith.addf %572, %571 : vector<2x32xf32>
    %574 = arith.divf %572, %573 : vector<2x32xf32>
    %575 = vector.extract_strided_slice %566 {offsets = [0, 32], sizes = [2, 32], strides = [1, 1]} : vector<2x96xf32> to vector<2x32xf32>
    %576 = vector.extract_strided_slice %563 {offsets = [0, 32], sizes = [2, 32], strides = [1, 1]} : vector<2x96xf32> to vector<2x32xf32>
    %577 = arith.addf %575, %576 : vector<2x32xf32>
    %578 = arith.negf %577 : vector<2x32xf32>
    %579 = math.exp %578 : vector<2x32xf32>
    %cst_241 = arith.constant 1.000000e+00 : f32
    %580 = vector.broadcast %cst_241 : f32 to vector<2x32xf32>
    %581 = arith.addf %580, %579 : vector<2x32xf32>
    %582 = arith.divf %580, %581 : vector<2x32xf32>
    %583 = vector.extract_strided_slice %566 {offsets = [0, 64], sizes = [2, 32], strides = [1, 1]} : vector<2x96xf32> to vector<2x32xf32>
    %584 = vector.extract_strided_slice %563 {offsets = [0, 64], sizes = [2, 32], strides = [1, 1]} : vector<2x96xf32> to vector<2x32xf32>
    %585 = arith.addf %584, %19 : vector<2x32xf32>
    %586 = arith.mulf %574, %585 : vector<2x32xf32>
    %587 = arith.addf %583, %586 : vector<2x32xf32>
    %588 = math.tanh %587 : vector<2x32xf32>
    %cst_242 = arith.constant 1.000000e+00 : f32
    %589 = vector.broadcast %cst_242 : f32 to vector<2x32xf32>
    %590 = arith.subf %589, %582 : vector<2x32xf32>
    %591 = arith.mulf %590, %588 : vector<2x32xf32>
    %592 = arith.mulf %582, %561 : vector<2x32xf32>
    %593 = arith.addf %591, %592 : vector<2x32xf32>
    %c1_243 = arith.constant 1 : index
    %c0_244 = arith.constant 0 : index
    %c0_245 = arith.constant 0 : index
    %594 = vector.load %arg6[%c1_243, %c0_244, %c0_245] : memref<2x2x32xf32, #tpu.memory_space<vmem>>, vector<1x2x32xf32>
    %595 = vector.shape_cast %594 : vector<1x2x32xf32> to vector<2x32xf32>
    %596 = vector.shape_cast %593 : vector<2x32xf32> to vector<1x2x32xf32>
    tpu.vector_store %arg6[%c1_243, %c0_244, %c0_245], %596 {strides = array<i32>} : memref<2x2x32xf32, #tpu.memory_space<vmem>>, vector<1x2x32xf32>,
    %c1_246 = arith.constant 1 : index
    %597 = arith.index_cast %559 : i32 to index
    %c0_247 = arith.constant 0 : index
    %c0_248 = arith.constant 0 : index
    %598 = vector.load %arg5[%c1_246, %597, %c0_247, %c0_248] : memref<2x8x2x32xf32, #tpu.memory_space<vmem>>, vector<1x1x2x32xf32>
    %599 = vector.shape_cast %598 : vector<1x1x2x32xf32> to vector<2x32xf32>
    %600 = vector.shape_cast %593 : vector<2x32xf32> to vector<1x1x2x32xf32>
    tpu.vector_store %arg5[%c1_246, %597, %c0_247, %c0_248], %600 {strides = array<i32>} : memref<2x8x2x32xf32, #tpu.memory_space<vmem>>, vector<1x1x2x32xf32>,
    %c7_i32_249 = arith.constant 7 : i32
    %c0_250 = arith.constant 0 : index
    %c0_251 = arith.constant 0 : index
    %c0_252 = arith.constant 0 : index
    %601 = vector.load %arg6[%c0_250, %c0_251, %c0_252] : memref<2x2x32xf32, #tpu.memory_space<vmem>>, vector<1x2x32xf32>
    %602 = vector.shape_cast %601 : vector<1x2x32xf32> to vector<2x32xf32>
    %603 = arith.truncf %602 : vector<2x32xf32> to vector<2x32xbf16>
    %cst_253 = arith.constant dense<0.000000e+00> : vector<2x96xf32>
    %604 = tpu.matmul %603, %9, %cst_253 {dimension_numbers = #tpu.dot_dimension_numbers<[1], [0], [0], [1], [0, 0, 1, 1], [], []>} : vector<2x32xbf16>, vector<32x96xbf16>, vector<2x96xf32> -> vector<2x96xf32>
    %c0_254 = arith.constant 0 : index
    %605 = arith.index_cast %c7_i32_249 : i32 to index
    %c0_255 = arith.constant 0 : index
    %c0_256 = arith.constant 0 : index
    %606 = vector.load %arg1[%c0_254, %605, %c0_255, %c0_256] : memref<2x8x2x96xf32, #tpu.memory_space<vmem>>, vector<1x1x2x96xf32>
    %607 = vector.shape_cast %606 : vector<1x1x2x96xf32> to vector<2x96xf32>
    %608 = vector.extract_strided_slice %607 {offsets = [0, 0], sizes = [2, 32], strides = [1, 1]} : vector<2x96xf32> to vector<2x32xf32>
    %609 = vector.extract_strided_slice %604 {offsets = [0, 0], sizes = [2, 32], strides = [1, 1]} : vector<2x96xf32> to vector<2x32xf32>
    %610 = arith.addf %608, %609 : vector<2x32xf32>
    %611 = arith.negf %610 : vector<2x32xf32>
    %612 = math.exp %611 : vector<2x32xf32>
    %cst_257 = arith.constant 1.000000e+00 : f32
    %613 = vector.broadcast %cst_257 : f32 to vector<2x32xf32>
    %614 = arith.addf %613, %612 : vector<2x32xf32>
    %615 = arith.divf %613, %614 : vector<2x32xf32>
    %616 = vector.extract_strided_slice %607 {offsets = [0, 32], sizes = [2, 32], strides = [1, 1]} : vector<2x96xf32> to vector<2x32xf32>
    %617 = vector.extract_strided_slice %604 {offsets = [0, 32], sizes = [2, 32], strides = [1, 1]} : vector<2x96xf32> to vector<2x32xf32>
    %618 = arith.addf %616, %617 : vector<2x32xf32>
    %619 = arith.negf %618 : vector<2x32xf32>
    %620 = math.exp %619 : vector<2x32xf32>
    %cst_258 = arith.constant 1.000000e+00 : f32
    %621 = vector.broadcast %cst_258 : f32 to vector<2x32xf32>
    %622 = arith.addf %621, %620 : vector<2x32xf32>
    %623 = arith.divf %621, %622 : vector<2x32xf32>
    %624 = vector.extract_strided_slice %607 {offsets = [0, 64], sizes = [2, 32], strides = [1, 1]} : vector<2x96xf32> to vector<2x32xf32>
    %625 = vector.extract_strided_slice %604 {offsets = [0, 64], sizes = [2, 32], strides = [1, 1]} : vector<2x96xf32> to vector<2x32xf32>
    %626 = arith.addf %625, %15 : vector<2x32xf32>
    %627 = arith.mulf %615, %626 : vector<2x32xf32>
    %628 = arith.addf %624, %627 : vector<2x32xf32>
    %629 = math.tanh %628 : vector<2x32xf32>
    %cst_259 = arith.constant 1.000000e+00 : f32
    %630 = vector.broadcast %cst_259 : f32 to vector<2x32xf32>
    %631 = arith.subf %630, %623 : vector<2x32xf32>
    %632 = arith.mulf %631, %629 : vector<2x32xf32>
    %633 = arith.mulf %623, %602 : vector<2x32xf32>
    %634 = arith.addf %632, %633 : vector<2x32xf32>
    %c0_260 = arith.constant 0 : index
    %c0_261 = arith.constant 0 : index
    %c0_262 = arith.constant 0 : index
    %635 = vector.load %arg6[%c0_260, %c0_261, %c0_262] : memref<2x2x32xf32, #tpu.memory_space<vmem>>, vector<1x2x32xf32>
    %636 = vector.shape_cast %635 : vector<1x2x32xf32> to vector<2x32xf32>
    %637 = vector.shape_cast %634 : vector<2x32xf32> to vector<1x2x32xf32>
    tpu.vector_store %arg6[%c0_260, %c0_261, %c0_262], %637 {strides = array<i32>} : memref<2x2x32xf32, #tpu.memory_space<vmem>>, vector<1x2x32xf32>,
    %c0_263 = arith.constant 0 : index
    %638 = arith.index_cast %c7_i32_249 : i32 to index
    %c0_264 = arith.constant 0 : index
    %c0_265 = arith.constant 0 : index
    %639 = vector.load %arg5[%c0_263, %638, %c0_264, %c0_265] : memref<2x8x2x32xf32, #tpu.memory_space<vmem>>, vector<1x1x2x32xf32>
    %640 = vector.shape_cast %639 : vector<1x1x2x32xf32> to vector<2x32xf32>
    %641 = vector.shape_cast %634 : vector<2x32xf32> to vector<1x1x2x32xf32>
    tpu.vector_store %arg5[%c0_263, %638, %c0_264, %c0_265], %641 {strides = array<i32>} : memref<2x8x2x32xf32, #tpu.memory_space<vmem>>, vector<1x1x2x32xf32>,
    %c7_i32_266 = arith.constant 7 : i32
    %642 = arith.subi %c7_i32_266, %c7_i32_249 : i32
    %c1_267 = arith.constant 1 : index
    %c0_268 = arith.constant 0 : index
    %c0_269 = arith.constant 0 : index
    %643 = vector.load %arg6[%c1_267, %c0_268, %c0_269] : memref<2x2x32xf32, #tpu.memory_space<vmem>>, vector<1x2x32xf32>
    %644 = vector.shape_cast %643 : vector<1x2x32xf32> to vector<2x32xf32>
    %645 = arith.truncf %644 : vector<2x32xf32> to vector<2x32xbf16>
    %cst_270 = arith.constant dense<0.000000e+00> : vector<2x96xf32>
    %646 = tpu.matmul %645, %11, %cst_270 {dimension_numbers = #tpu.dot_dimension_numbers<[1], [0], [0], [1], [0, 0, 1, 1], [], []>} : vector<2x32xbf16>, vector<32x96xbf16>, vector<2x96xf32> -> vector<2x96xf32>
    %c1_271 = arith.constant 1 : index
    %647 = arith.index_cast %642 : i32 to index
    %c0_272 = arith.constant 0 : index
    %c0_273 = arith.constant 0 : index
    %648 = vector.load %arg1[%c1_271, %647, %c0_272, %c0_273] : memref<2x8x2x96xf32, #tpu.memory_space<vmem>>, vector<1x1x2x96xf32>
    %649 = vector.shape_cast %648 : vector<1x1x2x96xf32> to vector<2x96xf32>
    %650 = vector.extract_strided_slice %649 {offsets = [0, 0], sizes = [2, 32], strides = [1, 1]} : vector<2x96xf32> to vector<2x32xf32>
    %651 = vector.extract_strided_slice %646 {offsets = [0, 0], sizes = [2, 32], strides = [1, 1]} : vector<2x96xf32> to vector<2x32xf32>
    %652 = arith.addf %650, %651 : vector<2x32xf32>
    %653 = arith.negf %652 : vector<2x32xf32>
    %654 = math.exp %653 : vector<2x32xf32>
    %cst_274 = arith.constant 1.000000e+00 : f32
    %655 = vector.broadcast %cst_274 : f32 to vector<2x32xf32>
    %656 = arith.addf %655, %654 : vector<2x32xf32>
    %657 = arith.divf %655, %656 : vector<2x32xf32>
    %658 = vector.extract_strided_slice %649 {offsets = [0, 32], sizes = [2, 32], strides = [1, 1]} : vector<2x96xf32> to vector<2x32xf32>
    %659 = vector.extract_strided_slice %646 {offsets = [0, 32], sizes = [2, 32], strides = [1, 1]} : vector<2x96xf32> to vector<2x32xf32>
    %660 = arith.addf %658, %659 : vector<2x32xf32>
    %661 = arith.negf %660 : vector<2x32xf32>
    %662 = math.exp %661 : vector<2x32xf32>
    %cst_275 = arith.constant 1.000000e+00 : f32
    %663 = vector.broadcast %cst_275 : f32 to vector<2x32xf32>
    %664 = arith.addf %663, %662 : vector<2x32xf32>
    %665 = arith.divf %663, %664 : vector<2x32xf32>
    %666 = vector.extract_strided_slice %649 {offsets = [0, 64], sizes = [2, 32], strides = [1, 1]} : vector<2x96xf32> to vector<2x32xf32>
    %667 = vector.extract_strided_slice %646 {offsets = [0, 64], sizes = [2, 32], strides = [1, 1]} : vector<2x96xf32> to vector<2x32xf32>
    %668 = arith.addf %667, %19 : vector<2x32xf32>
    %669 = arith.mulf %657, %668 : vector<2x32xf32>
    %670 = arith.addf %666, %669 : vector<2x32xf32>
    %671 = math.tanh %670 : vector<2x32xf32>
    %cst_276 = arith.constant 1.000000e+00 : f32
    %672 = vector.broadcast %cst_276 : f32 to vector<2x32xf32>
    %673 = arith.subf %672, %665 : vector<2x32xf32>
    %674 = arith.mulf %673, %671 : vector<2x32xf32>
    %675 = arith.mulf %665, %644 : vector<2x32xf32>
    %676 = arith.addf %674, %675 : vector<2x32xf32>
    %c1_277 = arith.constant 1 : index
    %c0_278 = arith.constant 0 : index
    %c0_279 = arith.constant 0 : index
    %677 = vector.load %arg6[%c1_277, %c0_278, %c0_279] : memref<2x2x32xf32, #tpu.memory_space<vmem>>, vector<1x2x32xf32>
    %678 = vector.shape_cast %677 : vector<1x2x32xf32> to vector<2x32xf32>
    %679 = vector.shape_cast %676 : vector<2x32xf32> to vector<1x2x32xf32>
    tpu.vector_store %arg6[%c1_277, %c0_278, %c0_279], %679 {strides = array<i32>} : memref<2x2x32xf32, #tpu.memory_space<vmem>>, vector<1x2x32xf32>,
    %c1_280 = arith.constant 1 : index
    %680 = arith.index_cast %642 : i32 to index
    %c0_281 = arith.constant 0 : index
    %c0_282 = arith.constant 0 : index
    %681 = vector.load %arg5[%c1_280, %680, %c0_281, %c0_282] : memref<2x8x2x32xf32, #tpu.memory_space<vmem>>, vector<1x1x2x32xf32>
    %682 = vector.shape_cast %681 : vector<1x1x2x32xf32> to vector<2x32xf32>
    %683 = vector.shape_cast %676 : vector<2x32xf32> to vector<1x1x2x32xf32>
    tpu.vector_store %arg5[%c1_280, %680, %c0_281, %c0_282], %683 {strides = array<i32>} : memref<2x8x2x32xf32, #tpu.memory_space<vmem>>, vector<1x1x2x32xf32>,
    %c8_i32 = arith.constant 8 : i32
    return
  }
  func.func @transform_0(%arg0: i32) -> (i32, i32, i32, i32) {
    %c0_i32 = arith.constant 0 : i32
    %c0_i32_0 = arith.constant 0 : i32
    %c0_i32_1 = arith.constant 0 : i32
    %c0_i32_2 = arith.constant 0 : i32
    %c0_i32_3 = arith.constant 0 : i32
    return %c0_i32, %c0_i32_0, %c0_i32_1, %c0_i32_2 : i32, i32, i32, i32
  }
  func.func @transform_1(%arg0: i32) -> (i32, i32) {
    %c0_i32 = arith.constant 0 : i32
    %c0_i32_0 = arith.constant 0 : i32
    %c0_i32_1 = arith.constant 0 : i32
    return %c0_i32, %c0_i32_0 : i32, i32
  }
  func.func @transform_2(%arg0: i32) -> (i32, i32, i32) {
    %c0_i32 = arith.constant 0 : i32
    %c0_i32_0 = arith.constant 0 : i32
    %c0_i32_1 = arith.constant 0 : i32
    %c0_i32_2 = arith.constant 0 : i32
    return %c0_i32, %c0_i32_0, %c0_i32_1 : i32, i32, i32
  }
  func.func @transform_3(%arg0: i32) -> (i32, i32, i32) {
    %c0_i32 = arith.constant 0 : i32
    %c0_i32_0 = arith.constant 0 : i32
    %c0_i32_1 = arith.constant 0 : i32
    %c0_i32_2 = arith.constant 0 : i32
    return %c0_i32, %c0_i32_0, %c0_i32_1 : i32, i32, i32
  }
  func.func @transform_4(%arg0: i32) -> (i32, i32, i32, i32) {
    %c0_i32 = arith.constant 0 : i32
    %c0_i32_0 = arith.constant 0 : i32
    %c0_i32_1 = arith.constant 0 : i32
    %c0_i32_2 = arith.constant 0 : i32
    %c0_i32_3 = arith.constant 0 : i32
    return %c0_i32, %c0_i32_0, %c0_i32_1, %c0_i32_2 : i32, i32, i32, i32
  }
}

module attributes {stable_mosaic.version = 11 : i64} {
  func.func @_gru_decode_nll_kernel(%arg0: i32, %arg1: memref<8x2x96xf32, #tpu.memory_space<vmem>>, %arg2: memref<2x32xf32, #tpu.memory_space<vmem>>, %arg3: memref<32x96xbf16, #tpu.memory_space<vmem>>, %arg4: memref<1x32xf32, #tpu.memory_space<vmem>>, %arg5: memref<32x11xbf16, #tpu.memory_space<vmem>>, %arg6: memref<1x11xf32, #tpu.memory_space<vmem>>, %arg7: memref<16x1xi32, #tpu.memory_space<vmem>>, %arg8: memref<16x1xf32, #tpu.memory_space<vmem>>, %arg9: memref<2x32xf32, #tpu.memory_space<vmem>>, %arg10: memref<16x32xbf16, #tpu.memory_space<vmem>>) attributes {dimension_semantics = [#tpu.dimension_semantics<arbitrary>], iteration_bounds = array<i64: 1>, scalar_prefetch = 0 : i64, scratch_operands = 2 : i64, tpu.core_type = #tpu.core_type<tc>, window_params = [{pipeline_mode = #tpu.pipeline_mode<synchronous>, transform_indices = @transform_0, window_bounds = array<i64: 8, 2, 96>}, {pipeline_mode = #tpu.pipeline_mode<synchronous>, transform_indices = @transform_1, window_bounds = array<i64: 2, 32>}, {pipeline_mode = #tpu.pipeline_mode<synchronous>, transform_indices = @transform_2, window_bounds = array<i64: 32, 96>}, {pipeline_mode = #tpu.pipeline_mode<synchronous>, transform_indices = @transform_3, window_bounds = array<i64: 1, 32>}, {pipeline_mode = #tpu.pipeline_mode<synchronous>, transform_indices = @transform_4, window_bounds = array<i64: 32, 11>}, {pipeline_mode = #tpu.pipeline_mode<synchronous>, transform_indices = @transform_5, window_bounds = array<i64: 1, 11>}, {pipeline_mode = #tpu.pipeline_mode<synchronous>, transform_indices = @transform_6, window_bounds = array<i64: 16, 1>}, {pipeline_mode = #tpu.pipeline_mode<synchronous>, transform_indices = @transform_7, window_bounds = array<i64: 16, 1>}]} {
    %c0 = arith.constant 0 : index
    %c0_0 = arith.constant 0 : index
    %0 = vector.load %arg2[%c0, %c0_0] : memref<2x32xf32, #tpu.memory_space<vmem>>, vector<2x32xf32>
    %c0_1 = arith.constant 0 : index
    %c0_2 = arith.constant 0 : index
    %1 = vector.load %arg9[%c0_1, %c0_2] : memref<2x32xf32, #tpu.memory_space<vmem>>, vector<2x32xf32>
    tpu.vector_store %arg9[%c0_1, %c0_2], %0 {strides = array<i32>} : memref<2x32xf32, #tpu.memory_space<vmem>>, vector<2x32xf32>,
    %c0_3 = arith.constant 0 : index
    %c0_4 = arith.constant 0 : index
    %2 = vector.load %arg3[%c0_3, %c0_4] : memref<32x96xbf16, #tpu.memory_space<vmem>>, vector<32x96xbf16>
    %c0_5 = arith.constant 0 : index
    %c0_6 = arith.constant 0 : index
    %3 = vector.load %arg4[%c0_5, %c0_6] : memref<1x32xf32, #tpu.memory_space<vmem>>, vector<1x32xf32>
    %4 = vector.shape_cast %3 : vector<1x32xf32> to vector<1x32xf32>
    %5 = vector.broadcast %4 : vector<1x32xf32> to vector<2x32xf32>
    %c0_i32 = arith.constant 0 : i32
    %c0_7 = arith.constant 0 : index
    %c0_8 = arith.constant 0 : index
    %6 = vector.load %arg9[%c0_7, %c0_8] : memref<2x32xf32, #tpu.memory_space<vmem>>, vector<2x32xf32>
    %7 = arith.truncf %6 : vector<2x32xf32> to vector<2x32xbf16>
    %cst = arith.constant dense<0.000000e+00> : vector<2x96xf32>
    %8 = tpu.matmul %7, %2, %cst {dimension_numbers = #tpu.dot_dimension_numbers<[1], [0], [0], [1], [0, 0, 1, 1], [], []>} : vector<2x32xbf16>, vector<32x96xbf16>, vector<2x96xf32> -> vector<2x96xf32>
    %9 = arith.index_cast %c0_i32 : i32 to index
    %c0_9 = arith.constant 0 : index
    %c0_10 = arith.constant 0 : index
    %10 = vector.load %arg1[%9, %c0_9, %c0_10] : memref<8x2x96xf32, #tpu.memory_space<vmem>>, vector<1x2x96xf32>
    %11 = vector.shape_cast %10 : vector<1x2x96xf32> to vector<2x96xf32>
    %12 = vector.extract_strided_slice %11 {offsets = [0, 0], sizes = [2, 32], strides = [1, 1]} : vector<2x96xf32> to vector<2x32xf32>
    %13 = vector.extract_strided_slice %8 {offsets = [0, 0], sizes = [2, 32], strides = [1, 1]} : vector<2x96xf32> to vector<2x32xf32>
    %14 = arith.addf %12, %13 : vector<2x32xf32>
    %15 = arith.negf %14 : vector<2x32xf32>
    %16 = math.exp %15 : vector<2x32xf32>
    %cst_11 = arith.constant 1.000000e+00 : f32
    %17 = vector.broadcast %cst_11 : f32 to vector<2x32xf32>
    %18 = arith.addf %17, %16 : vector<2x32xf32>
    %19 = arith.divf %17, %18 : vector<2x32xf32>
    %20 = vector.extract_strided_slice %11 {offsets = [0, 32], sizes = [2, 32], strides = [1, 1]} : vector<2x96xf32> to vector<2x32xf32>
    %21 = vector.extract_strided_slice %8 {offsets = [0, 32], sizes = [2, 32], strides = [1, 1]} : vector<2x96xf32> to vector<2x32xf32>
    %22 = arith.addf %20, %21 : vector<2x32xf32>
    %23 = arith.negf %22 : vector<2x32xf32>
    %24 = math.exp %23 : vector<2x32xf32>
    %cst_12 = arith.constant 1.000000e+00 : f32
    %25 = vector.broadcast %cst_12 : f32 to vector<2x32xf32>
    %26 = arith.addf %25, %24 : vector<2x32xf32>
    %27 = arith.divf %25, %26 : vector<2x32xf32>
    %28 = vector.extract_strided_slice %11 {offsets = [0, 64], sizes = [2, 32], strides = [1, 1]} : vector<2x96xf32> to vector<2x32xf32>
    %29 = vector.extract_strided_slice %8 {offsets = [0, 64], sizes = [2, 32], strides = [1, 1]} : vector<2x96xf32> to vector<2x32xf32>
    %30 = arith.addf %29, %5 : vector<2x32xf32>
    %31 = arith.mulf %19, %30 : vector<2x32xf32>
    %32 = arith.addf %28, %31 : vector<2x32xf32>
    %33 = math.tanh %32 : vector<2x32xf32>
    %cst_13 = arith.constant 1.000000e+00 : f32
    %34 = vector.broadcast %cst_13 : f32 to vector<2x32xf32>
    %35 = arith.subf %34, %27 : vector<2x32xf32>
    %36 = arith.mulf %35, %33 : vector<2x32xf32>
    %37 = arith.mulf %27, %6 : vector<2x32xf32>
    %38 = arith.addf %36, %37 : vector<2x32xf32>
    %c0_14 = arith.constant 0 : index
    %c0_15 = arith.constant 0 : index
    %39 = vector.load %arg9[%c0_14, %c0_15] : memref<2x32xf32, #tpu.memory_space<vmem>>, vector<2x32xf32>
    tpu.vector_store %arg9[%c0_14, %c0_15], %38 {strides = array<i32>} : memref<2x32xf32, #tpu.memory_space<vmem>>, vector<2x32xf32>,
    %40 = arith.truncf %38 : vector<2x32xf32> to vector<2x32xbf16>
    %c2_i32 = arith.constant 2 : i32
    %41 = arith.muli %c0_i32, %c2_i32 : i32
    %42 = arith.index_cast %41 : i32 to index
    %c0_16 = arith.constant 0 : index
    %43 = vector.load %arg10[%42, %c0_16] : memref<16x32xbf16, #tpu.memory_space<vmem>>, vector<2x32xbf16>
    tpu.vector_store %arg10[%42, %c0_16], %40 {strides = array<i32>} : memref<16x32xbf16, #tpu.memory_space<vmem>>, vector<2x32xbf16>,
    %c1_i32 = arith.constant 1 : i32
    %c0_17 = arith.constant 0 : index
    %c0_18 = arith.constant 0 : index
    %44 = vector.load %arg9[%c0_17, %c0_18] : memref<2x32xf32, #tpu.memory_space<vmem>>, vector<2x32xf32>
    %45 = arith.truncf %44 : vector<2x32xf32> to vector<2x32xbf16>
    %cst_19 = arith.constant dense<0.000000e+00> : vector<2x96xf32>
    %46 = tpu.matmul %45, %2, %cst_19 {dimension_numbers = #tpu.dot_dimension_numbers<[1], [0], [0], [1], [0, 0, 1, 1], [], []>} : vector<2x32xbf16>, vector<32x96xbf16>, vector<2x96xf32> -> vector<2x96xf32>
    %47 = arith.index_cast %c1_i32 : i32 to index
    %c0_20 = arith.constant 0 : index
    %c0_21 = arith.constant 0 : index
    %48 = vector.load %arg1[%47, %c0_20, %c0_21] : memref<8x2x96xf32, #tpu.memory_space<vmem>>, vector<1x2x96xf32>
    %49 = vector.shape_cast %48 : vector<1x2x96xf32> to vector<2x96xf32>
    %50 = vector.extract_strided_slice %49 {offsets = [0, 0], sizes = [2, 32], strides = [1, 1]} : vector<2x96xf32> to vector<2x32xf32>
    %51 = vector.extract_strided_slice %46 {offsets = [0, 0], sizes = [2, 32], strides = [1, 1]} : vector<2x96xf32> to vector<2x32xf32>
    %52 = arith.addf %50, %51 : vector<2x32xf32>
    %53 = arith.negf %52 : vector<2x32xf32>
    %54 = math.exp %53 : vector<2x32xf32>
    %cst_22 = arith.constant 1.000000e+00 : f32
    %55 = vector.broadcast %cst_22 : f32 to vector<2x32xf32>
    %56 = arith.addf %55, %54 : vector<2x32xf32>
    %57 = arith.divf %55, %56 : vector<2x32xf32>
    %58 = vector.extract_strided_slice %49 {offsets = [0, 32], sizes = [2, 32], strides = [1, 1]} : vector<2x96xf32> to vector<2x32xf32>
    %59 = vector.extract_strided_slice %46 {offsets = [0, 32], sizes = [2, 32], strides = [1, 1]} : vector<2x96xf32> to vector<2x32xf32>
    %60 = arith.addf %58, %59 : vector<2x32xf32>
    %61 = arith.negf %60 : vector<2x32xf32>
    %62 = math.exp %61 : vector<2x32xf32>
    %cst_23 = arith.constant 1.000000e+00 : f32
    %63 = vector.broadcast %cst_23 : f32 to vector<2x32xf32>
    %64 = arith.addf %63, %62 : vector<2x32xf32>
    %65 = arith.divf %63, %64 : vector<2x32xf32>
    %66 = vector.extract_strided_slice %49 {offsets = [0, 64], sizes = [2, 32], strides = [1, 1]} : vector<2x96xf32> to vector<2x32xf32>
    %67 = vector.extract_strided_slice %46 {offsets = [0, 64], sizes = [2, 32], strides = [1, 1]} : vector<2x96xf32> to vector<2x32xf32>
    %68 = arith.addf %67, %5 : vector<2x32xf32>
    %69 = arith.mulf %57, %68 : vector<2x32xf32>
    %70 = arith.addf %66, %69 : vector<2x32xf32>
    %71 = math.tanh %70 : vector<2x32xf32>
    %cst_24 = arith.constant 1.000000e+00 : f32
    %72 = vector.broadcast %cst_24 : f32 to vector<2x32xf32>
    %73 = arith.subf %72, %65 : vector<2x32xf32>
    %74 = arith.mulf %73, %71 : vector<2x32xf32>
    %75 = arith.mulf %65, %44 : vector<2x32xf32>
    %76 = arith.addf %74, %75 : vector<2x32xf32>
    %c0_25 = arith.constant 0 : index
    %c0_26 = arith.constant 0 : index
    %77 = vector.load %arg9[%c0_25, %c0_26] : memref<2x32xf32, #tpu.memory_space<vmem>>, vector<2x32xf32>
    tpu.vector_store %arg9[%c0_25, %c0_26], %76 {strides = array<i32>} : memref<2x32xf32, #tpu.memory_space<vmem>>, vector<2x32xf32>,
    %78 = arith.truncf %76 : vector<2x32xf32> to vector<2x32xbf16>
    %c2_i32_27 = arith.constant 2 : i32
    %79 = arith.muli %c1_i32, %c2_i32_27 : i32
    %80 = arith.index_cast %79 : i32 to index
    %c0_28 = arith.constant 0 : index
    %81 = vector.load %arg10[%80, %c0_28] : memref<16x32xbf16, #tpu.memory_space<vmem>>, vector<2x32xbf16>
    tpu.vector_store %arg10[%80, %c0_28], %78 {strides = array<i32>} : memref<16x32xbf16, #tpu.memory_space<vmem>>, vector<2x32xbf16>,
    %c2_i32_29 = arith.constant 2 : i32
    %c0_30 = arith.constant 0 : index
    %c0_31 = arith.constant 0 : index
    %82 = vector.load %arg9[%c0_30, %c0_31] : memref<2x32xf32, #tpu.memory_space<vmem>>, vector<2x32xf32>
    %83 = arith.truncf %82 : vector<2x32xf32> to vector<2x32xbf16>
    %cst_32 = arith.constant dense<0.000000e+00> : vector<2x96xf32>
    %84 = tpu.matmul %83, %2, %cst_32 {dimension_numbers = #tpu.dot_dimension_numbers<[1], [0], [0], [1], [0, 0, 1, 1], [], []>} : vector<2x32xbf16>, vector<32x96xbf16>, vector<2x96xf32> -> vector<2x96xf32>
    %85 = arith.index_cast %c2_i32_29 : i32 to index
    %c0_33 = arith.constant 0 : index
    %c0_34 = arith.constant 0 : index
    %86 = vector.load %arg1[%85, %c0_33, %c0_34] : memref<8x2x96xf32, #tpu.memory_space<vmem>>, vector<1x2x96xf32>
    %87 = vector.shape_cast %86 : vector<1x2x96xf32> to vector<2x96xf32>
    %88 = vector.extract_strided_slice %87 {offsets = [0, 0], sizes = [2, 32], strides = [1, 1]} : vector<2x96xf32> to vector<2x32xf32>
    %89 = vector.extract_strided_slice %84 {offsets = [0, 0], sizes = [2, 32], strides = [1, 1]} : vector<2x96xf32> to vector<2x32xf32>
    %90 = arith.addf %88, %89 : vector<2x32xf32>
    %91 = arith.negf %90 : vector<2x32xf32>
    %92 = math.exp %91 : vector<2x32xf32>
    %cst_35 = arith.constant 1.000000e+00 : f32
    %93 = vector.broadcast %cst_35 : f32 to vector<2x32xf32>
    %94 = arith.addf %93, %92 : vector<2x32xf32>
    %95 = arith.divf %93, %94 : vector<2x32xf32>
    %96 = vector.extract_strided_slice %87 {offsets = [0, 32], sizes = [2, 32], strides = [1, 1]} : vector<2x96xf32> to vector<2x32xf32>
    %97 = vector.extract_strided_slice %84 {offsets = [0, 32], sizes = [2, 32], strides = [1, 1]} : vector<2x96xf32> to vector<2x32xf32>
    %98 = arith.addf %96, %97 : vector<2x32xf32>
    %99 = arith.negf %98 : vector<2x32xf32>
    %100 = math.exp %99 : vector<2x32xf32>
    %cst_36 = arith.constant 1.000000e+00 : f32
    %101 = vector.broadcast %cst_36 : f32 to vector<2x32xf32>
    %102 = arith.addf %101, %100 : vector<2x32xf32>
    %103 = arith.divf %101, %102 : vector<2x32xf32>
    %104 = vector.extract_strided_slice %87 {offsets = [0, 64], sizes = [2, 32], strides = [1, 1]} : vector<2x96xf32> to vector<2x32xf32>
    %105 = vector.extract_strided_slice %84 {offsets = [0, 64], sizes = [2, 32], strides = [1, 1]} : vector<2x96xf32> to vector<2x32xf32>
    %106 = arith.addf %105, %5 : vector<2x32xf32>
    %107 = arith.mulf %95, %106 : vector<2x32xf32>
    %108 = arith.addf %104, %107 : vector<2x32xf32>
    %109 = math.tanh %108 : vector<2x32xf32>
    %cst_37 = arith.constant 1.000000e+00 : f32
    %110 = vector.broadcast %cst_37 : f32 to vector<2x32xf32>
    %111 = arith.subf %110, %103 : vector<2x32xf32>
    %112 = arith.mulf %111, %109 : vector<2x32xf32>
    %113 = arith.mulf %103, %82 : vector<2x32xf32>
    %114 = arith.addf %112, %113 : vector<2x32xf32>
    %c0_38 = arith.constant 0 : index
    %c0_39 = arith.constant 0 : index
    %115 = vector.load %arg9[%c0_38, %c0_39] : memref<2x32xf32, #tpu.memory_space<vmem>>, vector<2x32xf32>
    tpu.vector_store %arg9[%c0_38, %c0_39], %114 {strides = array<i32>} : memref<2x32xf32, #tpu.memory_space<vmem>>, vector<2x32xf32>,
    %116 = arith.truncf %114 : vector<2x32xf32> to vector<2x32xbf16>
    %c2_i32_40 = arith.constant 2 : i32
    %117 = arith.muli %c2_i32_29, %c2_i32_40 : i32
    %118 = arith.index_cast %117 : i32 to index
    %c0_41 = arith.constant 0 : index
    %119 = vector.load %arg10[%118, %c0_41] : memref<16x32xbf16, #tpu.memory_space<vmem>>, vector<2x32xbf16>
    tpu.vector_store %arg10[%118, %c0_41], %116 {strides = array<i32>} : memref<16x32xbf16, #tpu.memory_space<vmem>>, vector<2x32xbf16>,
    %c3_i32 = arith.constant 3 : i32
    %c0_42 = arith.constant 0 : index
    %c0_43 = arith.constant 0 : index
    %120 = vector.load %arg9[%c0_42, %c0_43] : memref<2x32xf32, #tpu.memory_space<vmem>>, vector<2x32xf32>
    %121 = arith.truncf %120 : vector<2x32xf32> to vector<2x32xbf16>
    %cst_44 = arith.constant dense<0.000000e+00> : vector<2x96xf32>
    %122 = tpu.matmul %121, %2, %cst_44 {dimension_numbers = #tpu.dot_dimension_numbers<[1], [0], [0], [1], [0, 0, 1, 1], [], []>} : vector<2x32xbf16>, vector<32x96xbf16>, vector<2x96xf32> -> vector<2x96xf32>
    %123 = arith.index_cast %c3_i32 : i32 to index
    %c0_45 = arith.constant 0 : index
    %c0_46 = arith.constant 0 : index
    %124 = vector.load %arg1[%123, %c0_45, %c0_46] : memref<8x2x96xf32, #tpu.memory_space<vmem>>, vector<1x2x96xf32>
    %125 = vector.shape_cast %124 : vector<1x2x96xf32> to vector<2x96xf32>
    %126 = vector.extract_strided_slice %125 {offsets = [0, 0], sizes = [2, 32], strides = [1, 1]} : vector<2x96xf32> to vector<2x32xf32>
    %127 = vector.extract_strided_slice %122 {offsets = [0, 0], sizes = [2, 32], strides = [1, 1]} : vector<2x96xf32> to vector<2x32xf32>
    %128 = arith.addf %126, %127 : vector<2x32xf32>
    %129 = arith.negf %128 : vector<2x32xf32>
    %130 = math.exp %129 : vector<2x32xf32>
    %cst_47 = arith.constant 1.000000e+00 : f32
    %131 = vector.broadcast %cst_47 : f32 to vector<2x32xf32>
    %132 = arith.addf %131, %130 : vector<2x32xf32>
    %133 = arith.divf %131, %132 : vector<2x32xf32>
    %134 = vector.extract_strided_slice %125 {offsets = [0, 32], sizes = [2, 32], strides = [1, 1]} : vector<2x96xf32> to vector<2x32xf32>
    %135 = vector.extract_strided_slice %122 {offsets = [0, 32], sizes = [2, 32], strides = [1, 1]} : vector<2x96xf32> to vector<2x32xf32>
    %136 = arith.addf %134, %135 : vector<2x32xf32>
    %137 = arith.negf %136 : vector<2x32xf32>
    %138 = math.exp %137 : vector<2x32xf32>
    %cst_48 = arith.constant 1.000000e+00 : f32
    %139 = vector.broadcast %cst_48 : f32 to vector<2x32xf32>
    %140 = arith.addf %139, %138 : vector<2x32xf32>
    %141 = arith.divf %139, %140 : vector<2x32xf32>
    %142 = vector.extract_strided_slice %125 {offsets = [0, 64], sizes = [2, 32], strides = [1, 1]} : vector<2x96xf32> to vector<2x32xf32>
    %143 = vector.extract_strided_slice %122 {offsets = [0, 64], sizes = [2, 32], strides = [1, 1]} : vector<2x96xf32> to vector<2x32xf32>
    %144 = arith.addf %143, %5 : vector<2x32xf32>
    %145 = arith.mulf %133, %144 : vector<2x32xf32>
    %146 = arith.addf %142, %145 : vector<2x32xf32>
    %147 = math.tanh %146 : vector<2x32xf32>
    %cst_49 = arith.constant 1.000000e+00 : f32
    %148 = vector.broadcast %cst_49 : f32 to vector<2x32xf32>
    %149 = arith.subf %148, %141 : vector<2x32xf32>
    %150 = arith.mulf %149, %147 : vector<2x32xf32>
    %151 = arith.mulf %141, %120 : vector<2x32xf32>
    %152 = arith.addf %150, %151 : vector<2x32xf32>
    %c0_50 = arith.constant 0 : index
    %c0_51 = arith.constant 0 : index
    %153 = vector.load %arg9[%c0_50, %c0_51] : memref<2x32xf32, #tpu.memory_space<vmem>>, vector<2x32xf32>
    tpu.vector_store %arg9[%c0_50, %c0_51], %152 {strides = array<i32>} : memref<2x32xf32, #tpu.memory_space<vmem>>, vector<2x32xf32>,
    %154 = arith.truncf %152 : vector<2x32xf32> to vector<2x32xbf16>
    %c2_i32_52 = arith.constant 2 : i32
    %155 = arith.muli %c3_i32, %c2_i32_52 : i32
    %156 = arith.index_cast %155 : i32 to index
    %c0_53 = arith.constant 0 : index
    %157 = vector.load %arg10[%156, %c0_53] : memref<16x32xbf16, #tpu.memory_space<vmem>>, vector<2x32xbf16>
    tpu.vector_store %arg10[%156, %c0_53], %154 {strides = array<i32>} : memref<16x32xbf16, #tpu.memory_space<vmem>>, vector<2x32xbf16>,
    %c4_i32 = arith.constant 4 : i32
    %c0_54 = arith.constant 0 : index
    %c0_55 = arith.constant 0 : index
    %158 = vector.load %arg9[%c0_54, %c0_55] : memref<2x32xf32, #tpu.memory_space<vmem>>, vector<2x32xf32>
    %159 = arith.truncf %158 : vector<2x32xf32> to vector<2x32xbf16>
    %cst_56 = arith.constant dense<0.000000e+00> : vector<2x96xf32>
    %160 = tpu.matmul %159, %2, %cst_56 {dimension_numbers = #tpu.dot_dimension_numbers<[1], [0], [0], [1], [0, 0, 1, 1], [], []>} : vector<2x32xbf16>, vector<32x96xbf16>, vector<2x96xf32> -> vector<2x96xf32>
    %161 = arith.index_cast %c4_i32 : i32 to index
    %c0_57 = arith.constant 0 : index
    %c0_58 = arith.constant 0 : index
    %162 = vector.load %arg1[%161, %c0_57, %c0_58] : memref<8x2x96xf32, #tpu.memory_space<vmem>>, vector<1x2x96xf32>
    %163 = vector.shape_cast %162 : vector<1x2x96xf32> to vector<2x96xf32>
    %164 = vector.extract_strided_slice %163 {offsets = [0, 0], sizes = [2, 32], strides = [1, 1]} : vector<2x96xf32> to vector<2x32xf32>
    %165 = vector.extract_strided_slice %160 {offsets = [0, 0], sizes = [2, 32], strides = [1, 1]} : vector<2x96xf32> to vector<2x32xf32>
    %166 = arith.addf %164, %165 : vector<2x32xf32>
    %167 = arith.negf %166 : vector<2x32xf32>
    %168 = math.exp %167 : vector<2x32xf32>
    %cst_59 = arith.constant 1.000000e+00 : f32
    %169 = vector.broadcast %cst_59 : f32 to vector<2x32xf32>
    %170 = arith.addf %169, %168 : vector<2x32xf32>
    %171 = arith.divf %169, %170 : vector<2x32xf32>
    %172 = vector.extract_strided_slice %163 {offsets = [0, 32], sizes = [2, 32], strides = [1, 1]} : vector<2x96xf32> to vector<2x32xf32>
    %173 = vector.extract_strided_slice %160 {offsets = [0, 32], sizes = [2, 32], strides = [1, 1]} : vector<2x96xf32> to vector<2x32xf32>
    %174 = arith.addf %172, %173 : vector<2x32xf32>
    %175 = arith.negf %174 : vector<2x32xf32>
    %176 = math.exp %175 : vector<2x32xf32>
    %cst_60 = arith.constant 1.000000e+00 : f32
    %177 = vector.broadcast %cst_60 : f32 to vector<2x32xf32>
    %178 = arith.addf %177, %176 : vector<2x32xf32>
    %179 = arith.divf %177, %178 : vector<2x32xf32>
    %180 = vector.extract_strided_slice %163 {offsets = [0, 64], sizes = [2, 32], strides = [1, 1]} : vector<2x96xf32> to vector<2x32xf32>
    %181 = vector.extract_strided_slice %160 {offsets = [0, 64], sizes = [2, 32], strides = [1, 1]} : vector<2x96xf32> to vector<2x32xf32>
    %182 = arith.addf %181, %5 : vector<2x32xf32>
    %183 = arith.mulf %171, %182 : vector<2x32xf32>
    %184 = arith.addf %180, %183 : vector<2x32xf32>
    %185 = math.tanh %184 : vector<2x32xf32>
    %cst_61 = arith.constant 1.000000e+00 : f32
    %186 = vector.broadcast %cst_61 : f32 to vector<2x32xf32>
    %187 = arith.subf %186, %179 : vector<2x32xf32>
    %188 = arith.mulf %187, %185 : vector<2x32xf32>
    %189 = arith.mulf %179, %158 : vector<2x32xf32>
    %190 = arith.addf %188, %189 : vector<2x32xf32>
    %c0_62 = arith.constant 0 : index
    %c0_63 = arith.constant 0 : index
    %191 = vector.load %arg9[%c0_62, %c0_63] : memref<2x32xf32, #tpu.memory_space<vmem>>, vector<2x32xf32>
    tpu.vector_store %arg9[%c0_62, %c0_63], %190 {strides = array<i32>} : memref<2x32xf32, #tpu.memory_space<vmem>>, vector<2x32xf32>,
    %192 = arith.truncf %190 : vector<2x32xf32> to vector<2x32xbf16>
    %c2_i32_64 = arith.constant 2 : i32
    %193 = arith.muli %c4_i32, %c2_i32_64 : i32
    %194 = arith.index_cast %193 : i32 to index
    %c0_65 = arith.constant 0 : index
    %195 = vector.load %arg10[%194, %c0_65] : memref<16x32xbf16, #tpu.memory_space<vmem>>, vector<2x32xbf16>
    tpu.vector_store %arg10[%194, %c0_65], %192 {strides = array<i32>} : memref<16x32xbf16, #tpu.memory_space<vmem>>, vector<2x32xbf16>,
    %c5_i32 = arith.constant 5 : i32
    %c0_66 = arith.constant 0 : index
    %c0_67 = arith.constant 0 : index
    %196 = vector.load %arg9[%c0_66, %c0_67] : memref<2x32xf32, #tpu.memory_space<vmem>>, vector<2x32xf32>
    %197 = arith.truncf %196 : vector<2x32xf32> to vector<2x32xbf16>
    %cst_68 = arith.constant dense<0.000000e+00> : vector<2x96xf32>
    %198 = tpu.matmul %197, %2, %cst_68 {dimension_numbers = #tpu.dot_dimension_numbers<[1], [0], [0], [1], [0, 0, 1, 1], [], []>} : vector<2x32xbf16>, vector<32x96xbf16>, vector<2x96xf32> -> vector<2x96xf32>
    %199 = arith.index_cast %c5_i32 : i32 to index
    %c0_69 = arith.constant 0 : index
    %c0_70 = arith.constant 0 : index
    %200 = vector.load %arg1[%199, %c0_69, %c0_70] : memref<8x2x96xf32, #tpu.memory_space<vmem>>, vector<1x2x96xf32>
    %201 = vector.shape_cast %200 : vector<1x2x96xf32> to vector<2x96xf32>
    %202 = vector.extract_strided_slice %201 {offsets = [0, 0], sizes = [2, 32], strides = [1, 1]} : vector<2x96xf32> to vector<2x32xf32>
    %203 = vector.extract_strided_slice %198 {offsets = [0, 0], sizes = [2, 32], strides = [1, 1]} : vector<2x96xf32> to vector<2x32xf32>
    %204 = arith.addf %202, %203 : vector<2x32xf32>
    %205 = arith.negf %204 : vector<2x32xf32>
    %206 = math.exp %205 : vector<2x32xf32>
    %cst_71 = arith.constant 1.000000e+00 : f32
    %207 = vector.broadcast %cst_71 : f32 to vector<2x32xf32>
    %208 = arith.addf %207, %206 : vector<2x32xf32>
    %209 = arith.divf %207, %208 : vector<2x32xf32>
    %210 = vector.extract_strided_slice %201 {offsets = [0, 32], sizes = [2, 32], strides = [1, 1]} : vector<2x96xf32> to vector<2x32xf32>
    %211 = vector.extract_strided_slice %198 {offsets = [0, 32], sizes = [2, 32], strides = [1, 1]} : vector<2x96xf32> to vector<2x32xf32>
    %212 = arith.addf %210, %211 : vector<2x32xf32>
    %213 = arith.negf %212 : vector<2x32xf32>
    %214 = math.exp %213 : vector<2x32xf32>
    %cst_72 = arith.constant 1.000000e+00 : f32
    %215 = vector.broadcast %cst_72 : f32 to vector<2x32xf32>
    %216 = arith.addf %215, %214 : vector<2x32xf32>
    %217 = arith.divf %215, %216 : vector<2x32xf32>
    %218 = vector.extract_strided_slice %201 {offsets = [0, 64], sizes = [2, 32], strides = [1, 1]} : vector<2x96xf32> to vector<2x32xf32>
    %219 = vector.extract_strided_slice %198 {offsets = [0, 64], sizes = [2, 32], strides = [1, 1]} : vector<2x96xf32> to vector<2x32xf32>
    %220 = arith.addf %219, %5 : vector<2x32xf32>
    %221 = arith.mulf %209, %220 : vector<2x32xf32>
    %222 = arith.addf %218, %221 : vector<2x32xf32>
    %223 = math.tanh %222 : vector<2x32xf32>
    %cst_73 = arith.constant 1.000000e+00 : f32
    %224 = vector.broadcast %cst_73 : f32 to vector<2x32xf32>
    %225 = arith.subf %224, %217 : vector<2x32xf32>
    %226 = arith.mulf %225, %223 : vector<2x32xf32>
    %227 = arith.mulf %217, %196 : vector<2x32xf32>
    %228 = arith.addf %226, %227 : vector<2x32xf32>
    %c0_74 = arith.constant 0 : index
    %c0_75 = arith.constant 0 : index
    %229 = vector.load %arg9[%c0_74, %c0_75] : memref<2x32xf32, #tpu.memory_space<vmem>>, vector<2x32xf32>
    tpu.vector_store %arg9[%c0_74, %c0_75], %228 {strides = array<i32>} : memref<2x32xf32, #tpu.memory_space<vmem>>, vector<2x32xf32>,
    %230 = arith.truncf %228 : vector<2x32xf32> to vector<2x32xbf16>
    %c2_i32_76 = arith.constant 2 : i32
    %231 = arith.muli %c5_i32, %c2_i32_76 : i32
    %232 = arith.index_cast %231 : i32 to index
    %c0_77 = arith.constant 0 : index
    %233 = vector.load %arg10[%232, %c0_77] : memref<16x32xbf16, #tpu.memory_space<vmem>>, vector<2x32xbf16>
    tpu.vector_store %arg10[%232, %c0_77], %230 {strides = array<i32>} : memref<16x32xbf16, #tpu.memory_space<vmem>>, vector<2x32xbf16>,
    %c6_i32 = arith.constant 6 : i32
    %c0_78 = arith.constant 0 : index
    %c0_79 = arith.constant 0 : index
    %234 = vector.load %arg9[%c0_78, %c0_79] : memref<2x32xf32, #tpu.memory_space<vmem>>, vector<2x32xf32>
    %235 = arith.truncf %234 : vector<2x32xf32> to vector<2x32xbf16>
    %cst_80 = arith.constant dense<0.000000e+00> : vector<2x96xf32>
    %236 = tpu.matmul %235, %2, %cst_80 {dimension_numbers = #tpu.dot_dimension_numbers<[1], [0], [0], [1], [0, 0, 1, 1], [], []>} : vector<2x32xbf16>, vector<32x96xbf16>, vector<2x96xf32> -> vector<2x96xf32>
    %237 = arith.index_cast %c6_i32 : i32 to index
    %c0_81 = arith.constant 0 : index
    %c0_82 = arith.constant 0 : index
    %238 = vector.load %arg1[%237, %c0_81, %c0_82] : memref<8x2x96xf32, #tpu.memory_space<vmem>>, vector<1x2x96xf32>
    %239 = vector.shape_cast %238 : vector<1x2x96xf32> to vector<2x96xf32>
    %240 = vector.extract_strided_slice %239 {offsets = [0, 0], sizes = [2, 32], strides = [1, 1]} : vector<2x96xf32> to vector<2x32xf32>
    %241 = vector.extract_strided_slice %236 {offsets = [0, 0], sizes = [2, 32], strides = [1, 1]} : vector<2x96xf32> to vector<2x32xf32>
    %242 = arith.addf %240, %241 : vector<2x32xf32>
    %243 = arith.negf %242 : vector<2x32xf32>
    %244 = math.exp %243 : vector<2x32xf32>
    %cst_83 = arith.constant 1.000000e+00 : f32
    %245 = vector.broadcast %cst_83 : f32 to vector<2x32xf32>
    %246 = arith.addf %245, %244 : vector<2x32xf32>
    %247 = arith.divf %245, %246 : vector<2x32xf32>
    %248 = vector.extract_strided_slice %239 {offsets = [0, 32], sizes = [2, 32], strides = [1, 1]} : vector<2x96xf32> to vector<2x32xf32>
    %249 = vector.extract_strided_slice %236 {offsets = [0, 32], sizes = [2, 32], strides = [1, 1]} : vector<2x96xf32> to vector<2x32xf32>
    %250 = arith.addf %248, %249 : vector<2x32xf32>
    %251 = arith.negf %250 : vector<2x32xf32>
    %252 = math.exp %251 : vector<2x32xf32>
    %cst_84 = arith.constant 1.000000e+00 : f32
    %253 = vector.broadcast %cst_84 : f32 to vector<2x32xf32>
    %254 = arith.addf %253, %252 : vector<2x32xf32>
    %255 = arith.divf %253, %254 : vector<2x32xf32>
    %256 = vector.extract_strided_slice %239 {offsets = [0, 64], sizes = [2, 32], strides = [1, 1]} : vector<2x96xf32> to vector<2x32xf32>
    %257 = vector.extract_strided_slice %236 {offsets = [0, 64], sizes = [2, 32], strides = [1, 1]} : vector<2x96xf32> to vector<2x32xf32>
    %258 = arith.addf %257, %5 : vector<2x32xf32>
    %259 = arith.mulf %247, %258 : vector<2x32xf32>
    %260 = arith.addf %256, %259 : vector<2x32xf32>
    %261 = math.tanh %260 : vector<2x32xf32>
    %cst_85 = arith.constant 1.000000e+00 : f32
    %262 = vector.broadcast %cst_85 : f32 to vector<2x32xf32>
    %263 = arith.subf %262, %255 : vector<2x32xf32>
    %264 = arith.mulf %263, %261 : vector<2x32xf32>
    %265 = arith.mulf %255, %234 : vector<2x32xf32>
    %266 = arith.addf %264, %265 : vector<2x32xf32>
    %c0_86 = arith.constant 0 : index
    %c0_87 = arith.constant 0 : index
    %267 = vector.load %arg9[%c0_86, %c0_87] : memref<2x32xf32, #tpu.memory_space<vmem>>, vector<2x32xf32>
    tpu.vector_store %arg9[%c0_86, %c0_87], %266 {strides = array<i32>} : memref<2x32xf32, #tpu.memory_space<vmem>>, vector<2x32xf32>,
    %268 = arith.truncf %266 : vector<2x32xf32> to vector<2x32xbf16>
    %c2_i32_88 = arith.constant 2 : i32
    %269 = arith.muli %c6_i32, %c2_i32_88 : i32
    %270 = arith.index_cast %269 : i32 to index
    %c0_89 = arith.constant 0 : index
    %271 = vector.load %arg10[%270, %c0_89] : memref<16x32xbf16, #tpu.memory_space<vmem>>, vector<2x32xbf16>
    tpu.vector_store %arg10[%270, %c0_89], %268 {strides = array<i32>} : memref<16x32xbf16, #tpu.memory_space<vmem>>, vector<2x32xbf16>,
    %c7_i32 = arith.constant 7 : i32
    %c0_90 = arith.constant 0 : index
    %c0_91 = arith.constant 0 : index
    %272 = vector.load %arg9[%c0_90, %c0_91] : memref<2x32xf32, #tpu.memory_space<vmem>>, vector<2x32xf32>
    %273 = arith.truncf %272 : vector<2x32xf32> to vector<2x32xbf16>
    %cst_92 = arith.constant dense<0.000000e+00> : vector<2x96xf32>
    %274 = tpu.matmul %273, %2, %cst_92 {dimension_numbers = #tpu.dot_dimension_numbers<[1], [0], [0], [1], [0, 0, 1, 1], [], []>} : vector<2x32xbf16>, vector<32x96xbf16>, vector<2x96xf32> -> vector<2x96xf32>
    %275 = arith.index_cast %c7_i32 : i32 to index
    %c0_93 = arith.constant 0 : index
    %c0_94 = arith.constant 0 : index
    %276 = vector.load %arg1[%275, %c0_93, %c0_94] : memref<8x2x96xf32, #tpu.memory_space<vmem>>, vector<1x2x96xf32>
    %277 = vector.shape_cast %276 : vector<1x2x96xf32> to vector<2x96xf32>
    %278 = vector.extract_strided_slice %277 {offsets = [0, 0], sizes = [2, 32], strides = [1, 1]} : vector<2x96xf32> to vector<2x32xf32>
    %279 = vector.extract_strided_slice %274 {offsets = [0, 0], sizes = [2, 32], strides = [1, 1]} : vector<2x96xf32> to vector<2x32xf32>
    %280 = arith.addf %278, %279 : vector<2x32xf32>
    %281 = arith.negf %280 : vector<2x32xf32>
    %282 = math.exp %281 : vector<2x32xf32>
    %cst_95 = arith.constant 1.000000e+00 : f32
    %283 = vector.broadcast %cst_95 : f32 to vector<2x32xf32>
    %284 = arith.addf %283, %282 : vector<2x32xf32>
    %285 = arith.divf %283, %284 : vector<2x32xf32>
    %286 = vector.extract_strided_slice %277 {offsets = [0, 32], sizes = [2, 32], strides = [1, 1]} : vector<2x96xf32> to vector<2x32xf32>
    %287 = vector.extract_strided_slice %274 {offsets = [0, 32], sizes = [2, 32], strides = [1, 1]} : vector<2x96xf32> to vector<2x32xf32>
    %288 = arith.addf %286, %287 : vector<2x32xf32>
    %289 = arith.negf %288 : vector<2x32xf32>
    %290 = math.exp %289 : vector<2x32xf32>
    %cst_96 = arith.constant 1.000000e+00 : f32
    %291 = vector.broadcast %cst_96 : f32 to vector<2x32xf32>
    %292 = arith.addf %291, %290 : vector<2x32xf32>
    %293 = arith.divf %291, %292 : vector<2x32xf32>
    %294 = vector.extract_strided_slice %277 {offsets = [0, 64], sizes = [2, 32], strides = [1, 1]} : vector<2x96xf32> to vector<2x32xf32>
    %295 = vector.extract_strided_slice %274 {offsets = [0, 64], sizes = [2, 32], strides = [1, 1]} : vector<2x96xf32> to vector<2x32xf32>
    %296 = arith.addf %295, %5 : vector<2x32xf32>
    %297 = arith.mulf %285, %296 : vector<2x32xf32>
    %298 = arith.addf %294, %297 : vector<2x32xf32>
    %299 = math.tanh %298 : vector<2x32xf32>
    %cst_97 = arith.constant 1.000000e+00 : f32
    %300 = vector.broadcast %cst_97 : f32 to vector<2x32xf32>
    %301 = arith.subf %300, %293 : vector<2x32xf32>
    %302 = arith.mulf %301, %299 : vector<2x32xf32>
    %303 = arith.mulf %293, %272 : vector<2x32xf32>
    %304 = arith.addf %302, %303 : vector<2x32xf32>
    %c0_98 = arith.constant 0 : index
    %c0_99 = arith.constant 0 : index
    %305 = vector.load %arg9[%c0_98, %c0_99] : memref<2x32xf32, #tpu.memory_space<vmem>>, vector<2x32xf32>
    tpu.vector_store %arg9[%c0_98, %c0_99], %304 {strides = array<i32>} : memref<2x32xf32, #tpu.memory_space<vmem>>, vector<2x32xf32>,
    %306 = arith.truncf %304 : vector<2x32xf32> to vector<2x32xbf16>
    %c2_i32_100 = arith.constant 2 : i32
    %307 = arith.muli %c7_i32, %c2_i32_100 : i32
    %308 = arith.index_cast %307 : i32 to index
    %c0_101 = arith.constant 0 : index
    %309 = vector.load %arg10[%308, %c0_101] : memref<16x32xbf16, #tpu.memory_space<vmem>>, vector<2x32xbf16>
    tpu.vector_store %arg10[%308, %c0_101], %306 {strides = array<i32>} : memref<16x32xbf16, #tpu.memory_space<vmem>>, vector<2x32xbf16>,
    %c8_i32 = arith.constant 8 : i32
    %c0_102 = arith.constant 0 : index
    %c0_103 = arith.constant 0 : index
    %310 = vector.load %arg10[%c0_102, %c0_103] : memref<16x32xbf16, #tpu.memory_space<vmem>>, vector<16x32xbf16>
    %c0_104 = arith.constant 0 : index
    %c0_105 = arith.constant 0 : index
    %311 = vector.load %arg5[%c0_104, %c0_105] : memref<32x11xbf16, #tpu.memory_space<vmem>>, vector<32x11xbf16>
    %cst_106 = arith.constant dense<0.000000e+00> : vector<16x11xf32>
    %312 = tpu.matmul %310, %311, %cst_106 {dimension_numbers = #tpu.dot_dimension_numbers<[1], [0], [0], [1], [0, 0, 1, 1], [], []>} : vector<16x32xbf16>, vector<32x11xbf16>, vector<16x11xf32> -> vector<16x11xf32>
    %c0_107 = arith.constant 0 : index
    %c0_108 = arith.constant 0 : index
    %313 = vector.load %arg6[%c0_107, %c0_108] : memref<1x11xf32, #tpu.memory_space<vmem>>, vector<1x11xf32>
    %314 = vector.broadcast %313 : vector<1x11xf32> to vector<16x11xf32>
    %315 = arith.addf %312, %314 : vector<16x11xf32>
    %cst_109 = arith.constant dense<0xFF800000> : vector<16xf32>
    %316 = vector.multi_reduction <maximumf>, %315, %cst_109 [1] : vector<16x11xf32> to vector<16xf32>
    %317 = vector.shape_cast %316 : vector<16xf32> to vector<16x1xf32>
    %318 = vector.broadcast %317 : vector<16x1xf32> to vector<16x11xf32>
    %319 = arith.subf %315, %318 : vector<16x11xf32>
    %320 = math.exp %319 : vector<16x11xf32>
    %cst_110 = arith.constant dense<0.000000e+00> : vector<16xf32>
    %321 = vector.multi_reduction <add>, %320, %cst_110 [1] : vector<16x11xf32> to vector<16xf32>
    %322 = vector.shape_cast %321 : vector<16xf32> to vector<16x1xf32>
    %323 = math.log %322 : vector<16x1xf32>
    %324 = arith.addf %317, %323 : vector<16x1xf32>
    %cst_111 = arith.constant -13.8155107 : f32
    %325 = vector.broadcast %cst_111 : f32 to vector<16x1xf32>
    %326 = arith.maximumf %324, %325 : vector<16x1xf32>
    %cst_112 = arith.constant -13.8155107 : f32
    %327 = vector.broadcast %cst_112 : f32 to vector<16x1xf32>
    %328 = arith.subf %324, %327 : vector<16x1xf32>
    %329 = math.absf %328 : vector<16x1xf32>
    %cst_113 = arith.constant 0.000000e+00 : f32
    %330 = vector.broadcast %cst_113 : f32 to vector<16x1xf32>
    %331 = arith.subf %330, %329 : vector<16x1xf32>
    %332 = math.exp %331 : vector<16x1xf32>
    %cst_114 = arith.constant 1.000000e+00 : f32
    %333 = vector.broadcast %cst_114 : f32 to vector<16x1xf32>
    %334 = arith.addf %333, %332 : vector<16x1xf32>
    %335 = math.log %334 : vector<16x1xf32>
    %336 = arith.addf %326, %335 : vector<16x1xf32>
    %c0_115 = arith.constant 0 : index
    %c0_116 = arith.constant 0 : index
    %337 = vector.load %arg7[%c0_115, %c0_116] : memref<16x1xi32, #tpu.memory_space<vmem>>, vector<16x1xi32>
    %338 = tpu.iota {dimensions = array<i32: 1>} : vector<16x11xi32>
    %339 = vector.broadcast %337 : vector<16x1xi32> to vector<16x11xi32>
    %340 = arith.cmpi eq, %338, %339 : vector<16x11xi32>
    %cst_117 = arith.constant 0.000000e+00 : f32
    %341 = vector.broadcast %cst_117 : f32 to vector<16x11xf32>
    %342 = arith.select %340, %315, %341 : vector<16x11xi1>, vector<16x11xf32>
    %cst_118 = arith.constant dense<0.000000e+00> : vector<16xf32>
    %343 = vector.multi_reduction <add>, %342, %cst_118 [1] : vector<16x11xf32> to vector<16xf32>
    %344 = vector.shape_cast %343 : vector<16xf32> to vector<16x1xf32>
    %345 = arith.subf %336, %344 : vector<16x1xf32>
    %c10_i32 = arith.constant 10 : i32
    %346 = vector.broadcast %c10_i32 : i32 to vector<16x1xi32>
    %347 = arith.cmpi eq, %337, %346 : vector<16x1xi32>
    %cst_119 = arith.constant 0.000000e+00 : f32
    %348 = vector.broadcast %cst_119 : f32 to vector<16x1xf32>
    %349 = arith.select %347, %348, %345 : vector<16x1xi1>, vector<16x1xf32>
    %c0_120 = arith.constant 0 : index
    %c0_121 = arith.constant 0 : index
    %350 = vector.load %arg8[%c0_120, %c0_121] : memref<16x1xf32, #tpu.memory_space<vmem>>, vector<16x1xf32>
    tpu.vector_store %arg8[%c0_120, %c0_121], %349 {strides = array<i32>} : memref<16x1xf32, #tpu.memory_space<vmem>>, vector<16x1xf32>,
    return
  }
  func.func @transform_0(%arg0: i32) -> (i32, i32, i32) {
    %c0_i32 = arith.constant 0 : i32
    %c0_i32_0 = arith.constant 0 : i32
    %c0_i32_1 = arith.constant 0 : i32
    %c0_i32_2 = arith.constant 0 : i32
    return %c0_i32, %c0_i32_0, %c0_i32_1 : i32, i32, i32
  }
  func.func @transform_1(%arg0: i32) -> (i32, i32) {
    %c0_i32 = arith.constant 0 : i32
    %c0_i32_0 = arith.constant 0 : i32
    %c0_i32_1 = arith.constant 0 : i32
    return %c0_i32, %c0_i32_0 : i32, i32
  }
  func.func @transform_2(%arg0: i32) -> (i32, i32) {
    %c0_i32 = arith.constant 0 : i32
    %c0_i32_0 = arith.constant 0 : i32
    %c0_i32_1 = arith.constant 0 : i32
    return %c0_i32, %c0_i32_0 : i32, i32
  }
  func.func @transform_3(%arg0: i32) -> (i32, i32) {
    %c0_i32 = arith.constant 0 : i32
    %c0_i32_0 = arith.constant 0 : i32
    %c0_i32_1 = arith.constant 0 : i32
    return %c0_i32, %c0_i32_0 : i32, i32
  }
  func.func @transform_4(%arg0: i32) -> (i32, i32) {
    %c0_i32 = arith.constant 0 : i32
    %c0_i32_0 = arith.constant 0 : i32
    %c0_i32_1 = arith.constant 0 : i32
    return %c0_i32, %c0_i32_0 : i32, i32
  }
  func.func @transform_5(%arg0: i32) -> (i32, i32) {
    %c0_i32 = arith.constant 0 : i32
    %c0_i32_0 = arith.constant 0 : i32
    %c0_i32_1 = arith.constant 0 : i32
    return %c0_i32, %c0_i32_0 : i32, i32
  }
  func.func @transform_6(%arg0: i32) -> (i32, i32) {
    %c0_i32 = arith.constant 0 : i32
    %c0_i32_0 = arith.constant 0 : i32
    %c0_i32_1 = arith.constant 0 : i32
    return %c0_i32, %c0_i32_0 : i32, i32
  }
  func.func @transform_7(%arg0: i32) -> (i32, i32) {
    %c0_i32 = arith.constant 0 : i32
    %c0_i32_0 = arith.constant 0 : i32
    %c0_i32_1 = arith.constant 0 : i32
    return %c0_i32, %c0_i32_0 : i32, i32
  }
}

</mosaic_0001>

<bundles_post_ra>
// kernel: squeeze.5
= control target key start
LH: loop header
LB: loop body
LE: loop exit
PB: predicated region body
PF: predicated region fallthrough
CT: control target
= control target key end

     0   :  { %s67_s8 = smov 122   ;;  %vm8_vm0 = vcmask 15360   ;;  %s68_s11 = smov 124   ;;  %s118_s0 = inlined_call_operand.vmem [shape: f32[16], index: 0, kind: input, shape index: {}]   ;;  %s119_s1 = inlined_call_operand.vmem [shape: f32[8,2], index: 1, kind: output, shape index: {}]  }
   0x1   :  { %v5_v0 = vld [vmem:[%s118_s0] sm:$0x1]  ;;  %s66_s0 = smov 126   ;;  %s69_s12 = smov 120  }
   0x2   :  { %6 = vst [vmem:[#allocation0] sm:$0x1] %v5_v0  ;;  %s70_s13 = smov 118   ;;  %s71_s14 = smov 116  }
   0x3   :  { %s72_s15 = smov 114  }
   0x9   :  { %v10_v1 = vld [vmem:[#allocation0] sm:$0x1]  }
   0xa   :  { %v22_v2 = vld [vmem:[#allocation0] sm:$0x1]   ;;  %11 = vrot.lane.b32.xlu0 %v10_v1, %s66_s0 }
   0xb   :  { %23 = vrot.lane.b32.xlu1 %v22_v2, %s67_s8  ;;  %v16_v3 = vld [vmem:[#allocation0] sm:$0x1]  }
   0xc   :  { %v28_v4 = vld [vmem:[#allocation0] sm:$0x1]  }
   0xd   :  { %v7_v5 = vld [vmem:[#allocation0] sm:$0x1]  }
   0xe   :  { %9 = vst.msk [vmem:[%s119_s1] sm:$0x1] %vm8_vm0, %v7_v5   ;;  %17 = vrot.lane.b32.xlu0 %v16_v3, %s68_s11  ;;  %v34_v6 = vld [vmem:[#allocation0] sm:$0x1]  }
   0xf   :  { %29 = vrot.lane.b32.xlu1 %v28_v4, %s69_s12  ;;  %v40_v7 = vld [vmem:[#allocation0] sm:$0x1]  }
  0x10   :  { %v46_v8 = vld [vmem:[#allocation0] sm:$0x1]  }
  0x12   :  { %35 = vrot.lane.b32.xlu0 %v34_v6, %s70_s13 }
  0x13   :  { %41 = vrot.lane.b32.xlu1 %v40_v7, %s71_s14 }
  0x16   :  { %47 = vrot.lane.b32.xlu0 %v46_v8, %s72_s15 }
  0x7c   :  { %v12_v9 = vpop.permute.xlu0 %11  }
  0x7d   :  { %v24_v10 = vpop.permute.xlu1 %23   ;;  %52 = vst.msk [vmem:[%s119_s1 + $0x1] sm:$0x1] %vm8_vm0, %v12_v9  }
  0x7e   :  { %54 = vst.msk [vmem:[%s119_s1 + $0x3] sm:$0x1] %vm8_vm0, %v24_v10  }
  0x80   :  { %v18_v11 = vpop.permute.xlu0 %17  }
  0x81   :  { %v30_v12 = vpop.permute.xlu1 %29   ;;  %53 = vst.msk [vmem:[%s119_s1 + $0x2] sm:$0x1] %vm8_vm0, %v18_v11  }
  0x82   :  { %55 = vst.msk [vmem:[%s119_s1 + $0x4] sm:$0x1] %vm8_vm0, %v30_v12  }
  0x84   :  { %v36_v13 = vpop.permute.xlu0 %35  }
  0x85   :  { %v42_v14 = vpop.permute.xlu1 %41   ;;  %56 = vst.msk [vmem:[%s119_s1 + $0x5] sm:$0x1] %vm8_vm0, %v36_v13  }
  0x86   :  { %57 = vst.msk [vmem:[%s119_s1 + $0x6] sm:$0x1] %vm8_vm0, %v42_v14  }
  0x88   :  { %v48_v15 = vpop.permute.xlu0 %47  }
  0x89   :  { %58 = vst.msk [vmem:[%s119_s1 + $0x7] sm:$0x1] %vm8_vm0, %v48_v15  }

// kernel: vae_forward.3
= control target key start
LH: loop header
LB: loop body
LE: loop exit
PB: predicated region body
PF: predicated region fallthrough
CT: control target
= control target key end

     0   :  { %vm28_vm0 = vcmask 254976   ;;  %v1170_v0 = vmov 0.0   ;;  %vm1171_vm1 = vmmov 0   ;;  %s1172_s9 = smov 64   ;;  %vm54_vm2 = vcmask 261120   ;;  %s1174_s10 = smov 96   ;;  %s1457_s2 = inlined_call_operand.vmem [shape: bf16[32,96], index: 2, kind: input, shape index: {}]   ;;  %s1458_s1 = inlined_call_operand.vmem [shape: f32[2,32], index: 1, kind: input, shape index: {}]   ;;  %s1459_s3 = inlined_call_operand.vmem [shape: f32[1,32], index: 3, kind: input, shape index: {}]   ;;  %s1460_s0 = inlined_call_operand.vmem [shape: f32[8,2,96], index: 0, kind: input, shape index: {}]   ;;  %s1461_s4 = inlined_call_operand.vmem [shape: bf16[32,11], index: 4, kind: input, shape index: {}]   ;;  %s1462_s5 = inlined_call_operand.vmem [shape: f32[1,11], index: 5, kind: input, shape index: {}]   ;;  %s1463_s6 = inlined_call_operand.vmem [shape: s32[16,1], index: 6, kind: input, shape index: {}]   ;;  %s1464_s7 = inlined_call_operand.vmem [shape: f32[16,1], index: 7, kind: output, shape index: {}]  }
   0x1   :  { %1021 = vmatprep.subr.bf16.mxu0 %v1170_v0  ;;  %v1220_v1 = vld [vmem:[%s1457_s2 + $0x8] sm:$0xff]   ;;  %1025 = vmatprep.mubr.msk.bf16.mxu0 %vm1171_vm1, %v1170_v0  ;;  %v1231_v2 = vld [vmem:[%s1457_s2] sm:$0xff]   ;;  %vm238_vm3 = vcmask 254977   ;;  %vm424_vm4 = vcmask 257027   ;;  %vm145_vm5 = vcmask 253952   ;;  %vm331_vm6 = vcmask 256002  }
   0x2   :  { %1029 = vmatprep.subr.bf16.mxu1 %v1170_v0  ;;  %1033 = vmatprep.mubr.msk.bf16.mxu1 %vm1171_vm1, %v1170_v0  ;;  %v27_v3 = vld [vmem:[%s1458_s1] sm:$0x3]  ;;  %s1173_s1 = smov 32   ;;  %v952_v38 = vld [vmem:[%s1460_s0 + $0x2] sm:$0x3]  ;;  %vm867_vm7 = vcmask 89088  }
   0x3   :  { %1022 = vmatpush3.bf16.msra.mxu0 %v1220_v1  ;;  %v945_v4 = vld [vmem:[%s1459_s3] ss:$0 sm:$0xff]  ;;  %1030 = vmatpush3.bf16.msra.mxu1 %v1220_v1  ;;  %29 = vst.msk [vmem:[#allocation2] sm:$0x3] %vm28_vm0, %v27_v3  ;;  %v956_v63 = vld [vmem:[%s1460_s0 + $0x4] sm:$0x3] }
   0x4   :  { %1023 = vmatprep.subr.bf16.mxu0 %v1170_v0  ;;  %106 = vrot.lane.b32.xlu0 %v945_v4, %s1172_s9  ;;  %v98_v13 = vld [vmem:[%s1460_s0] sm:$0x3]  ;;  %vm938_vm11 = vcmask 7168  }
   0x5   :  { %1031 = vmatprep.subr.bf16.mxu1 %v1170_v0 }
   0x7   :  { %1024 = vmatpush3.bf16.msra.mxu0 %v1231_v2  ;;  %1032 = vmatpush3.bf16.msra.mxu1 %v1231_v2 }
   0x8   :  { %1037 = vmatprep.subr.bf16.mxu0 %v1170_v0  ;;  %1045 = vmatprep.subr.bf16.mxu1 %v1170_v0 }
   0xa   :  { %v40_v5 = vld [vmem:[#allocation2] sm:$0x3] }
   0xb   :  { %v41_v6 = vpack.c.bf16 %v40_v5, %v40_v5 }
   0xd   :  { %1026 = vmatmul.mubr.msk.bf16.vlgmr.msra.gmra.mxu0 %vm54_vm2, %v41_v6 }
   0xe   :  { %1038 = vmatpush3.bf16.msra.mxu0 %v1220_v1  ;;  %1041 = vmatprep.mubr.msk.bf16.mxu0 %vm1171_vm1, %v1170_v0 }
   0xf   :  { %1039 = vmatprep.subr.bf16.mxu0 %v1170_v0 }
  0x12   :  { %1040 = vmatpush3.bf16.msra.mxu0 %v1231_v2 }
  0x13   :  { %1053 = vmatprep.subr.bf16.mxu0 %v1170_v0 }
  0x76   :  { %v1255_v7 = vpop.permute.xlu0 %106 }
  0xcd   :  { %v92_v8 = vpop.f32.mrf.mxu0 }
  0xce   :  { %v109_v9 = vadd.f32 %v1255_v7, %v92_v8  ;;  %v99_v14 = vadd.f32 %v98_v13, %v92_v8 }
  0xcf   :  { %v1027_v10 = vpop.f32.mrf.mxu0 }
  0xd0   :  { %111 = vrot.lane.b32.xlu0 %v109_v9, %s1172_s9  ;;  %v949_v15 = vmul.f32 -1.442695, %v99_v14 }
  0xd1   :  { %v95_v11 = vpop.f32.mrf.mxu0 }
  0xd2   :  { %1106 = vpow2.f32 %v949_v15 }
  0xd3   :  { %v1028_v12 = vpop.f32.mrf.mxu0 }
  0xd4   :  { %128 = vrot.lane.b32.xlu0 %v40_v5, %s1173_s1 }
  0xdf   :  { %v1107_v16 = vpop.eup %1106 }
  0xe0   :  { %v103_v17 = vadd.f32 1.0, %v1107_v16 }
  0xe2   :  { %1108 = vrcp.f32 %v103_v17 }
  0xef   :  { %v1109_v18 = vpop.eup %1108 }
  0xf0   :  { %v121_v25 = vsub.f32 1.0, %v1109_v18 }
 0x142   :  { %v112_v19 = vpop.permute.xlu0 %111 }
 0x143   :  { %v114_v20 = vmul.f32 %v1109_v18, %v112_v19 }
 0x145   :  { %116 = vrot.lane.b32.xlu1 %v114_v20, %s1172_s9 }
 0x146   :  { %v129_v24 = vpop.permute.xlu0 %128 }
 0x147   :  { %v131_v27 = vmul.f32 %v1109_v18, %v129_v24 }
 0x1b7   :  { %v117_v21 = vpop.permute.xlu1 %116 }
 0x1b8   :  { %v119_v22 = vadd.f32 %v117_v21, %v98_v13 }
 0x1ba   :  { %1110 = vtanh.f32 %v119_v22 }
 0x1c7   :  { %v1111_v23 = vpop.eup %1110 }
 0x1c8   :  { %123 = vrot.lane.b32.xlu1 %v1111_v23, %s1174_s10 }
 0x23a   :  { %v124_v26 = vpop.permute.xlu1 %123 }
 0x23b   :  { %v126_v28 = vmul.f32 %v124_v26, %v121_v25 }
 0x23d   :  { %v1265_v29 = vadd.f32 %v131_v27, %v126_v28  ;;  %v960_v28 = vld [vmem:[%s1460_s0 + $0x6] sm:$0x3] }
 0x23f   :  { %134 = vrot.lane.b32.xlu1 %v1265_v29, %s1174_s10 }
 0x2b1   :  { %v135_v30 = vpop.permute.xlu1 %134 }
 0x2b2   :  { %137 = vst.msk [vmem:[#allocation2] sm:$0x3] %vm28_vm0, %v135_v30 }
 0x2b9   :  { %v147_v31 = vld [vmem:[#allocation2] sm:$0x3] }
 0x2ba   :  { %v148_v32 = vpack.c.bf16 %v147_v31, %v147_v31 }
 0x2bc   :  { %1034 = vmatmul.mubr.msk.bf16.vlgmr.msra.gmra.mxu1 %vm54_vm2, %v148_v32 }
 0x2bd   :  { %1046 = vmatpush3.bf16.msra.mxu1 %v1220_v1  ;;  %1049 = vmatprep.mubr.msk.bf16.mxu1 %vm1171_vm1, %v1170_v0 }
 0x2be   :  { %1047 = vmatprep.subr.bf16.mxu1 %v1170_v0 }
 0x2c1   :  { %1048 = vmatpush3.bf16.msra.mxu1 %v1231_v2 }
 0x2c2   :  { %1061 = vmatprep.subr.bf16.mxu1 %v1170_v0 }
 0x37c   :  { %v186_v33 = vpop.f32.mrf.mxu1 }
 0x37d   :  { %v201_v34 = vadd.f32 %v186_v33, %v1255_v7  ;;  %v194_v39 = vadd.f32 %v952_v38, %v186_v33 }
 0x37e   :  { %v1035_v35 = vpop.f32.mrf.mxu1 }
 0x37f   :  { %203 = vrot.lane.b32.xlu0 %v201_v34, %s1172_s9  ;;  %v953_v40 = vmul.f32 -1.442695, %v194_v39 }
 0x380   :  { %v189_v36 = vpop.f32.mrf.mxu1 }
 0x381   :  { %1112 = vpow2.f32 %v953_v40 }
 0x382   :  { %v1036_v37 = vpop.f32.mrf.mxu1 }
 0x38e   :  { %v1113_v41 = vpop.eup %1112 }
 0x38f   :  { %v198_v42 = vadd.f32 1.0, %v1113_v41 }
 0x391   :  { %1114 = vrcp.f32 %v198_v42 }
 0x39e   :  { %v1115_v43 = vpop.eup %1114 }
 0x39f   :  { %v213_v50 = vsub.f32 1.0, %v1115_v43 }
 0x3f1   :  { %v204_v44 = vpop.permute.xlu0 %203 }
 0x3f2   :  { %v206_v45 = vmul.f32 %v1115_v43, %v204_v44 }
 0x3f4   :  { %208 = vrot.lane.b32.xlu1 %v206_v45, %s1172_s9 }
 0x3f8   :  { %220 = vrot.lane.b32.xlu1 %v147_v31, %s1173_s1 }
 0x466   :  { %v209_v46 = vpop.permute.xlu1 %208 }
 0x467   :  { %v211_v47 = vadd.f32 %v952_v38, %v209_v46 }
 0x469   :  { %1116 = vtanh.f32 %v211_v47 }
 0x46a   :  { %v221_v49 = vpop.permute.xlu1 %220 }
 0x46b   :  { %v223_v52 = vmul.f32 %v1115_v43, %v221_v49 }
 0x476   :  { %v1117_v48 = vpop.eup %1116 }
 0x477   :  { %215 = vrot.lane.b32.xlu0 %v1117_v48, %s1174_s10 }
 0x4e9   :  { %v216_v51 = vpop.permute.xlu0 %215 }
 0x4ea   :  { %v218_v53 = vmul.f32 %v216_v51, %v213_v50 }
 0x4ec   :  { %v1285_v54 = vadd.f32 %v223_v52, %v218_v53 }
 0x4ee   :  { %226 = vrot.lane.b32.xlu0 %v1285_v54, %s1174_s10 }
 0x560   :  { %v227_v55 = vpop.permute.xlu0 %226 }
 0x561   :  { %229 = vst.msk [vmem:[#allocation2] sm:$0x3] %vm28_vm0, %v227_v55  ;;  %v964_v55 = vld [vmem:[%s1460_s0 + $0x8] sm:$0x3] }
 0x568   :  { %v240_v56 = vld [vmem:[#allocation2] sm:$0x3] }
 0x569   :  { %v241_v57 = vpack.c.bf16 %v240_v56, %v240_v56 }
 0x56b   :  { %1042 = vmatmul.mubr.msk.bf16.vlgmr.msra.gmra.mxu0 %vm54_vm2, %v241_v57 }
 0x56c   :  { %1054 = vmatpush3.bf16.msra.mxu0 %v1220_v1  ;;  %1057 = vmatprep.mubr.msk.bf16.mxu0 %vm1171_vm1, %v1170_v0 }
 0x56d   :  { %1055 = vmatprep.subr.bf16.mxu0 %v1170_v0 }
 0x570   :  { %1056 = vmatpush3.bf16.msra.mxu0 %v1231_v2 }
 0x571   :  { %1069 = vmatprep.subr.bf16.mxu0 %v1170_v0 }
 0x62b   :  { %v279_v58 = vpop.f32.mrf.mxu0 }
 0x62c   :  { %v294_v59 = vadd.f32 %v279_v58, %v1255_v7  ;;  %v287_v3 = vadd.f32 %v956_v63, %v279_v58 }
 0x62d   :  { %v1043_v60 = vpop.f32.mrf.mxu0 }
 0x62e   :  { %296 = vrot.lane.b32.xlu1 %v294_v59, %s1172_s9  ;;  %v957_v4 = vmul.f32 -1.442695, %v287_v3 }
 0x62f   :  { %v282_v61 = vpop.f32.mrf.mxu0 }
 0x630   :  { %1118 = vpow2.f32 %v957_v4 }
 0x631   :  { %v1044_v62 = vpop.f32.mrf.mxu0 }
 0x63d   :  { %v1119_v5 = vpop.eup %1118 }
 0x63e   :  { %v291_v6 = vadd.f32 1.0, %v1119_v5 }
 0x640   :  { %1120 = vrcp.f32 %v291_v6 }
 0x64d   :  { %v1121_v8 = vpop.eup %1120 }
 0x64e   :  { %v306_v15 = vsub.f32 1.0, %v1121_v8 }
 0x6a0   :  { %v297_v9 = vpop.permute.xlu1 %296 }
 0x6a1   :  { %v299_v10 = vmul.f32 %v1121_v8, %v297_v9 }
 0x6a3   :  { %301 = vrot.lane.b32.xlu0 %v299_v10, %s1172_s9 }
 0x6a7   :  { %313 = vrot.lane.b32.xlu0 %v240_v56, %s1173_s1 }
 0x715   :  { %v302_v11 = vpop.permute.xlu0 %301 }
 0x716   :  { %v304_v12 = vadd.f32 %v956_v63, %v302_v11 }
 0x718   :  { %1122 = vtanh.f32 %v304_v12 }
 0x719   :  { %v314_v14 = vpop.permute.xlu0 %313 }
 0x71a   :  { %v316_v17 = vmul.f32 %v1121_v8, %v314_v14 }
 0x725   :  { %v1123_v13 = vpop.eup %1122 }
 0x726   :  { %308 = vrot.lane.b32.xlu1 %v1123_v13, %s1174_s10 }
 0x798   :  { %v309_v16 = vpop.permute.xlu1 %308 }
 0x799   :  { %v311_v18 = vmul.f32 %v309_v16, %v306_v15 }
 0x79b   :  { %v1305_v19 = vadd.f32 %v316_v17, %v311_v18 }
 0x79d   :  { %319 = vrot.lane.b32.xlu1 %v1305_v19, %s1174_s10 }
 0x80f   :  { %v320_v20 = vpop.permute.xlu1 %319 }
 0x810   :  { %322 = vst.msk [vmem:[#allocation2] sm:$0x3] %vm28_vm0, %v320_v20 }
 0x817   :  { %v333_v21 = vld [vmem:[#allocation2] sm:$0x3] }
 0x818   :  { %v334_v22 = vpack.c.bf16 %v333_v21, %v333_v21 }
 0x81a   :  { %1050 = vmatmul.mubr.msk.bf16.vlgmr.msra.gmra.mxu1 %vm54_vm2, %v334_v22 }
 0x81b   :  { %1062 = vmatpush3.bf16.msra.mxu1 %v1220_v1  ;;  %1065 = vmatprep.mubr.msk.bf16.mxu1 %vm1171_vm1, %v1170_v0 }
 0x81c   :  { %1063 = vmatprep.subr.bf16.mxu1 %v1170_v0 }
 0x81f   :  { %1064 = vmatpush3.bf16.msra.mxu1 %v1231_v2 }
 0x820   :  { %1077 = vmatprep.subr.bf16.mxu1 %v1170_v0 }
 0x8da   :  { %v372_v23 = vpop.f32.mrf.mxu1 }
 0x8db   :  { %v387_v24 = vadd.f32 %v372_v23, %v1255_v7  ;;  %v380_v30 = vadd.f32 %v960_v28, %v372_v23 }
 0x8dc   :  { %v1051_v25 = vpop.f32.mrf.mxu1 }
 0x8dd   :  { %389 = vrot.lane.b32.xlu0 %v387_v24, %s1172_s9  ;;  %v961_v31 = vmul.f32 -1.442695, %v380_v30 }
 0x8de   :  { %v375_v26 = vpop.f32.mrf.mxu1 }
 0x8df   :  { %1124 = vpow2.f32 %v961_v31 }
 0x8e0   :  { %v1052_v27 = vpop.f32.mrf.mxu1 }
 0x8ec   :  { %v1125_v32 = vpop.eup %1124 }
 0x8ed   :  { %v384_v33 = vadd.f32 1.0, %v1125_v32 }
 0x8ef   :  { %1126 = vrcp.f32 %v384_v33 }
 0x8fc   :  { %v1127_v34 = vpop.eup %1126 }
 0x8fd   :  { %v399_v41 = vsub.f32 1.0, %v1127_v34 }
 0x94f   :  { %v390_v35 = vpop.permute.xlu0 %389 }
 0x950   :  { %v392_v36 = vmul.f32 %v1127_v34, %v390_v35 }
 0x952   :  { %394 = vrot.lane.b32.xlu1 %v392_v36, %s1172_s9 }
 0x956   :  { %406 = vrot.lane.b32.xlu1 %v333_v21, %s1173_s1  ;;  %v968_v21 = vld [vmem:[%s1460_s0 + $0xa] sm:$0x3] }
 0x9c4   :  { %v395_v37 = vpop.permute.xlu1 %394 }
 0x9c5   :  { %v397_v38 = vadd.f32 %v960_v28, %v395_v37 }
 0x9c7   :  { %1128 = vtanh.f32 %v397_v38 }
 0x9c8   :  { %v407_v40 = vpop.permute.xlu1 %406 }
 0x9c9   :  { %v409_v43 = vmul.f32 %v1127_v34, %v407_v40 }
 0x9d4   :  { %v1129_v39 = vpop.eup %1128 }
 0x9d5   :  { %401 = vrot.lane.b32.xlu0 %v1129_v39, %s1174_s10 }
 0xa47   :  { %v402_v42 = vpop.permute.xlu0 %401 }
 0xa48   :  { %v404_v44 = vmul.f32 %v402_v42, %v399_v41 }
 0xa4a   :  { %v1325_v45 = vadd.f32 %v409_v43, %v404_v44 }
 0xa4c   :  { %412 = vrot.lane.b32.xlu0 %v1325_v45, %s1174_s10 }
 0xabe   :  { %v413_v46 = vpop.permute.xlu0 %412 }
 0xabf   :  { %415 = vst.msk [vmem:[#allocation2] sm:$0x3] %vm28_vm0, %v413_v46  ;;  %v972_v46 = vld [vmem:[%s1460_s0 + $0xc] sm:$0x3] }
 0xac6   :  { %v426_v47 = vld [vmem:[#allocation2] sm:$0x3] }
 0xac7   :  { %v427_v48 = vpack.c.bf16 %v426_v47, %v426_v47 }
 0xac9   :  { %1058 = vmatmul.mubr.msk.bf16.vlgmr.msra.gmra.mxu0 %vm54_vm2, %v427_v48 }
 0xaca   :  { %1070 = vmatpush3.bf16.msra.mxu0 %v1220_v1  ;;  %1073 = vmatprep.mubr.msk.bf16.mxu0 %vm1171_vm1, %v1170_v0 }
 0xacb   :  { %1071 = vmatprep.subr.bf16.mxu0 %v1170_v0 }
 0xace   :  { %1072 = vmatpush3.bf16.msra.mxu0 %v1231_v2 }
 0xacf   :  { %1085 = vmatprep.subr.bf16.mxu0 %v1170_v0 }
 0xb89   :  { %v465_v49 = vpop.f32.mrf.mxu0 }
 0xb8a   :  { %v480_v50 = vadd.f32 %v465_v49, %v1255_v7  ;;  %v473_v56 = vadd.f32 %v964_v55, %v465_v49 }
 0xb8b   :  { %v1059_v51 = vpop.f32.mrf.mxu0 }
 0xb8c   :  { %482 = vrot.lane.b32.xlu1 %v480_v50, %s1172_s9  ;;  %v965_v57 = vmul.f32 -1.442695, %v473_v56 }
 0xb8d   :  { %v468_v52 = vpop.f32.mrf.mxu0 }
 0xb8e   :  { %1130 = vpow2.f32 %v965_v57 }
 0xb8f   :  { %v1060_v53 = vpop.f32.mrf.mxu0 }
 0xb9b   :  { %v1131_v58 = vpop.eup %1130 }
 0xb9c   :  { %v477_v59 = vadd.f32 1.0, %v1131_v58 }
 0xb9e   :  { %1132 = vrcp.f32 %v477_v59 }
 0xbab   :  { %v1133_v60 = vpop.eup %1132 }
 0xbac   :  { %v492_v6 = vsub.f32 1.0, %v1133_v60 }
 0xbfe   :  { %v483_v61 = vpop.permute.xlu1 %482 }
 0xbff   :  { %v485_v62 = vmul.f32 %v1133_v60, %v483_v61 }
 0xc01   :  { %487 = vrot.lane.b32.xlu0 %v485_v62, %s1172_s9 }
 0xc05   :  { %499 = vrot.lane.b32.xlu0 %v426_v47, %s1173_s1 }
 0xc73   :  { %v488_v63 = vpop.permute.xlu0 %487 }
 0xc74   :  { %v490_v3 = vadd.f32 %v964_v55, %v488_v63 }
 0xc76   :  { %1134 = vtanh.f32 %v490_v3 }
 0xc77   :  { %v500_v5 = vpop.permute.xlu0 %499 }
 0xc78   :  { %v502_v9 = vmul.f32 %v1133_v60, %v500_v5 }
 0xc83   :  { %v1135_v4 = vpop.eup %1134 }
 0xc84   :  { %494 = vrot.lane.b32.xlu1 %v1135_v4, %s1174_s10 }
 0xcf6   :  { %v495_v8 = vpop.permute.xlu1 %494 }
 0xcf7   :  { %v497_v10 = vmul.f32 %v495_v8, %v492_v6 }
 0xcf9   :  { %v1345_v11 = vadd.f32 %v502_v9, %v497_v10 }
 0xcfb   :  { %505 = vrot.lane.b32.xlu1 %v1345_v11, %s1174_s10 }
 0xd6d   :  { %v506_v12 = vpop.permute.xlu1 %505 }
 0xd6e   :  { %508 = vst.msk [vmem:[#allocation2] sm:$0x3] %vm28_vm0, %v506_v12 }
 0xd75   :  { %v517_v13 = vld [vmem:[#allocation2] sm:$0x3] }
 0xd76   :  { %v518_v14 = vpack.c.bf16 %v517_v13, %v517_v13 }
 0xd78   :  { %1066 = vmatmul.mubr.msk.bf16.vlgmr.msra.gmra.mxu1 %vm54_vm2, %v518_v14 }
 0xd79   :  { %1078 = vmatpush3.bf16.msra.mxu1 %v1220_v1  ;;  %1081 = vmatprep.mubr.msk.bf16.mxu1 %vm1171_vm1, %v1170_v0 }
 0xd7a   :  { %1079 = vmatprep.subr.bf16.mxu1 %v1170_v0 }
 0xd7d   :  { %1080 = vmatpush3.bf16.msra.mxu1 %v1231_v2 }
 0xe38   :  { %v556_v15 = vpop.f32.mrf.mxu1 }
 0xe39   :  { %v571_v16 = vadd.f32 %v556_v15, %v1255_v7  ;;  %v564_v1 = vadd.f32 %v968_v21, %v556_v15 }
 0xe3a   :  { %v1067_v17 = vpop.f32.mrf.mxu1 }
 0xe3b   :  { %573 = vrot.lane.b32.xlu0 %v571_v16, %s1172_s9  ;;  %v969_v22 = vmul.f32 -1.442695, %v564_v1 }
 0xe3c   :  { %v559_v18 = vpop.f32.mrf.mxu1 }
 0xe3d   :  { %1136 = vpow2.f32 %v969_v22  ;;  %v989_v22 = vpack.c.bf16 %v1325_v45, %v1325_v45 }
 0xe3e   :  { %v1068_v20 = vpop.f32.mrf.mxu1 }
 0xe4a   :  { %v1137_v23 = vpop.eup %1136 }
 0xe4b   :  { %v568_v24 = vadd.f32 1.0, %v1137_v23  ;;  %v420_v23 = vrot.slane %v989_v22, 5 }
 0xe4d   :  { %1138 = vrcp.f32 %v568_v24 }
 0xe5a   :  { %v1139_v25 = vpop.eup %1138 }
 0xe5b   :  { %v583_v32 = vsub.f32 1.0, %v1139_v25 }
 0xead   :  { %v574_v2 = vpop.permute.xlu0 %573 }
 0xeae   :  { %v576_v26 = vmul.f32 %v1139_v25, %v574_v2 }
 0xeb0   :  { %578 = vrot.lane.b32.xlu1 %v576_v26, %s1172_s9 }
 0xeb4   :  { %590 = vrot.lane.b32.xlu1 %v517_v13, %s1173_s1  ;;  %v976_v13 = vld [vmem:[%s1460_s0 + $0xe] sm:$0x3] }
 0xf22   :  { %v579_v27 = vpop.permute.xlu1 %578 }
 0xf23   :  { %v581_v28 = vadd.f32 %v968_v21, %v579_v27 }
 0xf25   :  { %1140 = vtanh.f32 %v581_v28 }
 0xf26   :  { %v591_v31 = vpop.permute.xlu1 %590 }
 0xf27   :  { %v593_v34 = vmul.f32 %v1139_v25, %v591_v31  ;;  %v986_v31 = vpack.c.bf16 %v1265_v29, %v1265_v29  ;;  %v1103_v29 = vld [vmem:[%s1461_s4 + $0x8] sm:$0xff]  }
 0xf32   :  { %v1141_v30 = vpop.eup %1140 }
 0xf33   :  { %585 = vrot.lane.b32.xlu0 %v1141_v30, %s1174_s10 }
 0xfa5   :  { %v586_v33 = vpop.permute.xlu0 %585 }
 0xfa6   :  { %v588_v35 = vmul.f32 %v586_v33, %v583_v32  ;;  %v988_v32 = vpack.c.bf16 %v1305_v19, %v1305_v19  ;;  %v1104_v19 = vld [vmem:[%s1461_s4] sm:$0xff]  }
 0xfa8   :  { %v1364_v36 = vadd.f32 %v593_v34, %v588_v35  ;;  %v327_v33 = vrot.slane %v988_v32, 6  ;;  %v990_v34 = vpack.c.bf16 %v1345_v11, %v1345_v11 }
 0xfaa   :  { %596 = vrot.lane.b32.xlu0 %v1364_v36, %s1174_s10  ;;  %v991_v24 = vpack.c.bf16 %v1364_v36, %v1364_v36 }
 0xfac   :  { %v604_v25 = vrot.slane %v991_v24, 7 }
0x101c   :  { %v597_v37 = vpop.permute.xlu0 %596 }
0x101d   :  { %599 = vst.msk [vmem:[#allocation2] sm:$0x3] %vm28_vm0, %v597_v37 }
0x1024   :  { %v609_v38 = vld [vmem:[#allocation2] sm:$0x3] }
0x1025   :  { %v610_v39 = vpack.c.bf16 %v609_v38, %v609_v38 }
0x1027   :  { %1074 = vmatmul.mubr.msk.bf16.vlgmr.msra.gmra.mxu0 %vm54_vm2, %v610_v39 }
0x1028   :  { %1089 = vmatprep.mubr.msk.bf16.mxu0 %vm1171_vm1, %v1170_v0  ;;  %1086 = vmatpush3.bf16.msra.mxu0 %v1103_v29 }
0x1029   :  { %1087 = vmatprep.subr.bf16.mxu0 %v1170_v0 }
0x102c   :  { %1088 = vmatpush3.bf16.msra.mxu0 %v1104_v19 }
0x10e7   :  { %v648_v40 = vpop.f32.mrf.mxu0 }
0x10e8   :  { %v663_v41 = vadd.f32 %v648_v40, %v1255_v7  ;;  %v656_v47 = vadd.f32 %v972_v46, %v648_v40 }
0x10e9   :  { %v1075_v42 = vpop.f32.mrf.mxu0 }
0x10ea   :  { %665 = vrot.lane.b32.xlu1 %v663_v41, %s1172_s9  ;;  %v973_v48 = vmul.f32 -1.442695, %v656_v47 }
0x10eb   :  { %v651_v43 = vpop.f32.mrf.mxu0 }
0x10ec   :  { %1142 = vpow2.f32 %v973_v48 }
0x10ed   :  { %v1076_v44 = vpop.f32.mrf.mxu0 }
0x10f9   :  { %v1143_v49 = vpop.eup %1142 }
0x10fa   :  { %v660_v50 = vadd.f32 1.0, %v1143_v49  ;;  %v1175_v49 = vmov 0  }
0x10fb   :  { %1100 = vset.pattern.permute.xlu1 %v1175_v49  ;;  %1099 = vset.pattern.permute.xlu0 %v1175_v49 }
0x10fc   :  { %1144 = vrcp.f32 %v660_v50  ;;  %v979_v50 = vld [vmem:[%s1462_s5] ss:$0 sm:$0xff] }
0x1109   :  { %v1145_v51 = vpop.eup %1144 }
0x110a   :  { %v675_v59 = vsub.f32 1.0, %v1145_v51 }
0x115c   :  { %v666_v52 = vpop.permute.xlu1 %665 }
0x115d   :  { %v668_v53 = vmul.f32 %v1145_v51, %v666_v52 }
0x115f   :  { %670 = vrot.lane.b32.xlu0 %v668_v53, %s1172_s9 }
0x1163   :  { %682 = vrot.lane.b32.xlu0 %v609_v38, %s1173_s1 }
0x11d1   :  { %v671_v55 = vpop.permute.xlu0 %670 }
0x11d2   :  { %v673_v56 = vadd.f32 %v972_v46, %v671_v55 }
0x11d4   :  { %1146 = vtanh.f32 %v673_v56 }
0x11d5   :  { %v683_v58 = vpop.permute.xlu0 %682 }
0x11d6   :  { %v685_v61 = vmul.f32 %v1145_v51, %v683_v58 }
0x11e1   :  { %v1147_v57 = vpop.eup %1146 }
0x11e2   :  { %677 = vrot.lane.b32.xlu1 %v1147_v57, %s1174_s10 }
0x1254   :  { %v678_v60 = vpop.permute.xlu1 %677 }
0x1255   :  { %v680_v62 = vmul.f32 %v678_v60, %v675_v59  ;;  %v1433_v60 = vld [vmem:[%s1463_s6 + $0x8] sm:$0xff] }
0x1256   :  { %vm935_vm12 = vcmp.eq.s32.totalorder %v1433_v60, 10 }
0x1257   :  { %v686_v63 = vadd.f32 %v685_v61, %v680_v62  ;;  %v1438_v61 = vld [vmem:[%s1463_s6] sm:$0xff] }
0x1258   :  { %vm934_vm10 = vcmp.eq.s32.totalorder %v1438_v61, 10 }
0x1259   :  { %688 = vrot.lane.b32.xlu1 %v686_v63, %s1174_s10  ;;  %v992_v35 = vpack.c.bf16 %v686_v63, %v686_v63 }
0x125b   :  { %v696_v36 = vrot.slane %v992_v35, 6 }
0x12cb   :  { %v689_v3 = vpop.permute.xlu1 %688 }
0x12cc   :  { %691 = vst.msk [vmem:[#allocation2] sm:$0x3] %vm28_vm0, %v689_v3 }
0x12d3   :  { %v701_v4 = vld [vmem:[#allocation2] sm:$0x3] }
0x12d4   :  { %v702_v5 = vpack.c.bf16 %v701_v4, %v701_v4 }
0x12d6   :  { %1082 = vmatmul.mubr.msk.bf16.vlgmr.msra.gmra.mxu1 %vm54_vm2, %v702_v5 }
0x1396   :  { %v740_v6 = vpop.f32.mrf.mxu1 }
0x1397   :  { %v755_v8 = vadd.f32 %v740_v6, %v1255_v7  ;;  %v748_v14 = vadd.f32 %v976_v13, %v740_v6  ;;  %v987_v7 = vpack.c.bf16 %v1285_v54, %v1285_v54 }
0x1398   :  { %v1083_v9 = vpop.f32.mrf.mxu1 }
0x1399   :  { %757 = vrot.lane.b32.xlu0 %v755_v8, %s1172_s9  ;;  %v977_v15 = vmul.f32 -1.442695, %v748_v14  ;;  %v234_v1 = vrot.slane %v987_v7, 7  ;;  %v914_v8 = vlaneseq }
0x139a   :  { %v743_v10 = vpop.f32.mrf.mxu1 }
0x139b   :  { %1148 = vpow2.f32 %v977_v15  ;;  %v915_v9 = vand.u32 127, %v914_v8 }
0x139c   :  { %v1084_v12 = vpop.f32.mrf.mxu1 }
0x13a8   :  { %v1149_v16 = vpop.eup %1148 }
0x13a9   :  { %v752_v17 = vadd.f32 1.0, %v1149_v16 }
0x13ab   :  { %1150 = vrcp.f32 %v752_v17 }
0x13b8   :  { %v1151_v18 = vpop.eup %1150 }
0x13b9   :  { %v767_v37 = vsub.f32 1.0, %v1151_v18 }
0x140b   :  { %v758_v20 = vpop.permute.xlu0 %757 }
0x140c   :  { %v760_v21 = vmul.f32 %v1151_v18, %v758_v20 }
0x140e   :  { %762 = vrot.lane.b32.xlu1 %v760_v21, %s1172_s9 }
0x1412   :  { %774 = vrot.lane.b32.xlu1 %v701_v4, %s1173_s1 }
0x1416   :  { %235 = vrot.lane.b32.xlu1 %v234_v1, %s1174_s10 }
0x141a   :  { %421 = vrot.lane.b32.xlu1 %v420_v23, %s1174_s10 }
0x141e   :  { %605 = vrot.lane.b32.xlu1 %v604_v25, %s1174_s10 }
0x1480   :  { %v763_v2 = vpop.permute.xlu1 %762 }
0x1481   :  { %v765_v26 = vadd.f32 %v976_v13, %v763_v2 }
0x1483   :  { %1152 = vtanh.f32 %v765_v26 }
0x1484   :  { %v775_v54 = vpop.permute.xlu1 %774 }
0x1485   :  { %v777_v11 = vmul.f32 %v1151_v18, %v775_v54 }
0x1488   :  { %v236_v27 = vpop.permute.xlu1 %235 }
0x1489   :  { %239 = vst.msk [vmem:[#allocation3] sm:$0x2] %vm238_vm3, %v236_v27 }
0x148c   :  { %v422_v45 = vpop.permute.xlu1 %421 }
0x148d   :  { %425 = vst.msk [vmem:[#allocation3] sm:$0x8] %vm424_vm4, %v422_v45 }
0x1490   :  { %v1153_v28 = vpop.eup %1152  ;;  %v606_v30 = vpop.permute.xlu1 %605 }
0x1491   :  { %608 = vst.msk [vmem:[#allocation3 + $0x4] sm:$0x2] %vm238_vm3, %v606_v30  ;;  %769 = vrot.lane.b32.xlu0 %v1153_v28, %s1174_s10 }
0x1495   :  { %142 = vrot.lane.b32.xlu0 %v986_v31, %s1174_s10 }
0x1499   :  { %328 = vrot.lane.b32.xlu0 %v327_v33, %s1174_s10 }
0x149d   :  { %513 = vrot.lane.b32.xlu0 %v990_v34, %s1174_s10 }
0x14a1   :  { %697 = vrot.lane.b32.xlu0 %v696_v36, %s1174_s10 }
0x1503   :  { %v770_v38 = vpop.permute.xlu0 %769 }
0x1504   :  { %v772_v39 = vmul.f32 %v770_v38, %v767_v37 }
0x1506   :  { %v1418_v40 = vadd.f32 %v777_v11, %v772_v39 }
0x1507   :  { %v143_v41 = vpop.permute.xlu0 %142 }
0x1508   :  { %146 = vst.msk [vmem:[#allocation3] sm:$0x1] %vm145_vm5, %v143_v41  ;;  %v993_v42 = vpack.c.bf16 %v1418_v40, %v1418_v40 }
0x150a   :  { %v788_v43 = vrot.slane %v993_v42, 5 }
0x150b   :  { %v329_v44 = vpop.permute.xlu0 %328 }
0x150c   :  { %332 = vst.msk [vmem:[#allocation3] sm:$0x4] %vm331_vm6, %v329_v44  ;;  %789 = vrot.lane.b32.xlu1 %v788_v43, %s1174_s10 }
0x150f   :  { %v514_v46 = vpop.permute.xlu0 %513 }
0x1510   :  { %516 = vst.msk [vmem:[#allocation3 + $0x4] sm:$0x1] %vm145_vm5, %v514_v46 }
0x1513   :  { %v698_v0 = vpop.permute.xlu0 %697 }
0x1514   :  { %700 = vst.msk [vmem:[#allocation3 + $0x4] sm:$0x4] %vm331_vm6, %v698_v0 }
0x157e   :  { %v790_v47 = vpop.permute.xlu1 %789 }
0x157f   :  { %792 = vst.msk [vmem:[#allocation3 + $0x4] sm:$0x8] %vm424_vm4, %v790_v47 }
0x1586   :  { %v1105_v48 = vld [vmem:[#allocation3] sm:$0xff]  }
0x1587   :  { %1090 = vmatmul.mubr.msk.bf16.vlgmr.msra.gmra.mxu0 %vm54_vm2, %v1105_v48 }
0x1647   :  { %v860_v51 = vpop.f32.mrf.mxu0 }
0x1648   :  { %v861_v52 = vadd.f32 %v979_v50, %v860_v51 }
0x1649   :  { %v1091_v53 = vpop.f32.mrf.mxu0 }
0x164a   :  { %v868_v55 = vsel %vm867_vm7, %v861_v52, -inf }
0x164b   :  { %869 = vmax.xlane.f32.xlu0 %v868_v55  ;;  %v863_v56 = vpop.f32.mrf.mxu0 }
0x164c   :  { %v864_v57 = vadd.f32 %v979_v50, %v863_v56 }
0x164d   :  { %v1092_v58 = vpop.f32.mrf.mxu0 }
0x164e   :  { %v871_v59 = vsel %vm867_vm7, %v864_v57, -inf }
0x164f   :  { %872 = vmax.xlane.f32.xlu1 %v871_v59 }
0x1660   :  { %920 = vperm.xlu1 %1100, %v1433_v60  }
0x1661   :  { %917 = vperm.xlu0 %1099, %v1438_v61  }
0x16d4   :  { %v870_v62 = vpop.xlane.xlu0 %869 }
0x16d5   :  { %v874_v63 = vsub.f32 %v861_v52, %v870_v62 }
0x16d7   :  { %v876_v3 = vmul.f32 1.442695, %v874_v63 }
0x16d8   :  { %v873_v4 = vpop.xlane.xlu1 %872 }
0x16d9   :  { %1154 = vpow2.f32 %v876_v3  ;;  %v875_v5 = vsub.f32 %v864_v57, %v873_v4 }
0x16db   :  { %v878_v6 = vmul.f32 1.442695, %v875_v5 }
0x16dc   :  { %v918_v10 = vpop.permute.xlu0 %917  ;;  %v921_v13 = vpop.permute.xlu1 %920 }
0x16dd   :  { %1156 = vpow2.f32 %v878_v6  ;;  %vm922_vm8 = vcmp.eq.s32.totalorder %v915_v9, %v918_v10  ;;  %vm923_vm9 = vcmp.eq.s32.totalorder %v915_v9, %v921_v13 }
0x16de   :  { %v924_v15 = vsel %vm922_vm8, %v861_v52, 0.0  ;;  %v925_v20 = vsel %vm923_vm9, %v864_v57, 0.0 }
0x16df   :  { %v926_v17 = vsel %vm867_vm7, %v924_v15, 0.0  ;;  %v929_v21 = vsel %vm867_vm7, %v925_v20, 0.0 }
0x16e6   :  { %v1155_v12 = vpop.eup %1154 }
0x16e7   :  { %v880_v14 = vsel %vm867_vm7, %v1155_v12, 0.0 }
0x16e8   :  { %881 = vadd.xlane.f32.xlu1 %v880_v14 }
0x16ea   :  { %v1157_v16 = vpop.eup %1156 }
0x16eb   :  { %v883_v18 = vsel %vm867_vm7, %v1157_v16, 0.0 }
0x16ec   :  { %927 = vadd.xlane.f32.xlu1 %v926_v17  ;;  %884 = vadd.xlane.f32.xlu0 %v883_v18 }
0x16f0   :  { %930 = vadd.xlane.f32.xlu1 %v929_v21 }
0x1701   :  { %780 = vrot.lane.b32.xlu1 %v1418_v40, %s1174_s10 }
0x1771   :  { %v882_v7 = vpop.xlane.xlu1 %881 }
0x1772   :  { %1158 = vlog2.f32 %v882_v7 }
0x1775   :  { %v885_v1 = vpop.xlane.xlu0 %884  ;;  %v928_v22 = vpop.xlane.xlu1 %927 }
0x1776   :  { %1160 = vlog2.f32 %v885_v1 }
0x1779   :  { %v931_v23 = vpop.xlane.xlu1 %930 }
0x177d   :  { %v781_v24 = vpop.permute.xlu1 %780 }
0x177e   :  { %783 = vst.msk [vmem:[#allocation2] sm:$0x3] %vm28_vm0, %v781_v24 }
0x177f   :  { %v1159_v25 = vpop.eup %1158 }
0x1780   :  { %v887_v2 = vmul.f32 0.6931472, %v1159_v25 }
0x1782   :  { %v890_v26 = vadd.f32 %v887_v2, %v870_v62 }
0x1783   :  { %v1161_v54 = vpop.eup %1160 }
0x1784   :  { %v984_v27 = vadd.f32 13.815511, %v890_v26  ;;  %v889_v45 = vmul.f32 0.6931472, %v1161_v54  ;;  %v892_v39 = vmax.f32 %v890_v26, -13.815511 }
0x1786   :  { %v896_v28 = vand.u32 2147483647, %v984_v27  ;;  %v891_v30 = vadd.f32 %v889_v45, %v873_v4 }
0x1788   :  { %v898_v31 = vsub.f32 0.0, %v896_v28  ;;  %v985_v32 = vadd.f32 13.815511, %v891_v30  ;;  %v893_v44 = vmax.f32 %v891_v30, -13.815511 }
0x178a   :  { %v900_v33 = vmul.f32 1.442695, %v898_v31  ;;  %v897_v34 = vand.u32 2147483647, %v985_v32 }
0x178c   :  { %1162 = vpow2.f32 %v900_v33  ;;  %v899_v35 = vsub.f32 0.0, %v897_v34 }
0x178e   :  { %v902_v36 = vmul.f32 1.442695, %v899_v35 }
0x1790   :  { %1164 = vpow2.f32 %v902_v36 }
0x1799   :  { %v1163_v29 = vpop.eup %1162 }
0x179a   :  { %v904_v19 = vadd.f32 1.0, %v1163_v29 }
0x179c   :  { %1166 = vlog2.f32 %v904_v19 }
0x179d   :  { %v1165_v37 = vpop.eup %1164 }
0x179e   :  { %v905_v38 = vadd.f32 1.0, %v1165_v37 }
0x17a0   :  { %1168 = vlog2.f32 %v905_v38 }
0x17a9   :  { %v1167_v11 = vpop.eup %1166 }
0x17aa   :  { %v907_v40 = vmul.f32 0.6931472, %v1167_v11 }
0x17ac   :  { %v910_v41 = vadd.f32 %v907_v40, %v892_v39 }
0x17ad   :  { %v1169_v42 = vpop.eup %1168 }
0x17ae   :  { %v932_v43 = vsub.f32 %v910_v41, %v928_v22  ;;  %v909_v46 = vmul.f32 0.6931472, %v1169_v42 }
0x17b0   :  { %v936_v0 = vsel %vm934_vm10, 0.0, %v932_v43  ;;  %v911_v47 = vadd.f32 %v909_v46, %v893_v44 }
0x17b1   :  { %939 = vst.msk [vmem:[%s1464_s7] sm:$0xff] %vm938_vm11, %v936_v0 }
0x17b2   :  { %v933_v48 = vsub.f32 %v911_v47, %v931_v23 }
0x17b4   :  { %v937_v49 = vsel %vm935_vm12, 0.0, %v933_v48 }
0x17b5   :  { %940 = vst.msk [vmem:[%s1464_s7 + $0x8] sm:$0xff] %vm938_vm11, %v937_v49 }

// kernel: vae_forward.2
= control target key start
LH: loop header
LB: loop body
LE: loop exit
PB: predicated region body
PF: predicated region fallthrough
CT: control target
= control target key end

     0   :  { %v1797_v0 = vmov 0.0   ;;  %vm1798_vm0 = vmmov 0   ;;  %vm19_vm1 = vcmask 254976   ;;  %s1799_s29 = smov 64   ;;  %vm60_vm2 = vcmask 261120   ;;  %s1800_s8 = smov 32   ;;  %s2211_s2 = inlined_call_operand.vmem [shape: bf16[2,32,96], index: 2, kind: input, shape index: {}]   ;;  %s2212_s1 = inlined_call_operand.vmem [shape: f32[2,32], index: 1, kind: input, shape index: {}]   ;;  %s2213_s3 = inlined_call_operand.vmem [shape: f32[2,1,32], index: 3, kind: input, shape index: {}]   ;;  %s2214_s0 = inlined_call_operand.vmem [shape: f32[2,8,2,96], index: 0, kind: input, shape index: {}]   ;;  %s2215_s4 = inlined_call_operand.vmem [shape: f32[2,8,2,32], index: 4, kind: output, shape index: {}]  }
   0x1   :  { %1560 = vmatprep.subr.bf16.mxu0 %v1797_v0  ;;  %1568 = vmatprep.subr.bf16.mxu1 %v1797_v0  ;;  %v1832_v1 = vld [vmem:[%s2211_s2 + $0x8] sm:$0xff]   ;;  %v1837_v2 = vld [vmem:[%s2211_s2 + $0x18] sm:$0xff]   ;;  %v1847_v3 = vld [vmem:[%s2211_s2] sm:$0xff]   ;;  %s1801_s9 = smov 96  }
   0x2   :  { %1564 = vmatprep.mubr.msk.bf16.mxu0 %vm1798_vm0, %v1797_v0  ;;  %1572 = vmatprep.mubr.msk.bf16.mxu1 %vm1798_vm0, %v1797_v0  ;;  %v1854_v4 = vld [vmem:[%s2211_s2 + $0x10] sm:$0xff]   ;;  %v18_v5 = vld [vmem:[%s2212_s1] sm:$0x3]  ;;  %v1453_v27 = vld [vmem:[%s2214_s0 + $0x1e] sm:$0x3] }
   0x3   :  { %1561 = vmatpush3.bf16.msra.mxu0 %v1832_v1  ;;  %1569 = vmatpush3.bf16.msra.mxu1 %v1837_v2  ;;  %v21_v6 = vld [vmem:[%s2212_s1] sm:$0x3]  ;;  %20 = vst.msk [vmem:[#allocation2] sm:$0x3] %vm19_vm1, %v18_v5 }
   0x4   :  { %1562 = vmatprep.subr.bf16.mxu0 %v1797_v0  ;;  %1570 = vmatprep.subr.bf16.mxu1 %v1797_v0  ;;  %v1443_v7 = vld [vmem:[%s2213_s3] ss:$0 sm:$0xff]  ;;  %23 = vst.msk [vmem:[#allocation2 + $0x2] sm:$0x3] %vm19_vm1, %v21_v6  ;;  %v1445_v8 = vld [vmem:[%s2213_s3 + $0x1] ss:$0 sm:$0xff] }
   0x5   :  { %112 = vrot.lane.b32.xlu0 %v1443_v7, %s1799_s29  ;;  %v104_v25 = vld [vmem:[%s2214_s0] sm:$0x3] }
   0x7   :  { %1563 = vmatpush3.bf16.msra.mxu0 %v1847_v3  ;;  %1571 = vmatpush3.bf16.msra.mxu1 %v1854_v4 }
   0x8   :  { %1576 = vmatprep.subr.bf16.mxu0 %v1797_v0  ;;  %1584 = vmatprep.subr.bf16.mxu1 %v1797_v0 }
   0x9   :  { %211 = vrot.lane.b32.xlu0 %v1445_v8, %s1799_s29 }
   0xa   :  { %v46_v9 = vld [vmem:[#allocation2] sm:$0x3] }
   0xb   :  { %v145_v10 = vld [vmem:[#allocation2 + $0x2] sm:$0x3]  ;;  %v47_v11 = vpack.c.bf16 %v46_v9, %v46_v9 }
   0xc   :  { %v146_v12 = vpack.c.bf16 %v145_v10, %v145_v10 }
   0xd   :  { %1565 = vmatmul.mubr.msk.bf16.vlgmr.msra.gmra.mxu0 %vm60_vm2, %v47_v11 }
   0xe   :  { %1573 = vmatmul.mubr.msk.bf16.vlgmr.msra.gmra.mxu1 %vm60_vm2, %v146_v12  ;;  %1577 = vmatpush3.bf16.msra.mxu0 %v1832_v1 }
   0xf   :  { %1585 = vmatpush3.bf16.msra.mxu1 %v1837_v2  ;;  %1578 = vmatprep.subr.bf16.mxu0 %v1797_v0 }
  0x10   :  { %1580 = vmatprep.mubr.msk.bf16.mxu0 %vm1798_vm0, %v1797_v0  ;;  %1586 = vmatprep.subr.bf16.mxu1 %v1797_v0 }
  0x11   :  { %1588 = vmatprep.mubr.msk.bf16.mxu1 %vm1798_vm0, %v1797_v0 }
  0x12   :  { %1579 = vmatpush3.bf16.msra.mxu0 %v1847_v3 }
  0x13   :  { %1587 = vmatpush3.bf16.msra.mxu1 %v1854_v4  ;;  %1592 = vmatprep.subr.bf16.mxu0 %v1797_v0 }
  0x14   :  { %1600 = vmatprep.subr.bf16.mxu1 %v1797_v0 }
  0x77   :  { %v1891_v13 = vpop.permute.xlu0 %112 }
  0x7b   :  { %v1893_v14 = vpop.permute.xlu0 %211 }
  0xcd   :  { %v98_v15 = vpop.f32.mrf.mxu0 }
  0xce   :  { %v196_v16 = vpop.f32.mrf.mxu1  ;;  %v115_v17 = vadd.f32 %v1891_v13, %v98_v15  ;;  %v105_v26 = vadd.f32 %v104_v25, %v98_v15 }
  0xcf   :  { %v1566_v18 = vpop.f32.mrf.mxu0  ;;  %v214_v20 = vadd.f32 %v1893_v14, %v196_v16  ;;  %v204_v29 = vadd.f32 %v1453_v27, %v196_v16 }
  0xd0   :  { %v1574_v19 = vpop.f32.mrf.mxu1  ;;  %117 = vrot.lane.b32.xlu1 %v115_v17, %s1799_s29  ;;  %v1449_v28 = vmul.f32 -1.442695, %v105_v26  ;;  %v1457_v18 = vld [vmem:[%s2214_s0 + $0x2] sm:$0x3] }
  0xd1   :  { %v101_v21 = vpop.f32.mrf.mxu0  ;;  %v1454_v30 = vmul.f32 -1.442695, %v204_v29 }
  0xd2   :  { %v199_v22 = vpop.f32.mrf.mxu1  ;;  %1697 = vpow2.f32 %v1449_v28 }
  0xd3   :  { %v1567_v23 = vpop.f32.mrf.mxu0  ;;  %1699 = vpow2.f32 %v1454_v30 }
  0xd4   :  { %v1575_v24 = vpop.f32.mrf.mxu1  ;;  %216 = vrot.lane.b32.xlu1 %v214_v20, %s1799_s29  ;;  %v1461_v20 = vld [vmem:[%s2214_s0 + $0x1c] sm:$0x3] }
  0xdf   :  { %v1698_v31 = vpop.eup %1697 }
  0xe0   :  { %v109_v32 = vadd.f32 1.0, %v1698_v31  ;;  %v1700_v33 = vpop.eup %1699 }
  0xe1   :  { %v208_v34 = vadd.f32 1.0, %v1700_v33 }
  0xe2   :  { %1701 = vrcp.f32 %v109_v32 }
  0xe3   :  { %1703 = vrcp.f32 %v208_v34 }
  0xef   :  { %v1702_v35 = vpop.eup %1701 }
  0xf0   :  { %v1704_v38 = vpop.eup %1703  ;;  %v127_v48 = vsub.f32 1.0, %v1702_v35 }
  0xf1   :  { %v226_v54 = vsub.f32 1.0, %v1704_v38 }
 0x142   :  { %v118_v36 = vpop.permute.xlu1 %117 }
 0x143   :  { %v120_v37 = vmul.f32 %v1702_v35, %v118_v36 }
 0x145   :  { %122 = vrot.lane.b32.xlu0 %v120_v37, %s1799_s29 }
 0x146   :  { %v217_v39 = vpop.permute.xlu1 %216 }
 0x147   :  { %v219_v40 = vmul.f32 %v1704_v38, %v217_v39 }
 0x149   :  { %221 = vrot.lane.b32.xlu1 %v219_v40, %s1799_s29 }
 0x14d   :  { %134 = vrot.lane.b32.xlu1 %v46_v9, %s1800_s8 }
 0x151   :  { %233 = vrot.lane.b32.xlu1 %v145_v10, %s1800_s8 }
 0x1b7   :  { %v123_v41 = vpop.permute.xlu0 %122 }
 0x1b8   :  { %v125_v42 = vadd.f32 %v123_v41, %v104_v25 }
 0x1ba   :  { %1705 = vtanh.f32 %v125_v42 }
 0x1bb   :  { %v222_v43 = vpop.permute.xlu1 %221 }
 0x1bc   :  { %v224_v44 = vadd.f32 %v1453_v27, %v222_v43 }
 0x1be   :  { %1707 = vtanh.f32 %v224_v44 }
 0x1bf   :  { %v135_v47 = vpop.permute.xlu1 %134 }
 0x1c0   :  { %v137_v50 = vmul.f32 %v1702_v35, %v135_v47 }
 0x1c3   :  { %v234_v52 = vpop.permute.xlu1 %233 }
 0x1c4   :  { %v236_v56 = vmul.f32 %v1704_v38, %v234_v52 }
 0x1c7   :  { %v1706_v45 = vpop.eup %1705 }
 0x1c8   :  { %129 = vrot.lane.b32.xlu0 %v1706_v45, %s1801_s9 }
 0x1cb   :  { %v1708_v46 = vpop.eup %1707 }
 0x1cc   :  { %228 = vrot.lane.b32.xlu0 %v1708_v46, %s1801_s9 }
 0x23a   :  { %v130_v49 = vpop.permute.xlu0 %129 }
 0x23b   :  { %v132_v51 = vmul.f32 %v130_v49, %v127_v48 }
 0x23d   :  { %v138_v53 = vadd.f32 %v137_v50, %v132_v51 }
 0x23e   :  { %v229_v55 = vpop.permute.xlu0 %228 }
 0x23f   :  { %v231_v57 = vmul.f32 %v229_v55, %v226_v54  ;;  %140 = vrot.lane.b32.xlu0 %v138_v53, %s1801_s9 }
 0x241   :  { %v237_v58 = vadd.f32 %v236_v56, %v231_v57 }
 0x243   :  { %239 = vrot.lane.b32.xlu1 %v237_v58, %s1801_s9 }
 0x2b1   :  { %v141_v59 = vpop.permute.xlu0 %140 }
 0x2b2   :  { %143 = vst.msk [vmem:[#allocation2] sm:$0x3] %vm19_vm1, %v141_v59  ;;  %144 = vst.msk [vmem:[%s2215_s4] sm:$0x3] %vm19_vm1, %v141_v59 }
 0x2b5   :  { %v240_v60 = vpop.permute.xlu1 %239 }
 0x2b6   :  { %242 = vst.msk [vmem:[#allocation2 + $0x2] sm:$0x3] %vm19_vm1, %v240_v60  ;;  %1455 = vst.msk [vmem:[%s2215_s4 + $0x1e] sm:$0x3] %vm19_vm1, %v240_v60 }
 0x2b9   :  { %v245_v61 = vld [vmem:[#allocation2] sm:$0x3] }
 0x2ba   :  { %v246_v62 = vpack.c.bf16 %v245_v61, %v245_v61 }
 0x2bc   :  { %1581 = vmatmul.mubr.msk.bf16.vlgmr.msra.gmra.mxu0 %vm60_vm2, %v246_v62 }
 0x2bd   :  { %v330_v63 = vld [vmem:[#allocation2 + $0x2] sm:$0x3]  ;;  %1593 = vmatpush3.bf16.msra.mxu0 %v1832_v1  ;;  %1596 = vmatprep.mubr.msk.bf16.mxu0 %vm1798_vm0, %v1797_v0 }
 0x2be   :  { %v331_v5 = vpack.c.bf16 %v330_v63, %v330_v63  ;;  %1594 = vmatprep.subr.bf16.mxu0 %v1797_v0 }
 0x2c0   :  { %1589 = vmatmul.mubr.msk.bf16.vlgmr.msra.gmra.mxu1 %vm60_vm2, %v331_v5 }
 0x2c1   :  { %1595 = vmatpush3.bf16.msra.mxu0 %v1847_v3  ;;  %1601 = vmatpush3.bf16.msra.mxu1 %v1837_v2 }
 0x2c2   :  { %1602 = vmatprep.subr.bf16.mxu1 %v1797_v0  ;;  %1604 = vmatprep.mubr.msk.bf16.mxu1 %vm1798_vm0, %v1797_v0 }
 0x2c3   :  { %1608 = vmatprep.subr.bf16.mxu0 %v1797_v0 }
 0x2c5   :  { %1603 = vmatpush3.bf16.msra.mxu1 %v1854_v4 }
 0x2c6   :  { %1616 = vmatprep.subr.bf16.mxu1 %v1797_v0 }
 0x37c   :  { %v284_v6 = vpop.f32.mrf.mxu0 }
 0x37d   :  { %v299_v7 = vadd.f32 %v284_v6, %v1891_v13  ;;  %v292_v19 = vadd.f32 %v1457_v18, %v284_v6 }
 0x37e   :  { %v1582_v8 = vpop.f32.mrf.mxu0 }
 0x37f   :  { %301 = vrot.lane.b32.xlu0 %v299_v7, %s1799_s29  ;;  %v1458_v21 = vmul.f32 -1.442695, %v292_v19 }
 0x380   :  { %v287_v9 = vpop.f32.mrf.mxu0  ;;  %v369_v10 = vpop.f32.mrf.mxu1 }
 0x381   :  { %v384_v11 = vadd.f32 %v369_v10, %v1893_v14  ;;  %v377_v22 = vadd.f32 %v1461_v20, %v369_v10  ;;  %1709 = vpow2.f32 %v1458_v21  ;;  %v1465_v9 = vld [vmem:[%s2214_s0 + $0x4] sm:$0x3] }
 0x382   :  { %v1583_v12 = vpop.f32.mrf.mxu0  ;;  %v1590_v15 = vpop.f32.mrf.mxu1 }
 0x383   :  { %386 = vrot.lane.b32.xlu1 %v384_v11, %s1799_s29  ;;  %v1462_v23 = vmul.f32 -1.442695, %v377_v22  ;;  %v1469_v11 = vld [vmem:[%s2214_s0 + $0x1a] sm:$0x3] }
 0x384   :  { %v372_v16 = vpop.f32.mrf.mxu1 }
 0x385   :  { %1711 = vpow2.f32 %v1462_v23 }
 0x386   :  { %v1591_v17 = vpop.f32.mrf.mxu1 }
 0x38e   :  { %v1710_v24 = vpop.eup %1709 }
 0x38f   :  { %v296_v25 = vadd.f32 1.0, %v1710_v24 }
 0x391   :  { %1713 = vrcp.f32 %v296_v25 }
 0x392   :  { %v1712_v26 = vpop.eup %1711 }
 0x393   :  { %v381_v27 = vadd.f32 1.0, %v1712_v26 }
 0x395   :  { %1715 = vrcp.f32 %v381_v27 }
 0x39e   :  { %v1714_v28 = vpop.eup %1713 }
 0x39f   :  { %v311_v41 = vsub.f32 1.0, %v1714_v28 }
 0x3a2   :  { %v1716_v31 = vpop.eup %1715 }
 0x3a3   :  { %v396_v47 = vsub.f32 1.0, %v1716_v31 }
 0x3f1   :  { %v302_v29 = vpop.permute.xlu0 %301 }
 0x3f2   :  { %v304_v30 = vmul.f32 %v1714_v28, %v302_v29 }
 0x3f4   :  { %306 = vrot.lane.b32.xlu0 %v304_v30, %s1799_s29 }
 0x3f5   :  { %v387_v32 = vpop.permute.xlu1 %386 }
 0x3f6   :  { %v389_v33 = vmul.f32 %v1716_v31, %v387_v32 }
 0x3f8   :  { %391 = vrot.lane.b32.xlu1 %v389_v33, %s1799_s29 }
 0x3fc   :  { %318 = vrot.lane.b32.xlu1 %v245_v61, %s1800_s8 }
 0x400   :  { %403 = vrot.lane.b32.xlu1 %v330_v63, %s1800_s8 }
 0x466   :  { %v307_v34 = vpop.permute.xlu0 %306 }
 0x467   :  { %v309_v35 = vadd.f32 %v1457_v18, %v307_v34 }
 0x469   :  { %1717 = vtanh.f32 %v309_v35 }
 0x46a   :  { %v392_v36 = vpop.permute.xlu1 %391 }
 0x46b   :  { %v394_v37 = vadd.f32 %v1461_v20, %v392_v36 }
 0x46d   :  { %1719 = vtanh.f32 %v394_v37 }
 0x46e   :  { %v319_v40 = vpop.permute.xlu1 %318 }
 0x46f   :  { %v321_v43 = vmul.f32 %v1714_v28, %v319_v40 }
 0x472   :  { %v404_v45 = vpop.permute.xlu1 %403 }
 0x473   :  { %v406_v49 = vmul.f32 %v1716_v31, %v404_v45 }
 0x476   :  { %v1718_v38 = vpop.eup %1717 }
 0x477   :  { %313 = vrot.lane.b32.xlu0 %v1718_v38, %s1801_s9 }
 0x47a   :  { %v1720_v39 = vpop.eup %1719 }
 0x47b   :  { %398 = vrot.lane.b32.xlu0 %v1720_v39, %s1801_s9 }
 0x4e9   :  { %v314_v42 = vpop.permute.xlu0 %313 }
 0x4ea   :  { %v316_v44 = vmul.f32 %v314_v42, %v311_v41 }
 0x4ec   :  { %v322_v46 = vadd.f32 %v321_v43, %v316_v44 }
 0x4ed   :  { %v399_v48 = vpop.permute.xlu0 %398 }
 0x4ee   :  { %v401_v50 = vmul.f32 %v399_v48, %v396_v47  ;;  %324 = vrot.lane.b32.xlu0 %v322_v46, %s1801_s9 }
 0x4f0   :  { %v407_v51 = vadd.f32 %v406_v49, %v401_v50 }
 0x4f2   :  { %409 = vrot.lane.b32.xlu1 %v407_v51, %s1801_s9 }
 0x560   :  { %v325_v52 = vpop.permute.xlu0 %324 }
 0x561   :  { %327 = vst.msk [vmem:[#allocation2] sm:$0x3] %vm19_vm1, %v325_v52  ;;  %1459 = vst.msk [vmem:[%s2215_s4 + $0x2] sm:$0x3] %vm19_vm1, %v325_v52 }
 0x564   :  { %v410_v53 = vpop.permute.xlu1 %409 }
 0x565   :  { %412 = vst.msk [vmem:[#allocation2 + $0x2] sm:$0x3] %vm19_vm1, %v410_v53  ;;  %1463 = vst.msk [vmem:[%s2215_s4 + $0x1c] sm:$0x3] %vm19_vm1, %v410_v53 }
 0x568   :  { %v415_v54 = vld [vmem:[#allocation2] sm:$0x3] }
 0x569   :  { %v416_v55 = vpack.c.bf16 %v415_v54, %v415_v54 }
 0x56b   :  { %1597 = vmatmul.mubr.msk.bf16.vlgmr.msra.gmra.mxu0 %vm60_vm2, %v416_v55 }
 0x56c   :  { %v500_v56 = vld [vmem:[#allocation2 + $0x2] sm:$0x3]  ;;  %1609 = vmatpush3.bf16.msra.mxu0 %v1832_v1  ;;  %1612 = vmatprep.mubr.msk.bf16.mxu0 %vm1798_vm0, %v1797_v0 }
 0x56d   :  { %v501_v57 = vpack.c.bf16 %v500_v56, %v500_v56  ;;  %1610 = vmatprep.subr.bf16.mxu0 %v1797_v0 }
 0x56f   :  { %1605 = vmatmul.mubr.msk.bf16.vlgmr.msra.gmra.mxu1 %vm60_vm2, %v501_v57 }
 0x570   :  { %1611 = vmatpush3.bf16.msra.mxu0 %v1847_v3  ;;  %1617 = vmatpush3.bf16.msra.mxu1 %v1837_v2 }
 0x571   :  { %1618 = vmatprep.subr.bf16.mxu1 %v1797_v0  ;;  %1620 = vmatprep.mubr.msk.bf16.mxu1 %vm1798_vm0, %v1797_v0 }
 0x572   :  { %1624 = vmatprep.subr.bf16.mxu0 %v1797_v0 }
 0x574   :  { %1619 = vmatpush3.bf16.msra.mxu1 %v1854_v4 }
 0x575   :  { %1632 = vmatprep.subr.bf16.mxu1 %v1797_v0 }
 0x62b   :  { %v454_v58 = vpop.f32.mrf.mxu0 }
 0x62c   :  { %v469_v59 = vadd.f32 %v454_v58, %v1891_v13  ;;  %v462_v10 = vadd.f32 %v1465_v9, %v454_v58 }
 0x62d   :  { %v1598_v60 = vpop.f32.mrf.mxu0 }
 0x62e   :  { %471 = vrot.lane.b32.xlu0 %v469_v59, %s1799_s29  ;;  %v1466_v12 = vmul.f32 -1.442695, %v462_v10 }
 0x62f   :  { %v457_v61 = vpop.f32.mrf.mxu0  ;;  %v539_v62 = vpop.f32.mrf.mxu1 }
 0x630   :  { %v554_v63 = vadd.f32 %v539_v62, %v1893_v14  ;;  %v547_v15 = vadd.f32 %v1469_v11, %v539_v62  ;;  %1721 = vpow2.f32 %v1466_v12  ;;  %v1473_v61 = vld [vmem:[%s2214_s0 + $0x6] sm:$0x3] }
 0x631   :  { %v1599_v5 = vpop.f32.mrf.mxu0  ;;  %v1606_v6 = vpop.f32.mrf.mxu1 }
 0x632   :  { %556 = vrot.lane.b32.xlu1 %v554_v63, %s1799_s29  ;;  %v1470_v16 = vmul.f32 -1.442695, %v547_v15  ;;  %v1477_v63 = vld [vmem:[%s2214_s0 + $0x18] sm:$0x3] }
 0x633   :  { %v542_v7 = vpop.f32.mrf.mxu1 }
 0x634   :  { %1723 = vpow2.f32 %v1470_v16 }
 0x635   :  { %v1607_v8 = vpop.f32.mrf.mxu1 }
 0x63d   :  { %v1722_v17 = vpop.eup %1721 }
 0x63e   :  { %v466_v18 = vadd.f32 1.0, %v1722_v17 }
 0x640   :  { %1725 = vrcp.f32 %v466_v18 }
 0x641   :  { %v1724_v19 = vpop.eup %1723 }
 0x642   :  { %v551_v20 = vadd.f32 1.0, %v1724_v19 }
 0x644   :  { %1727 = vrcp.f32 %v551_v20 }
 0x64d   :  { %v1726_v21 = vpop.eup %1725 }
 0x64e   :  { %v481_v34 = vsub.f32 1.0, %v1726_v21 }
 0x651   :  { %v1728_v24 = vpop.eup %1727 }
 0x652   :  { %v566_v40 = vsub.f32 1.0, %v1728_v24 }
 0x6a0   :  { %v472_v22 = vpop.permute.xlu0 %471 }
 0x6a1   :  { %v474_v23 = vmul.f32 %v1726_v21, %v472_v22 }
 0x6a3   :  { %476 = vrot.lane.b32.xlu0 %v474_v23, %s1799_s29 }
 0x6a4   :  { %v557_v25 = vpop.permute.xlu1 %556 }
 0x6a5   :  { %v559_v26 = vmul.f32 %v1728_v24, %v557_v25 }
 0x6a7   :  { %561 = vrot.lane.b32.xlu1 %v559_v26, %s1799_s29 }
 0x6ab   :  { %488 = vrot.lane.b32.xlu1 %v415_v54, %s1800_s8 }
 0x6af   :  { %573 = vrot.lane.b32.xlu1 %v500_v56, %s1800_s8 }
 0x715   :  { %v477_v27 = vpop.permute.xlu0 %476 }
 0x716   :  { %v479_v28 = vadd.f32 %v1465_v9, %v477_v27 }
 0x718   :  { %1729 = vtanh.f32 %v479_v28 }
 0x719   :  { %v562_v29 = vpop.permute.xlu1 %561 }
 0x71a   :  { %v564_v30 = vadd.f32 %v1469_v11, %v562_v29 }
 0x71c   :  { %1731 = vtanh.f32 %v564_v30 }
 0x71d   :  { %v489_v33 = vpop.permute.xlu1 %488 }
 0x71e   :  { %v491_v36 = vmul.f32 %v1726_v21, %v489_v33 }
 0x721   :  { %v574_v38 = vpop.permute.xlu1 %573 }
 0x722   :  { %v576_v42 = vmul.f32 %v1728_v24, %v574_v38 }
 0x725   :  { %v1730_v31 = vpop.eup %1729 }
 0x726   :  { %483 = vrot.lane.b32.xlu0 %v1730_v31, %s1801_s9 }
 0x729   :  { %v1732_v32 = vpop.eup %1731 }
 0x72a   :  { %568 = vrot.lane.b32.xlu0 %v1732_v32, %s1801_s9 }
 0x798   :  { %v484_v35 = vpop.permute.xlu0 %483 }
 0x799   :  { %v486_v37 = vmul.f32 %v484_v35, %v481_v34 }
 0x79b   :  { %v492_v39 = vadd.f32 %v491_v36, %v486_v37 }
 0x79c   :  { %v569_v41 = vpop.permute.xlu0 %568 }
 0x79d   :  { %v571_v43 = vmul.f32 %v569_v41, %v566_v40  ;;  %494 = vrot.lane.b32.xlu0 %v492_v39, %s1801_s9 }
 0x79f   :  { %v577_v44 = vadd.f32 %v576_v42, %v571_v43 }
 0x7a1   :  { %579 = vrot.lane.b32.xlu1 %v577_v44, %s1801_s9 }
 0x80f   :  { %v495_v45 = vpop.permute.xlu0 %494 }
 0x810   :  { %497 = vst.msk [vmem:[#allocation2] sm:$0x3] %vm19_vm1, %v495_v45  ;;  %1467 = vst.msk [vmem:[%s2215_s4 + $0x4] sm:$0x3] %vm19_vm1, %v495_v45 }
 0x813   :  { %v580_v46 = vpop.permute.xlu1 %579 }
 0x814   :  { %582 = vst.msk [vmem:[#allocation2 + $0x2] sm:$0x3] %vm19_vm1, %v580_v46  ;;  %1471 = vst.msk [vmem:[%s2215_s4 + $0x1a] sm:$0x3] %vm19_vm1, %v580_v46 }
 0x817   :  { %v585_v47 = vld [vmem:[#allocation2] sm:$0x3] }
 0x818   :  { %v586_v48 = vpack.c.bf16 %v585_v47, %v585_v47 }
 0x81a   :  { %1613 = vmatmul.mubr.msk.bf16.vlgmr.msra.gmra.mxu0 %vm60_vm2, %v586_v48 }
 0x81b   :  { %v670_v49 = vld [vmem:[#allocation2 + $0x2] sm:$0x3]  ;;  %1625 = vmatpush3.bf16.msra.mxu0 %v1832_v1  ;;  %1628 = vmatprep.mubr.msk.bf16.mxu0 %vm1798_vm0, %v1797_v0 }
 0x81c   :  { %v671_v50 = vpack.c.bf16 %v670_v49, %v670_v49  ;;  %1626 = vmatprep.subr.bf16.mxu0 %v1797_v0 }
 0x81e   :  { %1621 = vmatmul.mubr.msk.bf16.vlgmr.msra.gmra.mxu1 %vm60_vm2, %v671_v50 }
 0x81f   :  { %1627 = vmatpush3.bf16.msra.mxu0 %v1847_v3  ;;  %1633 = vmatpush3.bf16.msra.mxu1 %v1837_v2 }
 0x820   :  { %1634 = vmatprep.subr.bf16.mxu1 %v1797_v0  ;;  %1636 = vmatprep.mubr.msk.bf16.mxu1 %vm1798_vm0, %v1797_v0 }
 0x821   :  { %1640 = vmatprep.subr.bf16.mxu0 %v1797_v0 }
 0x823   :  { %1635 = vmatpush3.bf16.msra.mxu1 %v1854_v4 }
 0x824   :  { %1648 = vmatprep.subr.bf16.mxu1 %v1797_v0 }
 0x8da   :  { %v624_v51 = vpop.f32.mrf.mxu0 }
 0x8db   :  { %v639_v52 = vadd.f32 %v624_v51, %v1891_v13  ;;  %v632_v62 = vadd.f32 %v1473_v61, %v624_v51 }
 0x8dc   :  { %v1614_v53 = vpop.f32.mrf.mxu0 }
 0x8dd   :  { %641 = vrot.lane.b32.xlu0 %v639_v52, %s1799_s29  ;;  %v1474_v5 = vmul.f32 -1.442695, %v632_v62 }
 0x8de   :  { %v627_v54 = vpop.f32.mrf.mxu0  ;;  %v709_v55 = vpop.f32.mrf.mxu1 }
 0x8df   :  { %v724_v56 = vadd.f32 %v709_v55, %v1893_v14  ;;  %v717_v6 = vadd.f32 %v1477_v63, %v709_v55  ;;  %1733 = vpow2.f32 %v1474_v5  ;;  %v1481_v54 = vld [vmem:[%s2214_s0 + $0x8] sm:$0x3] }
 0x8e0   :  { %v1615_v57 = vpop.f32.mrf.mxu0  ;;  %v1622_v58 = vpop.f32.mrf.mxu1 }
 0x8e1   :  { %726 = vrot.lane.b32.xlu1 %v724_v56, %s1799_s29  ;;  %v1478_v7 = vmul.f32 -1.442695, %v717_v6  ;;  %v1485_v56 = vld [vmem:[%s2214_s0 + $0x16] sm:$0x3] }
 0x8e2   :  { %v712_v59 = vpop.f32.mrf.mxu1 }
 0x8e3   :  { %1735 = vpow2.f32 %v1478_v7 }
 0x8e4   :  { %v1623_v60 = vpop.f32.mrf.mxu1 }
 0x8ec   :  { %v1734_v8 = vpop.eup %1733 }
 0x8ed   :  { %v636_v9 = vadd.f32 1.0, %v1734_v8 }
 0x8ef   :  { %1737 = vrcp.f32 %v636_v9 }
 0x8f0   :  { %v1736_v10 = vpop.eup %1735 }
 0x8f1   :  { %v721_v11 = vadd.f32 1.0, %v1736_v10 }
 0x8f3   :  { %1739 = vrcp.f32 %v721_v11 }
 0x8fc   :  { %v1738_v12 = vpop.eup %1737 }
 0x8fd   :  { %v651_v27 = vsub.f32 1.0, %v1738_v12 }
 0x900   :  { %v1740_v17 = vpop.eup %1739 }
 0x901   :  { %v736_v33 = vsub.f32 1.0, %v1740_v17 }
 0x94f   :  { %v642_v15 = vpop.permute.xlu0 %641 }
 0x950   :  { %v644_v16 = vmul.f32 %v1738_v12, %v642_v15 }
 0x952   :  { %646 = vrot.lane.b32.xlu0 %v644_v16, %s1799_s29 }
 0x953   :  { %v727_v18 = vpop.permute.xlu1 %726 }
 0x954   :  { %v729_v19 = vmul.f32 %v1740_v17, %v727_v18 }
 0x956   :  { %731 = vrot.lane.b32.xlu1 %v729_v19, %s1799_s29 }
 0x95a   :  { %658 = vrot.lane.b32.xlu1 %v585_v47, %s1800_s8 }
 0x95e   :  { %743 = vrot.lane.b32.xlu1 %v670_v49, %s1800_s8 }
 0x9c4   :  { %v647_v20 = vpop.permute.xlu0 %646 }
 0x9c5   :  { %v649_v21 = vadd.f32 %v1473_v61, %v647_v20 }
 0x9c7   :  { %1741 = vtanh.f32 %v649_v21 }
 0x9c8   :  { %v732_v22 = vpop.permute.xlu1 %731 }
 0x9c9   :  { %v734_v23 = vadd.f32 %v1477_v63, %v732_v22 }
 0x9cb   :  { %1743 = vtanh.f32 %v734_v23 }
 0x9cc   :  { %v659_v26 = vpop.permute.xlu1 %658 }
 0x9cd   :  { %v661_v29 = vmul.f32 %v1738_v12, %v659_v26 }
 0x9d0   :  { %v744_v31 = vpop.permute.xlu1 %743 }
 0x9d1   :  { %v746_v35 = vmul.f32 %v1740_v17, %v744_v31 }
 0x9d4   :  { %v1742_v24 = vpop.eup %1741 }
 0x9d5   :  { %653 = vrot.lane.b32.xlu0 %v1742_v24, %s1801_s9 }
 0x9d8   :  { %v1744_v25 = vpop.eup %1743 }
 0x9d9   :  { %738 = vrot.lane.b32.xlu0 %v1744_v25, %s1801_s9 }
 0xa47   :  { %v654_v28 = vpop.permute.xlu0 %653 }
 0xa48   :  { %v656_v30 = vmul.f32 %v654_v28, %v651_v27 }
 0xa4a   :  { %v662_v32 = vadd.f32 %v661_v29, %v656_v30 }
 0xa4b   :  { %v739_v34 = vpop.permute.xlu0 %738 }
 0xa4c   :  { %v741_v36 = vmul.f32 %v739_v34, %v736_v33  ;;  %664 = vrot.lane.b32.xlu0 %v662_v32, %s1801_s9 }
 0xa4e   :  { %v747_v37 = vadd.f32 %v746_v35, %v741_v36 }
 0xa50   :  { %749 = vrot.lane.b32.xlu1 %v747_v37, %s1801_s9 }
 0xabe   :  { %v665_v38 = vpop.permute.xlu0 %664 }
 0xabf   :  { %667 = vst.msk [vmem:[#allocation2] sm:$0x3] %vm19_vm1, %v665_v38  ;;  %1475 = vst.msk [vmem:[%s2215_s4 + $0x6] sm:$0x3] %vm19_vm1, %v665_v38 }
 0xac2   :  { %v750_v39 = vpop.permute.xlu1 %749 }
 0xac3   :  { %752 = vst.msk [vmem:[#allocation2 + $0x2] sm:$0x3] %vm19_vm1, %v750_v39  ;;  %1479 = vst.msk [vmem:[%s2215_s4 + $0x18] sm:$0x3] %vm19_vm1, %v750_v39 }
 0xac6   :  { %v755_v40 = vld [vmem:[#allocation2] sm:$0x3] }
 0xac7   :  { %v756_v41 = vpack.c.bf16 %v755_v40, %v755_v40 }
 0xac9   :  { %1629 = vmatmul.mubr.msk.bf16.vlgmr.msra.gmra.mxu0 %vm60_vm2, %v756_v41 }
 0xaca   :  { %v840_v42 = vld [vmem:[#allocation2 + $0x2] sm:$0x3]  ;;  %1641 = vmatpush3.bf16.msra.mxu0 %v1832_v1  ;;  %1644 = vmatprep.mubr.msk.bf16.mxu0 %vm1798_vm0, %v1797_v0 }
 0xacb   :  { %v841_v43 = vpack.c.bf16 %v840_v42, %v840_v42  ;;  %1642 = vmatprep.subr.bf16.mxu0 %v1797_v0 }
 0xacd   :  { %1637 = vmatmul.mubr.msk.bf16.vlgmr.msra.gmra.mxu1 %vm60_vm2, %v841_v43 }
 0xace   :  { %1643 = vmatpush3.bf16.msra.mxu0 %v1847_v3  ;;  %1649 = vmatpush3.bf16.msra.mxu1 %v1837_v2 }
 0xacf   :  { %1650 = vmatprep.subr.bf16.mxu1 %v1797_v0  ;;  %1652 = vmatprep.mubr.msk.bf16.mxu1 %vm1798_vm0, %v1797_v0 }
 0xad0   :  { %1656 = vmatprep.subr.bf16.mxu0 %v1797_v0 }
 0xad2   :  { %1651 = vmatpush3.bf16.msra.mxu1 %v1854_v4 }
 0xad3   :  { %1664 = vmatprep.subr.bf16.mxu1 %v1797_v0 }
 0xb89   :  { %v794_v44 = vpop.f32.mrf.mxu0 }
 0xb8a   :  { %v809_v45 = vadd.f32 %v794_v44, %v1891_v13  ;;  %v802_v55 = vadd.f32 %v1481_v54, %v794_v44 }
 0xb8b   :  { %v1630_v46 = vpop.f32.mrf.mxu0 }
 0xb8c   :  { %811 = vrot.lane.b32.xlu0 %v809_v45, %s1799_s29  ;;  %v1482_v57 = vmul.f32 -1.442695, %v802_v55  ;;  %v1493_v45 = vld [vmem:[%s2214_s0 + $0x14] sm:$0x3] }
 0xb8d   :  { %v797_v47 = vpop.f32.mrf.mxu0  ;;  %v879_v48 = vpop.f32.mrf.mxu1 }
 0xb8e   :  { %v894_v49 = vadd.f32 %v879_v48, %v1893_v14  ;;  %v887_v58 = vadd.f32 %v1485_v56, %v879_v48  ;;  %1745 = vpow2.f32 %v1482_v57 }
 0xb8f   :  { %v1631_v50 = vpop.f32.mrf.mxu0  ;;  %v1638_v51 = vpop.f32.mrf.mxu1 }
 0xb90   :  { %896 = vrot.lane.b32.xlu1 %v894_v49, %s1799_s29  ;;  %v1486_v59 = vmul.f32 -1.442695, %v887_v58 }
 0xb91   :  { %v882_v52 = vpop.f32.mrf.mxu1 }
 0xb92   :  { %1747 = vpow2.f32 %v1486_v59 }
 0xb93   :  { %v1639_v53 = vpop.f32.mrf.mxu1 }
 0xb9b   :  { %v1746_v60 = vpop.eup %1745 }
 0xb9c   :  { %v806_v61 = vadd.f32 1.0, %v1746_v60 }
 0xb9e   :  { %1749 = vrcp.f32 %v806_v61 }
 0xb9f   :  { %v1748_v62 = vpop.eup %1747 }
 0xba0   :  { %v891_v63 = vadd.f32 1.0, %v1748_v62 }
 0xba2   :  { %1751 = vrcp.f32 %v891_v63 }
 0xbab   :  { %v1750_v5 = vpop.eup %1749 }
 0xbac   :  { %v821_v20 = vsub.f32 1.0, %v1750_v5 }
 0xbaf   :  { %v1752_v8 = vpop.eup %1751 }
 0xbb0   :  { %v906_v26 = vsub.f32 1.0, %v1752_v8 }
 0xbfe   :  { %v812_v6 = vpop.permute.xlu0 %811 }
 0xbff   :  { %v814_v7 = vmul.f32 %v1750_v5, %v812_v6 }
 0xc01   :  { %816 = vrot.lane.b32.xlu0 %v814_v7, %s1799_s29 }
 0xc02   :  { %v897_v9 = vpop.permute.xlu1 %896 }
 0xc03   :  { %v899_v10 = vmul.f32 %v1752_v8, %v897_v9 }
 0xc05   :  { %901 = vrot.lane.b32.xlu1 %v899_v10, %s1799_s29 }
 0xc09   :  { %828 = vrot.lane.b32.xlu1 %v755_v40, %s1800_s8 }
 0xc0d   :  { %913 = vrot.lane.b32.xlu1 %v840_v42, %s1800_s8 }
 0xc73   :  { %v817_v11 = vpop.permute.xlu0 %816 }
 0xc74   :  { %v819_v12 = vadd.f32 %v1481_v54, %v817_v11 }
 0xc76   :  { %1753 = vtanh.f32 %v819_v12 }
 0xc77   :  { %v902_v15 = vpop.permute.xlu1 %901 }
 0xc78   :  { %v904_v16 = vadd.f32 %v1485_v56, %v902_v15 }
 0xc7a   :  { %1755 = vtanh.f32 %v904_v16 }
 0xc7b   :  { %v829_v19 = vpop.permute.xlu1 %828 }
 0xc7c   :  { %v831_v22 = vmul.f32 %v1750_v5, %v829_v19 }
 0xc7f   :  { %v914_v24 = vpop.permute.xlu1 %913 }
 0xc80   :  { %v916_v28 = vmul.f32 %v1752_v8, %v914_v24 }
 0xc83   :  { %v1754_v17 = vpop.eup %1753 }
 0xc84   :  { %823 = vrot.lane.b32.xlu0 %v1754_v17, %s1801_s9 }
 0xc87   :  { %v1756_v18 = vpop.eup %1755 }
 0xc88   :  { %908 = vrot.lane.b32.xlu0 %v1756_v18, %s1801_s9 }
 0xcf6   :  { %v824_v21 = vpop.permute.xlu0 %823 }
 0xcf7   :  { %v826_v23 = vmul.f32 %v824_v21, %v821_v20 }
 0xcf9   :  { %v832_v25 = vadd.f32 %v831_v22, %v826_v23 }
 0xcfa   :  { %v909_v27 = vpop.permute.xlu0 %908 }
 0xcfb   :  { %v911_v29 = vmul.f32 %v909_v27, %v906_v26  ;;  %834 = vrot.lane.b32.xlu0 %v832_v25, %s1801_s9  ;;  %v1793_v25 = vld [vmem:[%s2211_s2 + $0x8] sm:$0xff]   ;;  %v1794_v27 = vld [vmem:[%s2211_s2] sm:$0xff]  }
 0xcfd   :  { %v917_v30 = vadd.f32 %v916_v28, %v911_v29  ;;  %v1795_v28 = vld [vmem:[%s2211_s2 + $0x18] sm:$0xff]   ;;  %v1796_v29 = vld [vmem:[%s2211_s2 + $0x10] sm:$0xff]  }
 0xcff   :  { %919 = vrot.lane.b32.xlu1 %v917_v30, %s1801_s9 }
 0xd6d   :  { %v835_v31 = vpop.permute.xlu0 %834 }
 0xd6e   :  { %837 = vst.msk [vmem:[#allocation2] sm:$0x3] %vm19_vm1, %v835_v31  ;;  %1483 = vst.msk [vmem:[%s2215_s4 + $0x8] sm:$0x3] %vm19_vm1, %v835_v31 }
 0xd71   :  { %v920_v32 = vpop.permute.xlu1 %919 }
 0xd72   :  { %922 = vst.msk [vmem:[#allocation2 + $0x2] sm:$0x3] %vm19_vm1, %v920_v32  ;;  %1487 = vst.msk [vmem:[%s2215_s4 + $0x16] sm:$0x3] %vm19_vm1, %v920_v32 }
 0xd75   :  { %v925_v33 = vld [vmem:[#allocation2] sm:$0x3] }
 0xd76   :  { %v926_v34 = vpack.c.bf16 %v925_v33, %v925_v33 }
 0xd78   :  { %1645 = vmatmul.mubr.msk.bf16.vlgmr.msra.gmra.mxu0 %vm60_vm2, %v926_v34 }
 0xd79   :  { %v1010_v35 = vld [vmem:[#allocation2 + $0x2] sm:$0x3]  ;;  %1657 = vmatpush3.bf16.msra.mxu0 %v1832_v1  ;;  %1660 = vmatprep.mubr.msk.bf16.mxu0 %vm1798_vm0, %v1797_v0 }
 0xd7a   :  { %v1011_v36 = vpack.c.bf16 %v1010_v35, %v1010_v35  ;;  %1658 = vmatprep.subr.bf16.mxu0 %v1797_v0 }
 0xd7c   :  { %1653 = vmatmul.mubr.msk.bf16.vlgmr.msra.gmra.mxu1 %vm60_vm2, %v1011_v36 }
 0xd7d   :  { %1659 = vmatpush3.bf16.msra.mxu0 %v1847_v3  ;;  %1665 = vmatpush3.bf16.msra.mxu1 %v1837_v2 }
 0xd7e   :  { %1666 = vmatprep.subr.bf16.mxu1 %v1797_v0  ;;  %1668 = vmatprep.mubr.msk.bf16.mxu1 %vm1798_vm0, %v1797_v0 }
 0xd7f   :  { %1672 = vmatprep.subr.bf16.mxu0 %v1797_v0 }
 0xd81   :  { %1667 = vmatpush3.bf16.msra.mxu1 %v1854_v4  ;;  %v1489_v4 = vld [vmem:[%s2214_s0 + $0xa] sm:$0x3] }
 0xd82   :  { %1680 = vmatprep.subr.bf16.mxu1 %v1797_v0 }
 0xe38   :  { %v964_v1 = vpop.f32.mrf.mxu0 }
 0xe39   :  { %v979_v37 = vadd.f32 %v964_v1, %v1891_v13  ;;  %v972_v44 = vadd.f32 %v1489_v4, %v964_v1 }
 0xe3a   :  { %v1646_v38 = vpop.f32.mrf.mxu0 }
 0xe3b   :  { %981 = vrot.lane.b32.xlu0 %v979_v37, %s1799_s29  ;;  %v1490_v46 = vmul.f32 -1.442695, %v972_v44  ;;  %v1497_v38 = vld [vmem:[%s2214_s0 + $0xc] sm:$0x3] }
 0xe3c   :  { %v967_v3 = vpop.f32.mrf.mxu0  ;;  %v1049_v39 = vpop.f32.mrf.mxu1 }
 0xe3d   :  { %v1064_v2 = vadd.f32 %v1049_v39, %v1893_v14  ;;  %v1057_v47 = vadd.f32 %v1493_v45, %v1049_v39  ;;  %1757 = vpow2.f32 %v1490_v46  ;;  %v1501_v39 = vld [vmem:[%s2214_s0 + $0x12] sm:$0x3] }
 0xe3e   :  { %v1647_v40 = vpop.f32.mrf.mxu0  ;;  %v1654_v41 = vpop.f32.mrf.mxu1 }
 0xe3f   :  { %1066 = vrot.lane.b32.xlu1 %v1064_v2, %s1799_s29  ;;  %v1494_v48 = vmul.f32 -1.442695, %v1057_v47 }
 0xe40   :  { %v1052_v42 = vpop.f32.mrf.mxu1 }
 0xe41   :  { %1759 = vpow2.f32 %v1494_v48 }
 0xe42   :  { %v1655_v43 = vpop.f32.mrf.mxu1 }
 0xe4a   :  { %v1758_v49 = vpop.eup %1757 }
 0xe4b   :  { %v976_v50 = vadd.f32 1.0, %v1758_v49 }
 0xe4d   :  { %1761 = vrcp.f32 %v976_v50 }
 0xe4e   :  { %v1760_v51 = vpop.eup %1759 }
 0xe4f   :  { %v1061_v52 = vadd.f32 1.0, %v1760_v51 }
 0xe51   :  { %1763 = vrcp.f32 %v1061_v52 }
 0xe5a   :  { %v1762_v53 = vpop.eup %1761 }
 0xe5b   :  { %v991_v7 = vsub.f32 1.0, %v1762_v53 }
 0xe5e   :  { %v1764_v56 = vpop.eup %1763 }
 0xe5f   :  { %v1076_v15 = vsub.f32 1.0, %v1764_v56 }
 0xead   :  { %v982_v54 = vpop.permute.xlu0 %981 }
 0xeae   :  { %v984_v55 = vmul.f32 %v1762_v53, %v982_v54 }
 0xeb0   :  { %986 = vrot.lane.b32.xlu0 %v984_v55, %s1799_s29 }
 0xeb1   :  { %v1067_v57 = vpop.permute.xlu1 %1066 }
 0xeb2   :  { %v1069_v58 = vmul.f32 %v1764_v56, %v1067_v57 }
 0xeb4   :  { %1071 = vrot.lane.b32.xlu1 %v1069_v58, %s1799_s29 }
 0xeb8   :  { %998 = vrot.lane.b32.xlu1 %v925_v33, %s1800_s8 }
 0xebc   :  { %1083 = vrot.lane.b32.xlu1 %v1010_v35, %s1800_s8 }
 0xf22   :  { %v987_v59 = vpop.permute.xlu0 %986 }
 0xf23   :  { %v989_v60 = vadd.f32 %v1489_v4, %v987_v59 }
 0xf25   :  { %1765 = vtanh.f32 %v989_v60 }
 0xf26   :  { %v1072_v61 = vpop.permute.xlu1 %1071 }
 0xf27   :  { %v1074_v62 = vadd.f32 %v1493_v45, %v1072_v61 }
 0xf29   :  { %1767 = vtanh.f32 %v1074_v62 }
 0xf2a   :  { %v999_v6 = vpop.permute.xlu1 %998 }
 0xf2b   :  { %v1001_v9 = vmul.f32 %v1762_v53, %v999_v6 }
 0xf2e   :  { %v1084_v11 = vpop.permute.xlu1 %1083 }
 0xf2f   :  { %v1086_v17 = vmul.f32 %v1764_v56, %v1084_v11 }
 0xf32   :  { %v1766_v63 = vpop.eup %1765 }
 0xf33   :  { %993 = vrot.lane.b32.xlu0 %v1766_v63, %s1801_s9 }
 0xf36   :  { %v1768_v5 = vpop.eup %1767 }
 0xf37   :  { %1078 = vrot.lane.b32.xlu0 %v1768_v5, %s1801_s9 }
 0xfa5   :  { %v994_v8 = vpop.permute.xlu0 %993 }
 0xfa6   :  { %v996_v10 = vmul.f32 %v994_v8, %v991_v7 }
 0xfa8   :  { %v1002_v12 = vadd.f32 %v1001_v9, %v996_v10 }
 0xfa9   :  { %v1079_v16 = vpop.permute.xlu0 %1078 }
 0xfaa   :  { %v1081_v18 = vmul.f32 %v1079_v16, %v1076_v15  ;;  %1004 = vrot.lane.b32.xlu0 %v1002_v12, %s1801_s9 }
 0xfac   :  { %v1087_v19 = vadd.f32 %v1086_v17, %v1081_v18 }
 0xfae   :  { %1089 = vrot.lane.b32.xlu1 %v1087_v19, %s1801_s9 }
0x101c   :  { %v1005_v20 = vpop.permute.xlu0 %1004 }
0x101d   :  { %1007 = vst.msk [vmem:[#allocation2] sm:$0x3] %vm19_vm1, %v1005_v20  ;;  %1491 = vst.msk [vmem:[%s2215_s4 + $0xa] sm:$0x3] %vm19_vm1, %v1005_v20 }
0x1020   :  { %v1090_v21 = vpop.permute.xlu1 %1089 }
0x1021   :  { %1092 = vst.msk [vmem:[#allocation2 + $0x2] sm:$0x3] %vm19_vm1, %v1090_v21  ;;  %1495 = vst.msk [vmem:[%s2215_s4 + $0x14] sm:$0x3] %vm19_vm1, %v1090_v21 }
0x1024   :  { %v1095_v22 = vld [vmem:[#allocation2] sm:$0x3] }
0x1025   :  { %v1096_v23 = vpack.c.bf16 %v1095_v22, %v1095_v22 }
0x1027   :  { %1661 = vmatmul.mubr.msk.bf16.vlgmr.msra.gmra.mxu0 %vm60_vm2, %v1096_v23 }
0x1028   :  { %v1180_v24 = vld [vmem:[#allocation2 + $0x2] sm:$0x3]  ;;  %1673 = vmatpush3.bf16.msra.mxu0 %v1793_v25  ;;  %1676 = vmatprep.mubr.msk.bf16.mxu0 %vm1798_vm0, %v1797_v0 }
0x1029   :  { %v1181_v26 = vpack.c.bf16 %v1180_v24, %v1180_v24  ;;  %1674 = vmatprep.subr.bf16.mxu0 %v1797_v0 }
0x102b   :  { %1669 = vmatmul.mubr.msk.bf16.vlgmr.msra.gmra.mxu1 %vm60_vm2, %v1181_v26 }
0x102c   :  { %1675 = vmatpush3.bf16.msra.mxu0 %v1794_v27  ;;  %1681 = vmatpush3.bf16.msra.mxu1 %v1795_v28  ;;  %v1505_v28 = vld [vmem:[%s2214_s0 + $0xe] sm:$0x3] }
0x102d   :  { %1682 = vmatprep.subr.bf16.mxu1 %v1797_v0  ;;  %1684 = vmatprep.mubr.msk.bf16.mxu1 %vm1798_vm0, %v1797_v0 }
0x1030   :  { %1683 = vmatpush3.bf16.msra.mxu1 %v1796_v29 }
0x10e7   :  { %v1134_v30 = vpop.f32.mrf.mxu0 }
0x10e8   :  { %v1149_v31 = vadd.f32 %v1134_v30, %v1891_v13  ;;  %v1142_v3 = vadd.f32 %v1497_v38, %v1134_v30 }
0x10e9   :  { %v1662_v32 = vpop.f32.mrf.mxu0 }
0x10ea   :  { %1151 = vrot.lane.b32.xlu0 %v1149_v31, %s1799_s29  ;;  %v1498_v2 = vmul.f32 -1.442695, %v1142_v3 }
0x10eb   :  { %v1137_v33 = vpop.f32.mrf.mxu0  ;;  %v1219_v34 = vpop.f32.mrf.mxu1 }
0x10ec   :  { %v1234_v35 = vadd.f32 %v1219_v34, %v1893_v14  ;;  %v1227_v40 = vadd.f32 %v1501_v39, %v1219_v34  ;;  %1769 = vpow2.f32 %v1498_v2 }
0x10ed   :  { %v1663_v36 = vpop.f32.mrf.mxu0  ;;  %v1670_v1 = vpop.f32.mrf.mxu1 }
0x10ee   :  { %1236 = vrot.lane.b32.xlu1 %v1234_v35, %s1799_s29  ;;  %v1502_v41 = vmul.f32 -1.442695, %v1227_v40 }
0x10ef   :  { %v1222_v0 = vpop.f32.mrf.mxu1 }
0x10f0   :  { %1771 = vpow2.f32 %v1502_v41 }
0x10f1   :  { %v1671_v37 = vpop.f32.mrf.mxu1 }
0x10f9   :  { %v1770_v42 = vpop.eup %1769 }
0x10fa   :  { %v1146_v43 = vadd.f32 1.0, %v1770_v42 }
0x10fc   :  { %1773 = vrcp.f32 %v1146_v43 }
0x10fd   :  { %v1772_v4 = vpop.eup %1771 }
0x10fe   :  { %v1231_v44 = vadd.f32 1.0, %v1772_v4 }
0x1100   :  { %1775 = vrcp.f32 %v1231_v44 }
0x1109   :  { %v1774_v45 = vpop.eup %1773 }
0x110a   :  { %v1161_v58 = vsub.f32 1.0, %v1774_v45 }
0x110d   :  { %v1776_v48 = vpop.eup %1775 }
0x110e   :  { %v1246_v5 = vsub.f32 1.0, %v1776_v48 }
0x115c   :  { %v1152_v46 = vpop.permute.xlu0 %1151 }
0x115d   :  { %v1154_v47 = vmul.f32 %v1774_v45, %v1152_v46 }
0x115f   :  { %1156 = vrot.lane.b32.xlu0 %v1154_v47, %s1799_s29 }
0x1160   :  { %v1237_v49 = vpop.permute.xlu1 %1236 }
0x1161   :  { %v1239_v50 = vmul.f32 %v1776_v48, %v1237_v49 }
0x1163   :  { %1241 = vrot.lane.b32.xlu1 %v1239_v50, %s1799_s29 }
0x1167   :  { %1168 = vrot.lane.b32.xlu1 %v1095_v22, %s1800_s8 }
0x116b   :  { %1253 = vrot.lane.b32.xlu1 %v1180_v24, %s1800_s8 }
0x11d1   :  { %v1157_v51 = vpop.permute.xlu0 %1156 }
0x11d2   :  { %v1159_v52 = vadd.f32 %v1497_v38, %v1157_v51 }
0x11d4   :  { %1777 = vtanh.f32 %v1159_v52 }
0x11d5   :  { %v1242_v53 = vpop.permute.xlu1 %1241 }
0x11d6   :  { %v1244_v54 = vadd.f32 %v1501_v39, %v1242_v53 }
0x11d8   :  { %1779 = vtanh.f32 %v1244_v54 }
0x11d9   :  { %v1169_v57 = vpop.permute.xlu1 %1168 }
0x11da   :  { %v1171_v60 = vmul.f32 %v1774_v45, %v1169_v57 }
0x11dd   :  { %v1254_v62 = vpop.permute.xlu1 %1253 }
0x11de   :  { %v1256_v7 = vmul.f32 %v1776_v48, %v1254_v62 }
0x11e1   :  { %v1778_v55 = vpop.eup %1777 }
0x11e2   :  { %1163 = vrot.lane.b32.xlu0 %v1778_v55, %s1801_s9 }
0x11e5   :  { %v1780_v56 = vpop.eup %1779 }
0x11e6   :  { %1248 = vrot.lane.b32.xlu0 %v1780_v56, %s1801_s9 }
0x1254   :  { %v1164_v59 = vpop.permute.xlu0 %1163 }
0x1255   :  { %v1166_v61 = vmul.f32 %v1164_v59, %v1161_v58 }
0x1257   :  { %v1172_v63 = vadd.f32 %v1171_v60, %v1166_v61 }
0x1258   :  { %v1249_v6 = vpop.permute.xlu0 %1248 }
0x1259   :  { %v1251_v8 = vmul.f32 %v1249_v6, %v1246_v5  ;;  %1174 = vrot.lane.b32.xlu0 %v1172_v63, %s1801_s9 }
0x125b   :  { %v1257_v9 = vadd.f32 %v1256_v7, %v1251_v8 }
0x125d   :  { %1259 = vrot.lane.b32.xlu1 %v1257_v9, %s1801_s9 }
0x12cb   :  { %v1175_v10 = vpop.permute.xlu0 %1174 }
0x12cc   :  { %1177 = vst.msk [vmem:[#allocation2] sm:$0x3] %vm19_vm1, %v1175_v10  ;;  %1499 = vst.msk [vmem:[%s2215_s4 + $0xc] sm:$0x3] %vm19_vm1, %v1175_v10 }
0x12cf   :  { %v1260_v11 = vpop.permute.xlu1 %1259 }
0x12d0   :  { %1262 = vst.msk [vmem:[#allocation2 + $0x2] sm:$0x3] %vm19_vm1, %v1260_v11  ;;  %1503 = vst.msk [vmem:[%s2215_s4 + $0x12] sm:$0x3] %vm19_vm1, %v1260_v11 }
0x12d3   :  { %v1265_v12 = vld [vmem:[#allocation2] sm:$0x3] }
0x12d4   :  { %v1266_v15 = vpack.c.bf16 %v1265_v12, %v1265_v12 }
0x12d6   :  { %1677 = vmatmul.mubr.msk.bf16.vlgmr.msra.gmra.mxu0 %vm60_vm2, %v1266_v15 }
0x12d7   :  { %v1350_v16 = vld [vmem:[#allocation2 + $0x2] sm:$0x3] }
0x12d8   :  { %v1351_v17 = vpack.c.bf16 %v1350_v16, %v1350_v16 }
0x12da   :  { %1685 = vmatmul.mubr.msk.bf16.vlgmr.msra.gmra.mxu1 %vm60_vm2, %v1351_v17 }
0x1396   :  { %v1304_v18 = vpop.f32.mrf.mxu0 }
0x1397   :  { %v1319_v19 = vadd.f32 %v1304_v18, %v1891_v13  ;;  %v1312_v29 = vadd.f32 %v1505_v28, %v1304_v18  ;;  %v1509_v13 = vld [vmem:[%s2214_s0 + $0x10] sm:$0x3] }
0x1398   :  { %v1678_v20 = vpop.f32.mrf.mxu0 }
0x1399   :  { %1321 = vrot.lane.b32.xlu0 %v1319_v19, %s1799_s29  ;;  %v1506_v30 = vmul.f32 -1.442695, %v1312_v29 }
0x139a   :  { %v1307_v21 = vpop.f32.mrf.mxu0  ;;  %v1389_v22 = vpop.f32.mrf.mxu1 }
0x139b   :  { %v1404_v23 = vadd.f32 %v1389_v22, %v1893_v14  ;;  %v1397_v31 = vadd.f32 %v1509_v13, %v1389_v22  ;;  %1781 = vpow2.f32 %v1506_v30 }
0x139c   :  { %v1679_v24 = vpop.f32.mrf.mxu0  ;;  %v1686_v25 = vpop.f32.mrf.mxu1 }
0x139d   :  { %1406 = vrot.lane.b32.xlu1 %v1404_v23, %s1799_s29  ;;  %v1510_v32 = vmul.f32 -1.442695, %v1397_v31 }
0x139e   :  { %v1392_v26 = vpop.f32.mrf.mxu1 }
0x139f   :  { %1783 = vpow2.f32 %v1510_v32 }
0x13a0   :  { %v1687_v27 = vpop.f32.mrf.mxu1 }
0x13a8   :  { %v1782_v14 = vpop.eup %1781 }
0x13a9   :  { %v1316_v33 = vadd.f32 1.0, %v1782_v14 }
0x13ab   :  { %1785 = vrcp.f32 %v1316_v33 }
0x13ac   :  { %v1784_v34 = vpop.eup %1783 }
0x13ad   :  { %v1401_v35 = vadd.f32 1.0, %v1784_v34 }
0x13af   :  { %1787 = vrcp.f32 %v1401_v35 }
0x13b8   :  { %v1786_v36 = vpop.eup %1785 }
0x13b9   :  { %v1331_v44 = vsub.f32 1.0, %v1786_v36 }
0x13bc   :  { %v1788_v37 = vpop.eup %1787 }
0x13bd   :  { %v1416_v50 = vsub.f32 1.0, %v1788_v37 }
0x140b   :  { %v1322_v1 = vpop.permute.xlu0 %1321 }
0x140c   :  { %v1324_v0 = vmul.f32 %v1786_v36, %v1322_v1 }
0x140e   :  { %1326 = vrot.lane.b32.xlu0 %v1324_v0, %s1799_s29 }
0x140f   :  { %v1407_v38 = vpop.permute.xlu1 %1406 }
0x1410   :  { %v1409_v3 = vmul.f32 %v1788_v37, %v1407_v38 }
0x1412   :  { %1411 = vrot.lane.b32.xlu1 %v1409_v3, %s1799_s29 }
0x1416   :  { %1338 = vrot.lane.b32.xlu1 %v1265_v12, %s1800_s8 }
0x141a   :  { %1423 = vrot.lane.b32.xlu1 %v1350_v16, %s1800_s8 }
0x1480   :  { %v1327_v39 = vpop.permute.xlu0 %1326 }
0x1481   :  { %v1329_v2 = vadd.f32 %v1505_v28, %v1327_v39 }
0x1483   :  { %1789 = vtanh.f32 %v1329_v2 }
0x1484   :  { %v1412_v40 = vpop.permute.xlu1 %1411 }
0x1485   :  { %v1414_v41 = vadd.f32 %v1509_v13, %v1412_v40 }
0x1487   :  { %1791 = vtanh.f32 %v1414_v41 }
0x1488   :  { %v1339_v4 = vpop.permute.xlu1 %1338 }
0x1489   :  { %v1341_v46 = vmul.f32 %v1786_v36, %v1339_v4 }
0x148c   :  { %v1424_v48 = vpop.permute.xlu1 %1423 }
0x148d   :  { %v1426_v52 = vmul.f32 %v1788_v37, %v1424_v48 }
0x1490   :  { %v1790_v42 = vpop.eup %1789 }
0x1491   :  { %1333 = vrot.lane.b32.xlu0 %v1790_v42, %s1801_s9 }
0x1494   :  { %v1792_v43 = vpop.eup %1791 }
0x1495   :  { %1418 = vrot.lane.b32.xlu0 %v1792_v43, %s1801_s9 }
0x1503   :  { %v1334_v45 = vpop.permute.xlu0 %1333 }
0x1504   :  { %v1336_v47 = vmul.f32 %v1334_v45, %v1331_v44 }
0x1506   :  { %v1342_v49 = vadd.f32 %v1341_v46, %v1336_v47 }
0x1507   :  { %v1419_v51 = vpop.permute.xlu0 %1418 }
0x1508   :  { %v1421_v53 = vmul.f32 %v1419_v51, %v1416_v50  ;;  %1344 = vrot.lane.b32.xlu0 %v1342_v49, %s1801_s9 }
0x150a   :  { %v1427_v54 = vadd.f32 %v1426_v52, %v1421_v53 }
0x150c   :  { %1429 = vrot.lane.b32.xlu1 %v1427_v54, %s1801_s9 }
0x157a   :  { %v1345_v55 = vpop.permute.xlu0 %1344 }
0x157b   :  { %1347 = vst.msk [vmem:[#allocation2] sm:$0x3] %vm19_vm1, %v1345_v55  ;;  %1507 = vst.msk [vmem:[%s2215_s4 + $0xe] sm:$0x3] %vm19_vm1, %v1345_v55 }
0x157e   :  { %v1430_v56 = vpop.permute.xlu1 %1429 }
0x157f   :  { %1432 = vst.msk [vmem:[#allocation2 + $0x2] sm:$0x3] %vm19_vm1, %v1430_v56  ;;  %1511 = vst.msk [vmem:[%s2215_s4 + $0x10] sm:$0x3] %vm19_vm1, %v1430_v56 }

</bundles_post_ra>
